<compile_context>
chip_gen: v7x
topology: tpu7x:2x2x1
jax: 0.10.0
libtpu: 0.0.40
codegen_flags: <defaults>
</compile_context>

<pallas_src>
import jax
import jax.numpy as jnp
from jax.experimental import pallas as pl
from jax.experimental.pallas import tpu as pltpu

EPS = 1e-5


# --------------------------------------------------------------------------- #
# In-kernel helpers
# --------------------------------------------------------------------------- #
def _zero_halo(pad_ref):
    """Zero the 1-pixel halo of the (H+2, C, W+2) padded-image scratch."""
    Hp2, C, Wp2 = pad_ref.shape
    H, W = Hp2 - 2, Wp2 - 2
    dt = pad_ref.dtype
    pad_ref[0:1, :, :] = jnp.zeros((1, C, Wp2), dt)
    pad_ref[H + 1:H + 2, :, :] = jnp.zeros((1, C, Wp2), dt)
    pad_ref[:, :, 0:1] = jnp.zeros((Hp2, C, 1), dt)
    pad_ref[:, :, W + 1:W + 2] = jnp.zeros((Hp2, C, 1), dt)


def _conv_band(pad_ref, slab_ref, w_ref, b_ref, r):
    """3x3 'same' conv of one row band as a single im2col MXU matmul.

    pad_ref : (H+2, C, W+2) zero-padded image (compute dtype), persistent
    slab_ref: (9*C, TH*W)   im2col slab scratch (compute dtype)
    w_ref   : (Cout, 9*C)   weights, columns ordered (dy, dx, c)
    b_ref   : (Cout, 1)     bias (f32)
    r       : row-band index (pl.program_id(1))
    returns : (Cout, TH*W)  float32
    """
    Hp2, C, Wp2 = pad_ref.shape
    W = Wp2 - 2
    TH = slab_ref.shape[1] // W
    r0 = r * TH
    # One full-width padded-row read per (dy, local row); the three dx taps
    # are cheap lane slices of that row (3x fewer scratch reads than per-tap).
    for dy in range(3):
        for i in range(TH):
            row = pad_ref[r0 + dy + i]                       # (C, W+2)
            for dx in range(3):
                t = dy * 3 + dx
                slab_ref[t * C:(t + 1) * C, i * W:(i + 1) * W] = row[:, dx:dx + W]
    acc = jnp.dot(w_ref[...], slab_ref[...],
                  preferred_element_type=jnp.float32)        # (Cout, TH*W)
    return acc + b_ref[...]


def _band_stats(acc):
    """Two-pass per-band statistics: per-channel mean and centered M2."""
    inv = 1.0 / acc.shape[1]
    mean = jnp.sum(acc, axis=1, keepdims=True) * inv         # (Cout, 1)
    d = acc - mean
    m2 = jnp.sum(d * d, axis=1, keepdims=True)               # (Cout, 1)
    return mean, m2


# --------------------------------------------------------------------------- #
# Kernels
# --------------------------------------------------------------------------- #
def _conv1_kernel(x_ref, w_ref, b_ref, y_ref, st_ref, pad_ref, slab_ref):
    # x_ref: (1, Cin, H, W)  y_ref: (1, Cout, TH*W)  st_ref: (1, 1, Cout, 2)
    r = pl.program_id(1)
    Hp2, _, Wp2 = pad_ref.shape
    H, W = Hp2 - 2, Wp2 - 2

    @pl.when(r == 0)
    def _():
        _zero_halo(pad_ref)
        for i in range(H):                                   # fill interior once/image
            pad_ref[1 + i, :, 1:W + 1] = x_ref[0, :, i, :].astype(pad_ref.dtype)

    acc = _conv_band(pad_ref, slab_ref, w_ref, b_ref, r)
    mean, m2 = _band_stats(acc)
    y_ref[0] = acc.astype(y_ref.dtype)
    st_ref[0, 0, :, 0:1] = mean
    st_ref[0, 0, :, 1:2] = m2


def _bn_relu_conv2_kernel(y1_ref, sc_ref, sh_ref, w_ref, b_ref,
                          y2_ref, st_ref, pad_ref, slab_ref):
    # y1_ref: (1, Cout, H*W) full image; sc/sh: (Cout, 1) folded BN1 scale/shift.
    r = pl.program_id(1)
    Hp2, _, Wp2 = pad_ref.shape
    H, W = Hp2 - 2, Wp2 - 2

    @pl.when(r == 0)
    def _():
        _zero_halo(pad_ref)
        h = jnp.maximum(y1_ref[0].astype(jnp.float32) * sc_ref[...] + sh_ref[...],
                        0.0)                                 # BN1 + ReLU, (Cout, H*W)
        hb = h.astype(pad_ref.dtype)
        for i in range(H):
            pad_ref[1 + i, :, 1:W + 1] = hb[:, i * W:(i + 1) * W]

    acc = _conv_band(pad_ref, slab_ref, w_ref, b_ref, r)
    mean, m2 = _band_stats(acc)
    y2_ref[0] = acc.astype(y2_ref.dtype)
    st_ref[0, 0, :, 0:1] = mean
    st_ref[0, 0, :, 1:2] = m2


def _bn_relu_kernel(y_ref, sc_ref, sh_ref, o_ref):
    o_ref[0] = jnp.maximum(y_ref[0].astype(jnp.float32) * sc_ref[...] + sh_ref[...],
                           0.0).astype(o_ref.dtype)


# --------------------------------------------------------------------------- #
# Wrapper helpers
# --------------------------------------------------------------------------- #
def _vmem_limit_bytes():
    """Per-generation scoped-VMEM limit with headroom for double-buffered I/O."""
    cap = 64 * 1024 * 1024
    try:
        cap = int(getattr(pltpu.get_tpu_info(), "vmem_capacity_bytes", cap))
    except Exception:
        pass
    return max(32 * 1024 * 1024, min(3 * cap // 4, 100 * 1024 * 1024))


def _pick_row_band(H, W, band_elems):
    """Largest row-band TH dividing H with lane-dense (TH*W % 128 == 0) blocks."""
    best = None
    for th in range(1, H + 1):
        if H % th:
            continue
        lane = th * W
        if lane % 128 != 0 and th != H:      # block last dim must be %128 or full
            continue
        if lane <= band_elems and (best is None or th > best):
            best = th
    return best if best is not None else H   # full image is always a legal block


def _bn_affine(stats, gamma, beta, m_per_block):
    """Merge per-band (mean, M2) with Chan's formula and fold gamma/beta into
    per-channel scale/shift (training-mode BatchNorm, biased variance)."""
    cout = stats.shape[-2]
    st = stats.reshape(-1, cout, 2)
    means, m2s = st[:, :, 0], st[:, :, 1]                     # (NB, Cout)
    nb = means.shape[0]
    mean = jnp.mean(means, axis=0)                            # (Cout,)
    ss = jnp.sum(m2s, axis=0) + m_per_block * jnp.sum((means - mean[None, :]) ** 2,
                                                      axis=0)
    var = ss / (nb * m_per_block)
    scale = gamma * jax.lax.rsqrt(var + EPS)
    shift = beta - mean * scale
    return (scale.reshape(-1, 1).astype(jnp.float32),
            shift.reshape(-1, 1).astype(jnp.float32))


# --------------------------------------------------------------------------- #
# Forward
# --------------------------------------------------------------------------- #
def double_conv(x_nchw, params, *, compute_dtype=jnp.bfloat16, band_elems=2048):
    """x_nchw: (N, Cin, H, W) float32. Returns (N, Cout, H, W) float32."""
    w1, b1, g1, be1, w2, b2, g2, be2 = params
    N, Cin, H, W = x_nchw.shape
    Cout = w1.shape[-1]
    M = H * W
    TH = _pick_row_band(H, W, band_elems)
    RB = H // TH
    BW = TH * W                                               # band lane width

    x = x_nchw.astype(jnp.float32)
    # im2col weights: (3,3,Ci,Co) -> (Co, 9*Ci), columns ordered (dy, dx, c)
    w1m = w1.reshape(9 * Cin, Cout).T.astype(compute_dtype)
    w2m = w2.reshape(9 * Cout, Cout).T.astype(compute_dtype)
    col = lambda v: v.reshape(-1, 1).astype(jnp.float32)

    vlim = _vmem_limit_bytes()
    cp_conv = pltpu.CompilerParams(
        dimension_semantics=("parallel", "arbitrary"), vmem_limit_bytes=vlim)
    cp_ew = pltpu.CompilerParams(
        dimension_semantics=("parallel", "parallel"), vmem_limit_bytes=vlim)

    def full(shape):
        zeros = (0,) * len(shape)
        return pl.BlockSpec(shape, lambda n, r, _z=zeros: _z)

    x_spec = pl.BlockSpec((1, Cin, H, W), lambda n, r: (n, 0, 0, 0))
    band_spec = pl.BlockSpec((1, Cout, BW), lambda n, r: (n, 0, r))
    img_spec = pl.BlockSpec((1, Cout, M), lambda n, r: (n, 0, 0))
    st_spec = pl.BlockSpec((1, 1, Cout, 2), lambda n, r: (n, r, 0, 0))

    esize = jnp.dtype(compute_dtype).itemsize

    # ---- stage 1: conv1 (+bias) and per-band BN1 statistics ----
    y1, st1 = pl.pallas_call(
        _conv1_kernel,
        grid=(N, RB),
        in_specs=[x_spec, full((Cout, 9 * Cin)), full((Cout, 1))],
        out_specs=(band_spec, st_spec),
        out_shape=(jax.ShapeDtypeStruct((N, Cout, M), compute_dtype),
                   jax.ShapeDtypeStruct((N, RB, Cout, 2), jnp.float32)),
        scratch_shapes=[pltpu.VMEM((H + 2, Cin, W + 2), compute_dtype),
                        pltpu.VMEM((9 * Cin, BW), compute_dtype)],
        compiler_params=cp_conv,
        cost_estimate=pl.CostEstimate(
            flops=2 * N * M * 9 * Cin * Cout, transcendentals=0,
            bytes_accessed=4 * N * M * Cin + esize * (N * M * Cout + 9 * Cin * Cout)
            + 4 * N * RB * 2 * Cout),
    )(x, w1m, col(b1))

    scale1, shift1 = _bn_affine(st1, g1, be1, BW)

    # ---- stage 2: BN1 + ReLU + conv2 (+bias) and per-band BN2 statistics ----
    y2, st2 = pl.pallas_call(
        _bn_relu_conv2_kernel,
        grid=(N, RB),
        in_specs=[img_spec, full((Cout, 1)), full((Cout, 1)),
                  full((Cout, 9 * Cout)), full((Cout, 1))],
        out_specs=(band_spec, st_spec),
        out_shape=(jax.ShapeDtypeStruct((N, Cout, M), compute_dtype),
                   jax.ShapeDtypeStruct((N, RB, Cout, 2), jnp.float32)),
        scratch_shapes=[pltpu.VMEM((H + 2, Cout, W + 2), compute_dtype),
                        pltpu.VMEM((9 * Cout, BW), compute_dtype)],
        compiler_params=cp_conv,
        cost_estimate=pl.CostEstimate(
            flops=2 * N * M * 9 * Cout * Cout, transcendentals=0,
            bytes_accessed=esize * (2 * N * M * Cout + 9 * Cout * Cout)
            + 4 * N * RB * 2 * Cout),
    )(y1, scale1, shift1, w2m, col(b2))

    scale2, shift2 = _bn_affine(st2, g2, be2, BW)

    # ---- stage 3: BN2 + ReLU (elementwise, lane-dense blocks) ----
    out = pl.pallas_call(
        _bn_relu_kernel,
        grid=(N, RB),
        in_specs=[band_spec, full((Cout, 1)), full((Cout, 1))],
        out_specs=band_spec,
        out_shape=jax.ShapeDtypeStruct((N, Cout, M), jnp.float32),
        compiler_params=cp_ew,
    )(y2, scale2, shift2)

    # (N, Cout, H*W) -> NCHW is a metadata-only reshape (no relayout glue).
    return out.reshape(N, Cout, H, W)


# --------------------------------------------------------------------------- #
# Pure-JAX reference (PyTorch training-mode forward semantics)
# --------------------------------------------------------------------------- #
def double_conv_reference(x_nchw, params):
    w1, b1, g1, be1, w2, b2, g2, be2 = params

    def conv(x, w, b):
        w_oihw = jnp.transpose(w, (3, 2, 0, 1))
        y = jax.lax.conv_general_dilated(
            x, w_oihw, window_strides=(1, 1), padding=((1, 1), (1, 1)),
            dimension_numbers=('NCHW', 'OIHW', 'NCHW'),
            precision=jax.lax.Precision.HIGHEST)
        return y + b.reshape(1, -1, 1, 1)

    def bn_relu(x, g, be):
        m = jnp.mean(x, axis=(0, 2, 3), keepdims=True)
        v = jnp.mean((x - m) ** 2, axis=(0, 2, 3), keepdims=True)
        y = (x - m) * jax.lax.rsqrt(v + EPS)
        y = y * g.reshape(1, -1, 1, 1) + be.reshape(1, -1, 1, 1)
        return jnp.maximum(y, 0.0)

    y = bn_relu(conv(x_nchw, w1, b1), g1, be1)
    y = bn_relu(conv(y, w2, b2), g2, be2)
    return y


def init_params(key, in_channels, out_channels):
    ks = jax.random.split(key, 8)
    w1 = 0.1 * jax.random.normal(ks[0], (3, 3, in_channels, out_channels), jnp.float32)
    b1 = 0.1 * jax.random.normal(ks[1], (out_channels,), jnp.float32)
    g1 = 1.0 + 0.1 * jax.random.normal(ks[2], (out_channels,), jnp.float32)
    be1 = 0.1 * jax.random.normal(ks[3], (out_channels,), jnp.float32)
    w2 = 0.1 * jax.random.normal(ks[4], (3, 3, out_channels, out_channels), jnp.float32)
    b2 = 0.1 * jax.random.normal(ks[5], (out_channels,), jnp.float32)
    g2 = 1.0 + 0.1 * jax.random.normal(ks[6], (out_channels,), jnp.float32)
    be2 = 0.1 * jax.random.normal(ks[7], (out_channels,), jnp.float32)
    return (w1, b1, g1, be1, w2, b2, g2, be2)


if __name__ == "__main__":
    key = jax.random.PRNGKey(0)
    k_x, k_p = jax.random.split(key)

    N, Cin, Cout, H, W = 2, 4, 8, 16, 16
    x = jax.random.normal(k_x, (N, Cin, H, W), jnp.float32)   # NCHW like PyTorch
    params = init_params(k_p, Cin, Cout)

    ref = jax.block_until_ready(double_conv_reference(x, params))

    # band_elems=128 forces 2 row bands per 16x16 image so the multi-band path
    # (persistent pad scratch, Chan merge across 4 blocks) is exercised.

    # 1) strict numerical check with f32 MXU operands / intermediates
    f32_fn = jax.jit(lambda a, p: double_conv(a, p, compute_dtype=jnp.float32,
                                              band_elems=128))
    out_f32 = jax.block_until_ready(f32_fn(x, params))
    assert out_f32.shape == (N, Cout, H, W)
    err32 = float(jnp.max(jnp.abs(out_f32 - ref)))
    assert err32 < 1e-3, f"f32 path max err {err32}"

    # 2) fast path: bf16 MXU operands + bf16 inter-stage activations
    bf16_fn = jax.jit(lambda a, p: double_conv(a, p, band_elems=128))
    out_bf16 = jax.block_until_ready(bf16_fn(x, params))
    assert out_bf16.shape == (N, Cout, H, W)
    errbf = float(jnp.max(jnp.abs(out_bf16 - ref)))
    assert errbf < 1.2e-1, f"bf16 path max err {errbf}"   # bf16 MXU rounding bound

    print("KERNEL_OK")
</pallas_src>

<mosaic_0001>
module attributes {stable_mosaic.version = 11 : i64} {
  func.func @_bn_relu_kernel(%arg0: i32, %arg1: i32, %arg2: memref<1x8x128xf32, #tpu.memory_space<vmem>>, %arg3: memref<8x1xf32, #tpu.memory_space<vmem>>, %arg4: memref<8x1xf32, #tpu.memory_space<vmem>>, %arg5: memref<1x8x128xf32, #tpu.memory_space<vmem>>) attributes {dimension_semantics = [#tpu.dimension_semantics<parallel>, #tpu.dimension_semantics<parallel>], iteration_bounds = array<i64: 2, 2>, scalar_prefetch = 0 : i64, scratch_operands = 0 : i64, tpu.core_type = #tpu.core_type<tc>, window_params = [{transform_indices = @transform_0, window_bounds = array<i64: 1, 8, 128>}, {pipeline_mode = #tpu.pipeline_mode<synchronous>, transform_indices = @transform_1, window_bounds = array<i64: 8, 1>}, {pipeline_mode = #tpu.pipeline_mode<synchronous>, transform_indices = @transform_2, window_bounds = array<i64: 8, 1>}, {transform_indices = @transform_3, window_bounds = array<i64: 1, 8, 128>}]} {
    %c0 = arith.constant 0 : index
    %c0_0 = arith.constant 0 : index
    %c0_1 = arith.constant 0 : index
    %0 = vector.load %arg2[%c0, %c0_0, %c0_1] : memref<1x8x128xf32, #tpu.memory_space<vmem>>, vector<1x8x128xf32>
    %1 = vector.shape_cast %0 : vector<1x8x128xf32> to vector<8x128xf32>
    %c0_2 = arith.constant 0 : index
    %c0_3 = arith.constant 0 : index
    %2 = vector.load %arg3[%c0_2, %c0_3] : memref<8x1xf32, #tpu.memory_space<vmem>>, vector<8x1xf32>
    %3 = vector.broadcast %2 : vector<8x1xf32> to vector<8x128xf32>
    %4 = arith.mulf %1, %3 : vector<8x128xf32>
    %c0_4 = arith.constant 0 : index
    %c0_5 = arith.constant 0 : index
    %5 = vector.load %arg4[%c0_4, %c0_5] : memref<8x1xf32, #tpu.memory_space<vmem>>, vector<8x1xf32>
    %6 = vector.broadcast %5 : vector<8x1xf32> to vector<8x128xf32>
    %7 = arith.addf %4, %6 : vector<8x128xf32>
    %cst = arith.constant 0.000000e+00 : f32
    %8 = vector.broadcast %cst : f32 to vector<8x128xf32>
    %9 = arith.maximumf %7, %8 : vector<8x128xf32>
    %c0_6 = arith.constant 0 : index
    %c0_7 = arith.constant 0 : index
    %c0_8 = arith.constant 0 : index
    %10 = vector.load %arg5[%c0_6, %c0_7, %c0_8] : memref<1x8x128xf32, #tpu.memory_space<vmem>>, vector<1x8x128xf32>
    %11 = vector.shape_cast %10 : vector<1x8x128xf32> to vector<8x128xf32>
    %12 = vector.shape_cast %9 : vector<8x128xf32> to vector<1x8x128xf32>
    tpu.vector_store %arg5[%c0_6, %c0_7, %c0_8], %12 {strides = array<i32>} : memref<1x8x128xf32, #tpu.memory_space<vmem>>, vector<1x8x128xf32>,
    return
  }
  func.func @transform_0(%arg0: i32, %arg1: i32) -> (i32, i32, i32) {
    %c0_i32 = arith.constant 0 : i32
    %c0_i32_0 = arith.constant 0 : i32
    return %arg0, %c0_i32, %arg1 : i32, i32, i32
  }
  func.func @transform_1(%arg0: i32, %arg1: i32) -> (i32, i32) {
    %c0_i32 = arith.constant 0 : i32
    %c0_i32_0 = arith.constant 0 : i32
    %c0_i32_1 = arith.constant 0 : i32
    return %c0_i32, %c0_i32_0 : i32, i32
  }
  func.func @transform_2(%arg0: i32, %arg1: i32) -> (i32, i32) {
    %c0_i32 = arith.constant 0 : i32
    %c0_i32_0 = arith.constant 0 : i32
    %c0_i32_1 = arith.constant 0 : i32
    return %c0_i32, %c0_i32_0 : i32, i32
  }
  func.func @transform_3(%arg0: i32, %arg1: i32) -> (i32, i32, i32) {
    %c0_i32 = arith.constant 0 : i32
    %c0_i32_0 = arith.constant 0 : i32
    return %arg0, %c0_i32, %arg1 : i32, i32, i32
  }
}

module attributes {stable_mosaic.version = 11 : i64} {
  func.func @_conv1_kernel(%arg0: i32, %arg1: i32, %arg2: memref<1x4x16x16xf32, #tpu.memory_space<vmem>>, %arg3: memref<8x36xf32, #tpu.memory_space<vmem>>, %arg4: memref<8x1xf32, #tpu.memory_space<vmem>>, %arg5: memref<1x8x128xf32, #tpu.memory_space<vmem>>, %arg6: memref<1x1x8x2xf32, #tpu.memory_space<vmem>>, %arg7: memref<18x4x18xf32, #tpu.memory_space<vmem>>, %arg8: memref<36x128xf32, #tpu.memory_space<vmem>>) attributes {dimension_semantics = [#tpu.dimension_semantics<parallel>, #tpu.dimension_semantics<arbitrary>], iteration_bounds = array<i64: 2, 2>, scalar_prefetch = 0 : i64, scratch_operands = 2 : i64, tpu.core_type = #tpu.core_type<tc>, window_params = [{transform_indices = @transform_0, window_bounds = array<i64: 1, 4, 16, 16>}, {pipeline_mode = #tpu.pipeline_mode<synchronous>, transform_indices = @transform_1, window_bounds = array<i64: 8, 36>}, {pipeline_mode = #tpu.pipeline_mode<synchronous>, transform_indices = @transform_2, window_bounds = array<i64: 8, 1>}, {transform_indices = @transform_3, window_bounds = array<i64: 1, 8, 128>}, {transform_indices = @transform_4, window_bounds = array<i64: 1, 1, 8, 2>}]} {
    %c0_i32 = arith.constant 0 : i32
    %0 = arith.cmpi eq, %arg1, %c0_i32 : i32
    %1 = arith.extui %0 : i1 to i32
    %c0_i32_0 = arith.constant 0 : i32
    %2 = arith.cmpi ne, %1, %c0_i32_0 : i32
    scf.if %2 {
      %cst_239 = arith.constant 0.000000e+00 : f32
      %292 = vector.broadcast %cst_239 : f32 to vector<1x4x18xf32>
      %c0_240 = arith.constant 0 : index
      %c0_241 = arith.constant 0 : index
      %c0_242 = arith.constant 0 : index
      %293 = vector.load %arg7[%c0_240, %c0_241, %c0_242] : memref<18x4x18xf32, #tpu.memory_space<vmem>>, vector<1x4x18xf32>
      tpu.vector_store %arg7[%c0_240, %c0_241, %c0_242], %292 {strides = array<i32>} : memref<18x4x18xf32, #tpu.memory_space<vmem>>, vector<1x4x18xf32>,
      %cst_243 = arith.constant 0.000000e+00 : f32
      %294 = vector.broadcast %cst_243 : f32 to vector<1x4x18xf32>
      %c17 = arith.constant 17 : index
      %c0_244 = arith.constant 0 : index
      %c0_245 = arith.constant 0 : index
      %295 = vector.load %arg7[%c17, %c0_244, %c0_245] : memref<18x4x18xf32, #tpu.memory_space<vmem>>, vector<1x4x18xf32>
      tpu.vector_store %arg7[%c17, %c0_244, %c0_245], %294 {strides = array<i32>} : memref<18x4x18xf32, #tpu.memory_space<vmem>>, vector<1x4x18xf32>,
      %cst_246 = arith.constant 0.000000e+00 : f32
      %296 = vector.broadcast %cst_246 : f32 to vector<18x4x1xf32>
      %c0_247 = arith.constant 0 : index
      %c0_248 = arith.constant 0 : index
      %c0_249 = arith.constant 0 : index
      %297 = vector.load %arg7[%c0_247, %c0_248, %c0_249] : memref<18x4x18xf32, #tpu.memory_space<vmem>>, vector<18x4x1xf32>
      tpu.vector_store %arg7[%c0_247, %c0_248, %c0_249], %296 {strides = array<i32>} : memref<18x4x18xf32, #tpu.memory_space<vmem>>, vector<18x4x1xf32>,
      %cst_250 = arith.constant 0.000000e+00 : f32
      %298 = vector.broadcast %cst_250 : f32 to vector<18x4x1xf32>
      %c0_251 = arith.constant 0 : index
      %c0_252 = arith.constant 0 : index
      %c17_253 = arith.constant 17 : index
      %299 = vector.load %arg7[%c0_251, %c0_252, %c17_253] : memref<18x4x18xf32, #tpu.memory_space<vmem>>, vector<18x4x1xf32>
      tpu.vector_store %arg7[%c0_251, %c0_252, %c17_253], %298 {strides = array<i32>} : memref<18x4x18xf32, #tpu.memory_space<vmem>>, vector<18x4x1xf32>,
      %c0_254 = arith.constant 0 : index
      %c0_255 = arith.constant 0 : index
      %c0_256 = arith.constant 0 : index
      %c0_257 = arith.constant 0 : index
      %300 = vector.load %arg2[%c0_254, %c0_255, %c0_256, %c0_257] : memref<1x4x16x16xf32, #tpu.memory_space<vmem>>, vector<1x4x1x16xf32>
      %301 = vector.shape_cast %300 : vector<1x4x1x16xf32> to vector<4x16xf32>
      %c1_258 = arith.constant 1 : index
      %c0_259 = arith.constant 0 : index
      %c1_260 = arith.constant 1 : index
      %302 = vector.load %arg7[%c1_258, %c0_259, %c1_260] : memref<18x4x18xf32, #tpu.memory_space<vmem>>, vector<1x4x16xf32>
      %303 = vector.shape_cast %302 : vector<1x4x16xf32> to vector<4x16xf32>
      %304 = vector.shape_cast %301 : vector<4x16xf32> to vector<1x4x16xf32>
      tpu.vector_store %arg7[%c1_258, %c0_259, %c1_260], %304 {strides = array<i32>} : memref<18x4x18xf32, #tpu.memory_space<vmem>>, vector<1x4x16xf32>,
      %c0_261 = arith.constant 0 : index
      %c0_262 = arith.constant 0 : index
      %c1_263 = arith.constant 1 : index
      %c0_264 = arith.constant 0 : index
      %305 = vector.load %arg2[%c0_261, %c0_262, %c1_263, %c0_264] : memref<1x4x16x16xf32, #tpu.memory_space<vmem>>, vector<1x4x1x16xf32>
      %306 = vector.shape_cast %305 : vector<1x4x1x16xf32> to vector<4x16xf32>
      %c2 = arith.constant 2 : index
      %c0_265 = arith.constant 0 : index
      %c1_266 = arith.constant 1 : index
      %307 = vector.load %arg7[%c2, %c0_265, %c1_266] : memref<18x4x18xf32, #tpu.memory_space<vmem>>, vector<1x4x16xf32>
      %308 = vector.shape_cast %307 : vector<1x4x16xf32> to vector<4x16xf32>
      %309 = vector.shape_cast %306 : vector<4x16xf32> to vector<1x4x16xf32>
      tpu.vector_store %arg7[%c2, %c0_265, %c1_266], %309 {strides = array<i32>} : memref<18x4x18xf32, #tpu.memory_space<vmem>>, vector<1x4x16xf32>,
      %c0_267 = arith.constant 0 : index
      %c0_268 = arith.constant 0 : index
      %c2_269 = arith.constant 2 : index
      %c0_270 = arith.constant 0 : index
      %310 = vector.load %arg2[%c0_267, %c0_268, %c2_269, %c0_270] : memref<1x4x16x16xf32, #tpu.memory_space<vmem>>, vector<1x4x1x16xf32>
      %311 = vector.shape_cast %310 : vector<1x4x1x16xf32> to vector<4x16xf32>
      %c3 = arith.constant 3 : index
      %c0_271 = arith.constant 0 : index
      %c1_272 = arith.constant 1 : index
      %312 = vector.load %arg7[%c3, %c0_271, %c1_272] : memref<18x4x18xf32, #tpu.memory_space<vmem>>, vector<1x4x16xf32>
      %313 = vector.shape_cast %312 : vector<1x4x16xf32> to vector<4x16xf32>
      %314 = vector.shape_cast %311 : vector<4x16xf32> to vector<1x4x16xf32>
      tpu.vector_store %arg7[%c3, %c0_271, %c1_272], %314 {strides = array<i32>} : memref<18x4x18xf32, #tpu.memory_space<vmem>>, vector<1x4x16xf32>,
      %c0_273 = arith.constant 0 : index
      %c0_274 = arith.constant 0 : index
      %c3_275 = arith.constant 3 : index
      %c0_276 = arith.constant 0 : index
      %315 = vector.load %arg2[%c0_273, %c0_274, %c3_275, %c0_276] : memref<1x4x16x16xf32, #tpu.memory_space<vmem>>, vector<1x4x1x16xf32>
      %316 = vector.shape_cast %315 : vector<1x4x1x16xf32> to vector<4x16xf32>
      %c4_277 = arith.constant 4 : index
      %c0_278 = arith.constant 0 : index
      %c1_279 = arith.constant 1 : index
      %317 = vector.load %arg7[%c4_277, %c0_278, %c1_279] : memref<18x4x18xf32, #tpu.memory_space<vmem>>, vector<1x4x16xf32>
      %318 = vector.shape_cast %317 : vector<1x4x16xf32> to vector<4x16xf32>
      %319 = vector.shape_cast %316 : vector<4x16xf32> to vector<1x4x16xf32>
      tpu.vector_store %arg7[%c4_277, %c0_278, %c1_279], %319 {strides = array<i32>} : memref<18x4x18xf32, #tpu.memory_space<vmem>>, vector<1x4x16xf32>,
      %c0_280 = arith.constant 0 : index
      %c0_281 = arith.constant 0 : index
      %c4_282 = arith.constant 4 : index
      %c0_283 = arith.constant 0 : index
      %320 = vector.load %arg2[%c0_280, %c0_281, %c4_282, %c0_283] : memref<1x4x16x16xf32, #tpu.memory_space<vmem>>, vector<1x4x1x16xf32>
      %321 = vector.shape_cast %320 : vector<1x4x1x16xf32> to vector<4x16xf32>
      %c5 = arith.constant 5 : index
      %c0_284 = arith.constant 0 : index
      %c1_285 = arith.constant 1 : index
      %322 = vector.load %arg7[%c5, %c0_284, %c1_285] : memref<18x4x18xf32, #tpu.memory_space<vmem>>, vector<1x4x16xf32>
      %323 = vector.shape_cast %322 : vector<1x4x16xf32> to vector<4x16xf32>
      %324 = vector.shape_cast %321 : vector<4x16xf32> to vector<1x4x16xf32>
      tpu.vector_store %arg7[%c5, %c0_284, %c1_285], %324 {strides = array<i32>} : memref<18x4x18xf32, #tpu.memory_space<vmem>>, vector<1x4x16xf32>,
      %c0_286 = arith.constant 0 : index
      %c0_287 = arith.constant 0 : index
      %c5_288 = arith.constant 5 : index
      %c0_289 = arith.constant 0 : index
      %325 = vector.load %arg2[%c0_286, %c0_287, %c5_288, %c0_289] : memref<1x4x16x16xf32, #tpu.memory_space<vmem>>, vector<1x4x1x16xf32>
      %326 = vector.shape_cast %325 : vector<1x4x1x16xf32> to vector<4x16xf32>
      %c6 = arith.constant 6 : index
      %c0_290 = arith.constant 0 : index
      %c1_291 = arith.constant 1 : index
      %327 = vector.load %arg7[%c6, %c0_290, %c1_291] : memref<18x4x18xf32, #tpu.memory_space<vmem>>, vector<1x4x16xf32>
      %328 = vector.shape_cast %327 : vector<1x4x16xf32> to vector<4x16xf32>
      %329 = vector.shape_cast %326 : vector<4x16xf32> to vector<1x4x16xf32>
      tpu.vector_store %arg7[%c6, %c0_290, %c1_291], %329 {strides = array<i32>} : memref<18x4x18xf32, #tpu.memory_space<vmem>>, vector<1x4x16xf32>,
      %c0_292 = arith.constant 0 : index
      %c0_293 = arith.constant 0 : index
      %c6_294 = arith.constant 6 : index
      %c0_295 = arith.constant 0 : index
      %330 = vector.load %arg2[%c0_292, %c0_293, %c6_294, %c0_295] : memref<1x4x16x16xf32, #tpu.memory_space<vmem>>, vector<1x4x1x16xf32>
      %331 = vector.shape_cast %330 : vector<1x4x1x16xf32> to vector<4x16xf32>
      %c7 = arith.constant 7 : index
      %c0_296 = arith.constant 0 : index
      %c1_297 = arith.constant 1 : index
      %332 = vector.load %arg7[%c7, %c0_296, %c1_297] : memref<18x4x18xf32, #tpu.memory_space<vmem>>, vector<1x4x16xf32>
      %333 = vector.shape_cast %332 : vector<1x4x16xf32> to vector<4x16xf32>
      %334 = vector.shape_cast %331 : vector<4x16xf32> to vector<1x4x16xf32>
      tpu.vector_store %arg7[%c7, %c0_296, %c1_297], %334 {strides = array<i32>} : memref<18x4x18xf32, #tpu.memory_space<vmem>>, vector<1x4x16xf32>,
      %c0_298 = arith.constant 0 : index
      %c0_299 = arith.constant 0 : index
      %c7_300 = arith.constant 7 : index
      %c0_301 = arith.constant 0 : index
      %335 = vector.load %arg2[%c0_298, %c0_299, %c7_300, %c0_301] : memref<1x4x16x16xf32, #tpu.memory_space<vmem>>, vector<1x4x1x16xf32>
      %336 = vector.shape_cast %335 : vector<1x4x1x16xf32> to vector<4x16xf32>
      %c8_302 = arith.constant 8 : index
      %c0_303 = arith.constant 0 : index
      %c1_304 = arith.constant 1 : index
      %337 = vector.load %arg7[%c8_302, %c0_303, %c1_304] : memref<18x4x18xf32, #tpu.memory_space<vmem>>, vector<1x4x16xf32>
      %338 = vector.shape_cast %337 : vector<1x4x16xf32> to vector<4x16xf32>
      %339 = vector.shape_cast %336 : vector<4x16xf32> to vector<1x4x16xf32>
      tpu.vector_store %arg7[%c8_302, %c0_303, %c1_304], %339 {strides = array<i32>} : memref<18x4x18xf32, #tpu.memory_space<vmem>>, vector<1x4x16xf32>,
      %c0_305 = arith.constant 0 : index
      %c0_306 = arith.constant 0 : index
      %c8_307 = arith.constant 8 : index
      %c0_308 = arith.constant 0 : index
      %340 = vector.load %arg2[%c0_305, %c0_306, %c8_307, %c0_308] : memref<1x4x16x16xf32, #tpu.memory_space<vmem>>, vector<1x4x1x16xf32>
      %341 = vector.shape_cast %340 : vector<1x4x1x16xf32> to vector<4x16xf32>
      %c9 = arith.constant 9 : index
      %c0_309 = arith.constant 0 : index
      %c1_310 = arith.constant 1 : index
      %342 = vector.load %arg7[%c9, %c0_309, %c1_310] : memref<18x4x18xf32, #tpu.memory_space<vmem>>, vector<1x4x16xf32>
      %343 = vector.shape_cast %342 : vector<1x4x16xf32> to vector<4x16xf32>
      %344 = vector.shape_cast %341 : vector<4x16xf32> to vector<1x4x16xf32>
      tpu.vector_store %arg7[%c9, %c0_309, %c1_310], %344 {strides = array<i32>} : memref<18x4x18xf32, #tpu.memory_space<vmem>>, vector<1x4x16xf32>,
      %c0_311 = arith.constant 0 : index
      %c0_312 = arith.constant 0 : index
      %c9_313 = arith.constant 9 : index
      %c0_314 = arith.constant 0 : index
      %345 = vector.load %arg2[%c0_311, %c0_312, %c9_313, %c0_314] : memref<1x4x16x16xf32, #tpu.memory_space<vmem>>, vector<1x4x1x16xf32>
      %346 = vector.shape_cast %345 : vector<1x4x1x16xf32> to vector<4x16xf32>
      %c10 = arith.constant 10 : index
      %c0_315 = arith.constant 0 : index
      %c1_316 = arith.constant 1 : index
      %347 = vector.load %arg7[%c10, %c0_315, %c1_316] : memref<18x4x18xf32, #tpu.memory_space<vmem>>, vector<1x4x16xf32>
      %348 = vector.shape_cast %347 : vector<1x4x16xf32> to vector<4x16xf32>
      %349 = vector.shape_cast %346 : vector<4x16xf32> to vector<1x4x16xf32>
      tpu.vector_store %arg7[%c10, %c0_315, %c1_316], %349 {strides = array<i32>} : memref<18x4x18xf32, #tpu.memory_space<vmem>>, vector<1x4x16xf32>,
      %c0_317 = arith.constant 0 : index
      %c0_318 = arith.constant 0 : index
      %c10_319 = arith.constant 10 : index
      %c0_320 = arith.constant 0 : index
      %350 = vector.load %arg2[%c0_317, %c0_318, %c10_319, %c0_320] : memref<1x4x16x16xf32, #tpu.memory_space<vmem>>, vector<1x4x1x16xf32>
      %351 = vector.shape_cast %350 : vector<1x4x1x16xf32> to vector<4x16xf32>
      %c11 = arith.constant 11 : index
      %c0_321 = arith.constant 0 : index
      %c1_322 = arith.constant 1 : index
      %352 = vector.load %arg7[%c11, %c0_321, %c1_322] : memref<18x4x18xf32, #tpu.memory_space<vmem>>, vector<1x4x16xf32>
      %353 = vector.shape_cast %352 : vector<1x4x16xf32> to vector<4x16xf32>
      %354 = vector.shape_cast %351 : vector<4x16xf32> to vector<1x4x16xf32>
      tpu.vector_store %arg7[%c11, %c0_321, %c1_322], %354 {strides = array<i32>} : memref<18x4x18xf32, #tpu.memory_space<vmem>>, vector<1x4x16xf32>,
      %c0_323 = arith.constant 0 : index
      %c0_324 = arith.constant 0 : index
      %c11_325 = arith.constant 11 : index
      %c0_326 = arith.constant 0 : index
      %355 = vector.load %arg2[%c0_323, %c0_324, %c11_325, %c0_326] : memref<1x4x16x16xf32, #tpu.memory_space<vmem>>, vector<1x4x1x16xf32>
      %356 = vector.shape_cast %355 : vector<1x4x1x16xf32> to vector<4x16xf32>
      %c12_327 = arith.constant 12 : index
      %c0_328 = arith.constant 0 : index
      %c1_329 = arith.constant 1 : index
      %357 = vector.load %arg7[%c12_327, %c0_328, %c1_329] : memref<18x4x18xf32, #tpu.memory_space<vmem>>, vector<1x4x16xf32>
      %358 = vector.shape_cast %357 : vector<1x4x16xf32> to vector<4x16xf32>
      %359 = vector.shape_cast %356 : vector<4x16xf32> to vector<1x4x16xf32>
      tpu.vector_store %arg7[%c12_327, %c0_328, %c1_329], %359 {strides = array<i32>} : memref<18x4x18xf32, #tpu.memory_space<vmem>>, vector<1x4x16xf32>,
      %c0_330 = arith.constant 0 : index
      %c0_331 = arith.constant 0 : index
      %c12_332 = arith.constant 12 : index
      %c0_333 = arith.constant 0 : index
      %360 = vector.load %arg2[%c0_330, %c0_331, %c12_332, %c0_333] : memref<1x4x16x16xf32, #tpu.memory_space<vmem>>, vector<1x4x1x16xf32>
      %361 = vector.shape_cast %360 : vector<1x4x1x16xf32> to vector<4x16xf32>
      %c13 = arith.constant 13 : index
      %c0_334 = arith.constant 0 : index
      %c1_335 = arith.constant 1 : index
      %362 = vector.load %arg7[%c13, %c0_334, %c1_335] : memref<18x4x18xf32, #tpu.memory_space<vmem>>, vector<1x4x16xf32>
      %363 = vector.shape_cast %362 : vector<1x4x16xf32> to vector<4x16xf32>
      %364 = vector.shape_cast %361 : vector<4x16xf32> to vector<1x4x16xf32>
      tpu.vector_store %arg7[%c13, %c0_334, %c1_335], %364 {strides = array<i32>} : memref<18x4x18xf32, #tpu.memory_space<vmem>>, vector<1x4x16xf32>,
      %c0_336 = arith.constant 0 : index
      %c0_337 = arith.constant 0 : index
      %c13_338 = arith.constant 13 : index
      %c0_339 = arith.constant 0 : index
      %365 = vector.load %arg2[%c0_336, %c0_337, %c13_338, %c0_339] : memref<1x4x16x16xf32, #tpu.memory_space<vmem>>, vector<1x4x1x16xf32>
      %366 = vector.shape_cast %365 : vector<1x4x1x16xf32> to vector<4x16xf32>
      %c14 = arith.constant 14 : index
      %c0_340 = arith.constant 0 : index
      %c1_341 = arith.constant 1 : index
      %367 = vector.load %arg7[%c14, %c0_340, %c1_341] : memref<18x4x18xf32, #tpu.memory_space<vmem>>, vector<1x4x16xf32>
      %368 = vector.shape_cast %367 : vector<1x4x16xf32> to vector<4x16xf32>
      %369 = vector.shape_cast %366 : vector<4x16xf32> to vector<1x4x16xf32>
      tpu.vector_store %arg7[%c14, %c0_340, %c1_341], %369 {strides = array<i32>} : memref<18x4x18xf32, #tpu.memory_space<vmem>>, vector<1x4x16xf32>,
      %c0_342 = arith.constant 0 : index
      %c0_343 = arith.constant 0 : index
      %c14_344 = arith.constant 14 : index
      %c0_345 = arith.constant 0 : index
      %370 = vector.load %arg2[%c0_342, %c0_343, %c14_344, %c0_345] : memref<1x4x16x16xf32, #tpu.memory_space<vmem>>, vector<1x4x1x16xf32>
      %371 = vector.shape_cast %370 : vector<1x4x1x16xf32> to vector<4x16xf32>
      %c15 = arith.constant 15 : index
      %c0_346 = arith.constant 0 : index
      %c1_347 = arith.constant 1 : index
      %372 = vector.load %arg7[%c15, %c0_346, %c1_347] : memref<18x4x18xf32, #tpu.memory_space<vmem>>, vector<1x4x16xf32>
      %373 = vector.shape_cast %372 : vector<1x4x16xf32> to vector<4x16xf32>
      %374 = vector.shape_cast %371 : vector<4x16xf32> to vector<1x4x16xf32>
      tpu.vector_store %arg7[%c15, %c0_346, %c1_347], %374 {strides = array<i32>} : memref<18x4x18xf32, #tpu.memory_space<vmem>>, vector<1x4x16xf32>,
      %c0_348 = arith.constant 0 : index
      %c0_349 = arith.constant 0 : index
      %c15_350 = arith.constant 15 : index
      %c0_351 = arith.constant 0 : index
      %375 = vector.load %arg2[%c0_348, %c0_349, %c15_350, %c0_351] : memref<1x4x16x16xf32, #tpu.memory_space<vmem>>, vector<1x4x1x16xf32>
      %376 = vector.shape_cast %375 : vector<1x4x1x16xf32> to vector<4x16xf32>
      %c16_352 = arith.constant 16 : index
      %c0_353 = arith.constant 0 : index
      %c1_354 = arith.constant 1 : index
      %377 = vector.load %arg7[%c16_352, %c0_353, %c1_354] : memref<18x4x18xf32, #tpu.memory_space<vmem>>, vector<1x4x16xf32>
      %378 = vector.shape_cast %377 : vector<1x4x16xf32> to vector<4x16xf32>
      %379 = vector.shape_cast %376 : vector<4x16xf32> to vector<1x4x16xf32>
      tpu.vector_store %arg7[%c16_352, %c0_353, %c1_354], %379 {strides = array<i32>} : memref<18x4x18xf32, #tpu.memory_space<vmem>>, vector<1x4x16xf32>,
    } else {
    }
    %c8_i32 = arith.constant 8 : i32
    %3 = arith.muli %arg1, %c8_i32 : i32
    %c0_i32_1 = arith.constant 0 : i32
    %4 = arith.addi %3, %c0_i32_1 : i32
    %c0_i32_2 = arith.constant 0 : i32
    %5 = arith.addi %4, %c0_i32_2 : i32
    %6 = arith.index_cast %5 : i32 to index
    %c0 = arith.constant 0 : index
    %c0_3 = arith.constant 0 : index
    %7 = vector.load %arg7[%6, %c0, %c0_3] : memref<18x4x18xf32, #tpu.memory_space<vmem>>, vector<1x4x18xf32>
    %8 = vector.shape_cast %7 : vector<1x4x18xf32> to vector<4x18xf32>
    %9 = vector.extract_strided_slice %8 {offsets = [0, 0], sizes = [4, 16], strides = [1, 1]} : vector<4x18xf32> to vector<4x16xf32>
    %c0_4 = arith.constant 0 : index
    %c0_5 = arith.constant 0 : index
    %10 = vector.load %arg8[%c0_4, %c0_5] : memref<36x128xf32, #tpu.memory_space<vmem>>, vector<4x16xf32>
    tpu.vector_store %arg8[%c0_4, %c0_5], %9 {strides = array<i32>} : memref<36x128xf32, #tpu.memory_space<vmem>>, vector<4x16xf32>,
    %11 = vector.extract_strided_slice %8 {offsets = [0, 1], sizes = [4, 16], strides = [1, 1]} : vector<4x18xf32> to vector<4x16xf32>
    %c4 = arith.constant 4 : index
    %c0_6 = arith.constant 0 : index
    %12 = vector.load %arg8[%c4, %c0_6] : memref<36x128xf32, #tpu.memory_space<vmem>>, vector<4x16xf32>
    tpu.vector_store %arg8[%c4, %c0_6], %11 {strides = array<i32>} : memref<36x128xf32, #tpu.memory_space<vmem>>, vector<4x16xf32>,
    %13 = vector.extract_strided_slice %8 {offsets = [0, 2], sizes = [4, 16], strides = [1, 1]} : vector<4x18xf32> to vector<4x16xf32>
    %c8 = arith.constant 8 : index
    %c0_7 = arith.constant 0 : index
    %14 = vector.load %arg8[%c8, %c0_7] : memref<36x128xf32, #tpu.memory_space<vmem>>, vector<4x16xf32>
    tpu.vector_store %arg8[%c8, %c0_7], %13 {strides = array<i32>} : memref<36x128xf32, #tpu.memory_space<vmem>>, vector<4x16xf32>,
    %c0_i32_8 = arith.constant 0 : i32
    %15 = arith.addi %3, %c0_i32_8 : i32
    %c1_i32 = arith.constant 1 : i32
    %16 = arith.addi %15, %c1_i32 : i32
    %17 = arith.index_cast %16 : i32 to index
    %c0_9 = arith.constant 0 : index
    %c0_10 = arith.constant 0 : index
    %18 = vector.load %arg7[%17, %c0_9, %c0_10] : memref<18x4x18xf32, #tpu.memory_space<vmem>>, vector<1x4x18xf32>
    %19 = vector.shape_cast %18 : vector<1x4x18xf32> to vector<4x18xf32>
    %20 = vector.extract_strided_slice %19 {offsets = [0, 0], sizes = [4, 16], strides = [1, 1]} : vector<4x18xf32> to vector<4x16xf32>
    %c0_11 = arith.constant 0 : index
    %c16 = arith.constant 16 : index
    %21 = vector.load %arg8[%c0_11, %c16] : memref<36x128xf32, #tpu.memory_space<vmem>>, vector<4x16xf32>
    tpu.vector_store %arg8[%c0_11, %c16], %20 {strides = array<i32>} : memref<36x128xf32, #tpu.memory_space<vmem>>, vector<4x16xf32>,
    %22 = vector.extract_strided_slice %19 {offsets = [0, 1], sizes = [4, 16], strides = [1, 1]} : vector<4x18xf32> to vector<4x16xf32>
    %c4_12 = arith.constant 4 : index
    %c16_13 = arith.constant 16 : index
    %23 = vector.load %arg8[%c4_12, %c16_13] : memref<36x128xf32, #tpu.memory_space<vmem>>, vector<4x16xf32>
    tpu.vector_store %arg8[%c4_12, %c16_13], %22 {strides = array<i32>} : memref<36x128xf32, #tpu.memory_space<vmem>>, vector<4x16xf32>,
    %24 = vector.extract_strided_slice %19 {offsets = [0, 2], sizes = [4, 16], strides = [1, 1]} : vector<4x18xf32> to vector<4x16xf32>
    %c8_14 = arith.constant 8 : index
    %c16_15 = arith.constant 16 : index
    %25 = vector.load %arg8[%c8_14, %c16_15] : memref<36x128xf32, #tpu.memory_space<vmem>>, vector<4x16xf32>
    tpu.vector_store %arg8[%c8_14, %c16_15], %24 {strides = array<i32>} : memref<36x128xf32, #tpu.memory_space<vmem>>, vector<4x16xf32>,
    %c0_i32_16 = arith.constant 0 : i32
    %26 = arith.addi %3, %c0_i32_16 : i32
    %c2_i32 = arith.constant 2 : i32
    %27 = arith.addi %26, %c2_i32 : i32
    %28 = arith.index_cast %27 : i32 to index
    %c0_17 = arith.constant 0 : index
    %c0_18 = arith.constant 0 : index
    %29 = vector.load %arg7[%28, %c0_17, %c0_18] : memref<18x4x18xf32, #tpu.memory_space<vmem>>, vector<1x4x18xf32>
    %30 = vector.shape_cast %29 : vector<1x4x18xf32> to vector<4x18xf32>
    %31 = vector.extract_strided_slice %30 {offsets = [0, 0], sizes = [4, 16], strides = [1, 1]} : vector<4x18xf32> to vector<4x16xf32>
    %c0_19 = arith.constant 0 : index
    %c32 = arith.constant 32 : index
    %32 = vector.load %arg8[%c0_19, %c32] : memref<36x128xf32, #tpu.memory_space<vmem>>, vector<4x16xf32>
    tpu.vector_store %arg8[%c0_19, %c32], %31 {strides = array<i32>} : memref<36x128xf32, #tpu.memory_space<vmem>>, vector<4x16xf32>,
    %33 = vector.extract_strided_slice %30 {offsets = [0, 1], sizes = [4, 16], strides = [1, 1]} : vector<4x18xf32> to vector<4x16xf32>
    %c4_20 = arith.constant 4 : index
    %c32_21 = arith.constant 32 : index
    %34 = vector.load %arg8[%c4_20, %c32_21] : memref<36x128xf32, #tpu.memory_space<vmem>>, vector<4x16xf32>
    tpu.vector_store %arg8[%c4_20, %c32_21], %33 {strides = array<i32>} : memref<36x128xf32, #tpu.memory_space<vmem>>, vector<4x16xf32>,
    %35 = vector.extract_strided_slice %30 {offsets = [0, 2], sizes = [4, 16], strides = [1, 1]} : vector<4x18xf32> to vector<4x16xf32>
    %c8_22 = arith.constant 8 : index
    %c32_23 = arith.constant 32 : index
    %36 = vector.load %arg8[%c8_22, %c32_23] : memref<36x128xf32, #tpu.memory_space<vmem>>, vector<4x16xf32>
    tpu.vector_store %arg8[%c8_22, %c32_23], %35 {strides = array<i32>} : memref<36x128xf32, #tpu.memory_space<vmem>>, vector<4x16xf32>,
    %c0_i32_24 = arith.constant 0 : i32
    %37 = arith.addi %3, %c0_i32_24 : i32
    %c3_i32 = arith.constant 3 : i32
    %38 = arith.addi %37, %c3_i32 : i32
    %39 = arith.index_cast %38 : i32 to index
    %c0_25 = arith.constant 0 : index
    %c0_26 = arith.constant 0 : index
    %40 = vector.load %arg7[%39, %c0_25, %c0_26] : memref<18x4x18xf32, #tpu.memory_space<vmem>>, vector<1x4x18xf32>
    %41 = vector.shape_cast %40 : vector<1x4x18xf32> to vector<4x18xf32>
    %42 = vector.extract_strided_slice %41 {offsets = [0, 0], sizes = [4, 16], strides = [1, 1]} : vector<4x18xf32> to vector<4x16xf32>
    %c0_27 = arith.constant 0 : index
    %c48 = arith.constant 48 : index
    %43 = vector.load %arg8[%c0_27, %c48] : memref<36x128xf32, #tpu.memory_space<vmem>>, vector<4x16xf32>
    tpu.vector_store %arg8[%c0_27, %c48], %42 {strides = array<i32>} : memref<36x128xf32, #tpu.memory_space<vmem>>, vector<4x16xf32>,
    %44 = vector.extract_strided_slice %41 {offsets = [0, 1], sizes = [4, 16], strides = [1, 1]} : vector<4x18xf32> to vector<4x16xf32>
    %c4_28 = arith.constant 4 : index
    %c48_29 = arith.constant 48 : index
    %45 = vector.load %arg8[%c4_28, %c48_29] : memref<36x128xf32, #tpu.memory_space<vmem>>, vector<4x16xf32>
    tpu.vector_store %arg8[%c4_28, %c48_29], %44 {strides = array<i32>} : memref<36x128xf32, #tpu.memory_space<vmem>>, vector<4x16xf32>,
    %46 = vector.extract_strided_slice %41 {offsets = [0, 2], sizes = [4, 16], strides = [1, 1]} : vector<4x18xf32> to vector<4x16xf32>
    %c8_30 = arith.constant 8 : index
    %c48_31 = arith.constant 48 : index
    %47 = vector.load %arg8[%c8_30, %c48_31] : memref<36x128xf32, #tpu.memory_space<vmem>>, vector<4x16xf32>
    tpu.vector_store %arg8[%c8_30, %c48_31], %46 {strides = array<i32>} : memref<36x128xf32, #tpu.memory_space<vmem>>, vector<4x16xf32>,
    %c0_i32_32 = arith.constant 0 : i32
    %48 = arith.addi %3, %c0_i32_32 : i32
    %c4_i32 = arith.constant 4 : i32
    %49 = arith.addi %48, %c4_i32 : i32
    %50 = arith.index_cast %49 : i32 to index
    %c0_33 = arith.constant 0 : index
    %c0_34 = arith.constant 0 : index
    %51 = vector.load %arg7[%50, %c0_33, %c0_34] : memref<18x4x18xf32, #tpu.memory_space<vmem>>, vector<1x4x18xf32>
    %52 = vector.shape_cast %51 : vector<1x4x18xf32> to vector<4x18xf32>
    %53 = vector.extract_strided_slice %52 {offsets = [0, 0], sizes = [4, 16], strides = [1, 1]} : vector<4x18xf32> to vector<4x16xf32>
    %c0_35 = arith.constant 0 : index
    %c64 = arith.constant 64 : index
    %54 = vector.load %arg8[%c0_35, %c64] : memref<36x128xf32, #tpu.memory_space<vmem>>, vector<4x16xf32>
    tpu.vector_store %arg8[%c0_35, %c64], %53 {strides = array<i32>} : memref<36x128xf32, #tpu.memory_space<vmem>>, vector<4x16xf32>,
    %55 = vector.extract_strided_slice %52 {offsets = [0, 1], sizes = [4, 16], strides = [1, 1]} : vector<4x18xf32> to vector<4x16xf32>
    %c4_36 = arith.constant 4 : index
    %c64_37 = arith.constant 64 : index
    %56 = vector.load %arg8[%c4_36, %c64_37] : memref<36x128xf32, #tpu.memory_space<vmem>>, vector<4x16xf32>
    tpu.vector_store %arg8[%c4_36, %c64_37], %55 {strides = array<i32>} : memref<36x128xf32, #tpu.memory_space<vmem>>, vector<4x16xf32>,
    %57 = vector.extract_strided_slice %52 {offsets = [0, 2], sizes = [4, 16], strides = [1, 1]} : vector<4x18xf32> to vector<4x16xf32>
    %c8_38 = arith.constant 8 : index
    %c64_39 = arith.constant 64 : index
    %58 = vector.load %arg8[%c8_38, %c64_39] : memref<36x128xf32, #tpu.memory_space<vmem>>, vector<4x16xf32>
    tpu.vector_store %arg8[%c8_38, %c64_39], %57 {strides = array<i32>} : memref<36x128xf32, #tpu.memory_space<vmem>>, vector<4x16xf32>,
    %c0_i32_40 = arith.constant 0 : i32
    %59 = arith.addi %3, %c0_i32_40 : i32
    %c5_i32 = arith.constant 5 : i32
    %60 = arith.addi %59, %c5_i32 : i32
    %61 = arith.index_cast %60 : i32 to index
    %c0_41 = arith.constant 0 : index
    %c0_42 = arith.constant 0 : index
    %62 = vector.load %arg7[%61, %c0_41, %c0_42] : memref<18x4x18xf32, #tpu.memory_space<vmem>>, vector<1x4x18xf32>
    %63 = vector.shape_cast %62 : vector<1x4x18xf32> to vector<4x18xf32>
    %64 = vector.extract_strided_slice %63 {offsets = [0, 0], sizes = [4, 16], strides = [1, 1]} : vector<4x18xf32> to vector<4x16xf32>
    %c0_43 = arith.constant 0 : index
    %c80 = arith.constant 80 : index
    %65 = vector.load %arg8[%c0_43, %c80] : memref<36x128xf32, #tpu.memory_space<vmem>>, vector<4x16xf32>
    tpu.vector_store %arg8[%c0_43, %c80], %64 {strides = array<i32>} : memref<36x128xf32, #tpu.memory_space<vmem>>, vector<4x16xf32>,
    %66 = vector.extract_strided_slice %63 {offsets = [0, 1], sizes = [4, 16], strides = [1, 1]} : vector<4x18xf32> to vector<4x16xf32>
    %c4_44 = arith.constant 4 : index
    %c80_45 = arith.constant 80 : index
    %67 = vector.load %arg8[%c4_44, %c80_45] : memref<36x128xf32, #tpu.memory_space<vmem>>, vector<4x16xf32>
    tpu.vector_store %arg8[%c4_44, %c80_45], %66 {strides = array<i32>} : memref<36x128xf32, #tpu.memory_space<vmem>>, vector<4x16xf32>,
    %68 = vector.extract_strided_slice %63 {offsets = [0, 2], sizes = [4, 16], strides = [1, 1]} : vector<4x18xf32> to vector<4x16xf32>
    %c8_46 = arith.constant 8 : index
    %c80_47 = arith.constant 80 : index
    %69 = vector.load %arg8[%c8_46, %c80_47] : memref<36x128xf32, #tpu.memory_space<vmem>>, vector<4x16xf32>
    tpu.vector_store %arg8[%c8_46, %c80_47], %68 {strides = array<i32>} : memref<36x128xf32, #tpu.memory_space<vmem>>, vector<4x16xf32>,
    %c0_i32_48 = arith.constant 0 : i32
    %70 = arith.addi %3, %c0_i32_48 : i32
    %c6_i32 = arith.constant 6 : i32
    %71 = arith.addi %70, %c6_i32 : i32
    %72 = arith.index_cast %71 : i32 to index
    %c0_49 = arith.constant 0 : index
    %c0_50 = arith.constant 0 : index
    %73 = vector.load %arg7[%72, %c0_49, %c0_50] : memref<18x4x18xf32, #tpu.memory_space<vmem>>, vector<1x4x18xf32>
    %74 = vector.shape_cast %73 : vector<1x4x18xf32> to vector<4x18xf32>
    %75 = vector.extract_strided_slice %74 {offsets = [0, 0], sizes = [4, 16], strides = [1, 1]} : vector<4x18xf32> to vector<4x16xf32>
    %c0_51 = arith.constant 0 : index
    %c96 = arith.constant 96 : index
    %76 = vector.load %arg8[%c0_51, %c96] : memref<36x128xf32, #tpu.memory_space<vmem>>, vector<4x16xf32>
    tpu.vector_store %arg8[%c0_51, %c96], %75 {strides = array<i32>} : memref<36x128xf32, #tpu.memory_space<vmem>>, vector<4x16xf32>,
    %77 = vector.extract_strided_slice %74 {offsets = [0, 1], sizes = [4, 16], strides = [1, 1]} : vector<4x18xf32> to vector<4x16xf32>
    %c4_52 = arith.constant 4 : index
    %c96_53 = arith.constant 96 : index
    %78 = vector.load %arg8[%c4_52, %c96_53] : memref<36x128xf32, #tpu.memory_space<vmem>>, vector<4x16xf32>
    tpu.vector_store %arg8[%c4_52, %c96_53], %77 {strides = array<i32>} : memref<36x128xf32, #tpu.memory_space<vmem>>, vector<4x16xf32>,
    %79 = vector.extract_strided_slice %74 {offsets = [0, 2], sizes = [4, 16], strides = [1, 1]} : vector<4x18xf32> to vector<4x16xf32>
    %c8_54 = arith.constant 8 : index
    %c96_55 = arith.constant 96 : index
    %80 = vector.load %arg8[%c8_54, %c96_55] : memref<36x128xf32, #tpu.memory_space<vmem>>, vector<4x16xf32>
    tpu.vector_store %arg8[%c8_54, %c96_55], %79 {strides = array<i32>} : memref<36x128xf32, #tpu.memory_space<vmem>>, vector<4x16xf32>,
    %c0_i32_56 = arith.constant 0 : i32
    %81 = arith.addi %3, %c0_i32_56 : i32
    %c7_i32 = arith.constant 7 : i32
    %82 = arith.addi %81, %c7_i32 : i32
    %83 = arith.index_cast %82 : i32 to index
    %c0_57 = arith.constant 0 : index
    %c0_58 = arith.constant 0 : index
    %84 = vector.load %arg7[%83, %c0_57, %c0_58] : memref<18x4x18xf32, #tpu.memory_space<vmem>>, vector<1x4x18xf32>
    %85 = vector.shape_cast %84 : vector<1x4x18xf32> to vector<4x18xf32>
    %86 = vector.extract_strided_slice %85 {offsets = [0, 0], sizes = [4, 16], strides = [1, 1]} : vector<4x18xf32> to vector<4x16xf32>
    %c0_59 = arith.constant 0 : index
    %c112 = arith.constant 112 : index
    %87 = vector.load %arg8[%c0_59, %c112] : memref<36x128xf32, #tpu.memory_space<vmem>>, vector<4x16xf32>
    tpu.vector_store %arg8[%c0_59, %c112], %86 {strides = array<i32>} : memref<36x128xf32, #tpu.memory_space<vmem>>, vector<4x16xf32>,
    %88 = vector.extract_strided_slice %85 {offsets = [0, 1], sizes = [4, 16], strides = [1, 1]} : vector<4x18xf32> to vector<4x16xf32>
    %c4_60 = arith.constant 4 : index
    %c112_61 = arith.constant 112 : index
    %89 = vector.load %arg8[%c4_60, %c112_61] : memref<36x128xf32, #tpu.memory_space<vmem>>, vector<4x16xf32>
    tpu.vector_store %arg8[%c4_60, %c112_61], %88 {strides = array<i32>} : memref<36x128xf32, #tpu.memory_space<vmem>>, vector<4x16xf32>,
    %90 = vector.extract_strided_slice %85 {offsets = [0, 2], sizes = [4, 16], strides = [1, 1]} : vector<4x18xf32> to vector<4x16xf32>
    %c8_62 = arith.constant 8 : index
    %c112_63 = arith.constant 112 : index
    %91 = vector.load %arg8[%c8_62, %c112_63] : memref<36x128xf32, #tpu.memory_space<vmem>>, vector<4x16xf32>
    tpu.vector_store %arg8[%c8_62, %c112_63], %90 {strides = array<i32>} : memref<36x128xf32, #tpu.memory_space<vmem>>, vector<4x16xf32>,
    %c1_i32_64 = arith.constant 1 : i32
    %92 = arith.addi %3, %c1_i32_64 : i32
    %c0_i32_65 = arith.constant 0 : i32
    %93 = arith.addi %92, %c0_i32_65 : i32
    %94 = arith.index_cast %93 : i32 to index
    %c0_66 = arith.constant 0 : index
    %c0_67 = arith.constant 0 : index
    %95 = vector.load %arg7[%94, %c0_66, %c0_67] : memref<18x4x18xf32, #tpu.memory_space<vmem>>, vector<1x4x18xf32>
    %96 = vector.shape_cast %95 : vector<1x4x18xf32> to vector<4x18xf32>
    %97 = vector.extract_strided_slice %96 {offsets = [0, 0], sizes = [4, 16], strides = [1, 1]} : vector<4x18xf32> to vector<4x16xf32>
    %c12 = arith.constant 12 : index
    %c0_68 = arith.constant 0 : index
    %98 = vector.load %arg8[%c12, %c0_68] : memref<36x128xf32, #tpu.memory_space<vmem>>, vector<4x16xf32>
    tpu.vector_store %arg8[%c12, %c0_68], %97 {strides = array<i32>} : memref<36x128xf32, #tpu.memory_space<vmem>>, vector<4x16xf32>,
    %99 = vector.extract_strided_slice %96 {offsets = [0, 1], sizes = [4, 16], strides = [1, 1]} : vector<4x18xf32> to vector<4x16xf32>
    %c16_69 = arith.constant 16 : index
    %c0_70 = arith.constant 0 : index
    %100 = vector.load %arg8[%c16_69, %c0_70] : memref<36x128xf32, #tpu.memory_space<vmem>>, vector<4x16xf32>
    tpu.vector_store %arg8[%c16_69, %c0_70], %99 {strides = array<i32>} : memref<36x128xf32, #tpu.memory_space<vmem>>, vector<4x16xf32>,
    %101 = vector.extract_strided_slice %96 {offsets = [0, 2], sizes = [4, 16], strides = [1, 1]} : vector<4x18xf32> to vector<4x16xf32>
    %c20 = arith.constant 20 : index
    %c0_71 = arith.constant 0 : index
    %102 = vector.load %arg8[%c20, %c0_71] : memref<36x128xf32, #tpu.memory_space<vmem>>, vector<4x16xf32>
    tpu.vector_store %arg8[%c20, %c0_71], %101 {strides = array<i32>} : memref<36x128xf32, #tpu.memory_space<vmem>>, vector<4x16xf32>,
    %c1_i32_72 = arith.constant 1 : i32
    %103 = arith.addi %3, %c1_i32_72 : i32
    %c1_i32_73 = arith.constant 1 : i32
    %104 = arith.addi %103, %c1_i32_73 : i32
    %105 = arith.index_cast %104 : i32 to index
    %c0_74 = arith.constant 0 : index
    %c0_75 = arith.constant 0 : index
    %106 = vector.load %arg7[%105, %c0_74, %c0_75] : memref<18x4x18xf32, #tpu.memory_space<vmem>>, vector<1x4x18xf32>
    %107 = vector.shape_cast %106 : vector<1x4x18xf32> to vector<4x18xf32>
    %108 = vector.extract_strided_slice %107 {offsets = [0, 0], sizes = [4, 16], strides = [1, 1]} : vector<4x18xf32> to vector<4x16xf32>
    %c12_76 = arith.constant 12 : index
    %c16_77 = arith.constant 16 : index
    %109 = vector.load %arg8[%c12_76, %c16_77] : memref<36x128xf32, #tpu.memory_space<vmem>>, vector<4x16xf32>
    tpu.vector_store %arg8[%c12_76, %c16_77], %108 {strides = array<i32>} : memref<36x128xf32, #tpu.memory_space<vmem>>, vector<4x16xf32>,
    %110 = vector.extract_strided_slice %107 {offsets = [0, 1], sizes = [4, 16], strides = [1, 1]} : vector<4x18xf32> to vector<4x16xf32>
    %c16_78 = arith.constant 16 : index
    %c16_79 = arith.constant 16 : index
    %111 = vector.load %arg8[%c16_78, %c16_79] : memref<36x128xf32, #tpu.memory_space<vmem>>, vector<4x16xf32>
    tpu.vector_store %arg8[%c16_78, %c16_79], %110 {strides = array<i32>} : memref<36x128xf32, #tpu.memory_space<vmem>>, vector<4x16xf32>,
    %112 = vector.extract_strided_slice %107 {offsets = [0, 2], sizes = [4, 16], strides = [1, 1]} : vector<4x18xf32> to vector<4x16xf32>
    %c20_80 = arith.constant 20 : index
    %c16_81 = arith.constant 16 : index
    %113 = vector.load %arg8[%c20_80, %c16_81] : memref<36x128xf32, #tpu.memory_space<vmem>>, vector<4x16xf32>
    tpu.vector_store %arg8[%c20_80, %c16_81], %112 {strides = array<i32>} : memref<36x128xf32, #tpu.memory_space<vmem>>, vector<4x16xf32>,
    %c1_i32_82 = arith.constant 1 : i32
    %114 = arith.addi %3, %c1_i32_82 : i32
    %c2_i32_83 = arith.constant 2 : i32
    %115 = arith.addi %114, %c2_i32_83 : i32
    %116 = arith.index_cast %115 : i32 to index
    %c0_84 = arith.constant 0 : index
    %c0_85 = arith.constant 0 : index
    %117 = vector.load %arg7[%116, %c0_84, %c0_85] : memref<18x4x18xf32, #tpu.memory_space<vmem>>, vector<1x4x18xf32>
    %118 = vector.shape_cast %117 : vector<1x4x18xf32> to vector<4x18xf32>
    %119 = vector.extract_strided_slice %118 {offsets = [0, 0], sizes = [4, 16], strides = [1, 1]} : vector<4x18xf32> to vector<4x16xf32>
    %c12_86 = arith.constant 12 : index
    %c32_87 = arith.constant 32 : index
    %120 = vector.load %arg8[%c12_86, %c32_87] : memref<36x128xf32, #tpu.memory_space<vmem>>, vector<4x16xf32>
    tpu.vector_store %arg8[%c12_86, %c32_87], %119 {strides = array<i32>} : memref<36x128xf32, #tpu.memory_space<vmem>>, vector<4x16xf32>,
    %121 = vector.extract_strided_slice %118 {offsets = [0, 1], sizes = [4, 16], strides = [1, 1]} : vector<4x18xf32> to vector<4x16xf32>
    %c16_88 = arith.constant 16 : index
    %c32_89 = arith.constant 32 : index
    %122 = vector.load %arg8[%c16_88, %c32_89] : memref<36x128xf32, #tpu.memory_space<vmem>>, vector<4x16xf32>
    tpu.vector_store %arg8[%c16_88, %c32_89], %121 {strides = array<i32>} : memref<36x128xf32, #tpu.memory_space<vmem>>, vector<4x16xf32>,
    %123 = vector.extract_strided_slice %118 {offsets = [0, 2], sizes = [4, 16], strides = [1, 1]} : vector<4x18xf32> to vector<4x16xf32>
    %c20_90 = arith.constant 20 : index
    %c32_91 = arith.constant 32 : index
    %124 = vector.load %arg8[%c20_90, %c32_91] : memref<36x128xf32, #tpu.memory_space<vmem>>, vector<4x16xf32>
    tpu.vector_store %arg8[%c20_90, %c32_91], %123 {strides = array<i32>} : memref<36x128xf32, #tpu.memory_space<vmem>>, vector<4x16xf32>,
    %c1_i32_92 = arith.constant 1 : i32
    %125 = arith.addi %3, %c1_i32_92 : i32
    %c3_i32_93 = arith.constant 3 : i32
    %126 = arith.addi %125, %c3_i32_93 : i32
    %127 = arith.index_cast %126 : i32 to index
    %c0_94 = arith.constant 0 : index
    %c0_95 = arith.constant 0 : index
    %128 = vector.load %arg7[%127, %c0_94, %c0_95] : memref<18x4x18xf32, #tpu.memory_space<vmem>>, vector<1x4x18xf32>
    %129 = vector.shape_cast %128 : vector<1x4x18xf32> to vector<4x18xf32>
    %130 = vector.extract_strided_slice %129 {offsets = [0, 0], sizes = [4, 16], strides = [1, 1]} : vector<4x18xf32> to vector<4x16xf32>
    %c12_96 = arith.constant 12 : index
    %c48_97 = arith.constant 48 : index
    %131 = vector.load %arg8[%c12_96, %c48_97] : memref<36x128xf32, #tpu.memory_space<vmem>>, vector<4x16xf32>
    tpu.vector_store %arg8[%c12_96, %c48_97], %130 {strides = array<i32>} : memref<36x128xf32, #tpu.memory_space<vmem>>, vector<4x16xf32>,
    %132 = vector.extract_strided_slice %129 {offsets = [0, 1], sizes = [4, 16], strides = [1, 1]} : vector<4x18xf32> to vector<4x16xf32>
    %c16_98 = arith.constant 16 : index
    %c48_99 = arith.constant 48 : index
    %133 = vector.load %arg8[%c16_98, %c48_99] : memref<36x128xf32, #tpu.memory_space<vmem>>, vector<4x16xf32>
    tpu.vector_store %arg8[%c16_98, %c48_99], %132 {strides = array<i32>} : memref<36x128xf32, #tpu.memory_space<vmem>>, vector<4x16xf32>,
    %134 = vector.extract_strided_slice %129 {offsets = [0, 2], sizes = [4, 16], strides = [1, 1]} : vector<4x18xf32> to vector<4x16xf32>
    %c20_100 = arith.constant 20 : index
    %c48_101 = arith.constant 48 : index
    %135 = vector.load %arg8[%c20_100, %c48_101] : memref<36x128xf32, #tpu.memory_space<vmem>>, vector<4x16xf32>
    tpu.vector_store %arg8[%c20_100, %c48_101], %134 {strides = array<i32>} : memref<36x128xf32, #tpu.memory_space<vmem>>, vector<4x16xf32>,
    %c1_i32_102 = arith.constant 1 : i32
    %136 = arith.addi %3, %c1_i32_102 : i32
    %c4_i32_103 = arith.constant 4 : i32
    %137 = arith.addi %136, %c4_i32_103 : i32
    %138 = arith.index_cast %137 : i32 to index
    %c0_104 = arith.constant 0 : index
    %c0_105 = arith.constant 0 : index
    %139 = vector.load %arg7[%138, %c0_104, %c0_105] : memref<18x4x18xf32, #tpu.memory_space<vmem>>, vector<1x4x18xf32>
    %140 = vector.shape_cast %139 : vector<1x4x18xf32> to vector<4x18xf32>
    %141 = vector.extract_strided_slice %140 {offsets = [0, 0], sizes = [4, 16], strides = [1, 1]} : vector<4x18xf32> to vector<4x16xf32>
    %c12_106 = arith.constant 12 : index
    %c64_107 = arith.constant 64 : index
    %142 = vector.load %arg8[%c12_106, %c64_107] : memref<36x128xf32, #tpu.memory_space<vmem>>, vector<4x16xf32>
    tpu.vector_store %arg8[%c12_106, %c64_107], %141 {strides = array<i32>} : memref<36x128xf32, #tpu.memory_space<vmem>>, vector<4x16xf32>,
    %143 = vector.extract_strided_slice %140 {offsets = [0, 1], sizes = [4, 16], strides = [1, 1]} : vector<4x18xf32> to vector<4x16xf32>
    %c16_108 = arith.constant 16 : index
    %c64_109 = arith.constant 64 : index
    %144 = vector.load %arg8[%c16_108, %c64_109] : memref<36x128xf32, #tpu.memory_space<vmem>>, vector<4x16xf32>
    tpu.vector_store %arg8[%c16_108, %c64_109], %143 {strides = array<i32>} : memref<36x128xf32, #tpu.memory_space<vmem>>, vector<4x16xf32>,
    %145 = vector.extract_strided_slice %140 {offsets = [0, 2], sizes = [4, 16], strides = [1, 1]} : vector<4x18xf32> to vector<4x16xf32>
    %c20_110 = arith.constant 20 : index
    %c64_111 = arith.constant 64 : index
    %146 = vector.load %arg8[%c20_110, %c64_111] : memref<36x128xf32, #tpu.memory_space<vmem>>, vector<4x16xf32>
    tpu.vector_store %arg8[%c20_110, %c64_111], %145 {strides = array<i32>} : memref<36x128xf32, #tpu.memory_space<vmem>>, vector<4x16xf32>,
    %c1_i32_112 = arith.constant 1 : i32
    %147 = arith.addi %3, %c1_i32_112 : i32
    %c5_i32_113 = arith.constant 5 : i32
    %148 = arith.addi %147, %c5_i32_113 : i32
    %149 = arith.index_cast %148 : i32 to index
    %c0_114 = arith.constant 0 : index
    %c0_115 = arith.constant 0 : index
    %150 = vector.load %arg7[%149, %c0_114, %c0_115] : memref<18x4x18xf32, #tpu.memory_space<vmem>>, vector<1x4x18xf32>
    %151 = vector.shape_cast %150 : vector<1x4x18xf32> to vector<4x18xf32>
    %152 = vector.extract_strided_slice %151 {offsets = [0, 0], sizes = [4, 16], strides = [1, 1]} : vector<4x18xf32> to vector<4x16xf32>
    %c12_116 = arith.constant 12 : index
    %c80_117 = arith.constant 80 : index
    %153 = vector.load %arg8[%c12_116, %c80_117] : memref<36x128xf32, #tpu.memory_space<vmem>>, vector<4x16xf32>
    tpu.vector_store %arg8[%c12_116, %c80_117], %152 {strides = array<i32>} : memref<36x128xf32, #tpu.memory_space<vmem>>, vector<4x16xf32>,
    %154 = vector.extract_strided_slice %151 {offsets = [0, 1], sizes = [4, 16], strides = [1, 1]} : vector<4x18xf32> to vector<4x16xf32>
    %c16_118 = arith.constant 16 : index
    %c80_119 = arith.constant 80 : index
    %155 = vector.load %arg8[%c16_118, %c80_119] : memref<36x128xf32, #tpu.memory_space<vmem>>, vector<4x16xf32>
    tpu.vector_store %arg8[%c16_118, %c80_119], %154 {strides = array<i32>} : memref<36x128xf32, #tpu.memory_space<vmem>>, vector<4x16xf32>,
    %156 = vector.extract_strided_slice %151 {offsets = [0, 2], sizes = [4, 16], strides = [1, 1]} : vector<4x18xf32> to vector<4x16xf32>
    %c20_120 = arith.constant 20 : index
    %c80_121 = arith.constant 80 : index
    %157 = vector.load %arg8[%c20_120, %c80_121] : memref<36x128xf32, #tpu.memory_space<vmem>>, vector<4x16xf32>
    tpu.vector_store %arg8[%c20_120, %c80_121], %156 {strides = array<i32>} : memref<36x128xf32, #tpu.memory_space<vmem>>, vector<4x16xf32>,
    %c1_i32_122 = arith.constant 1 : i32
    %158 = arith.addi %3, %c1_i32_122 : i32
    %c6_i32_123 = arith.constant 6 : i32
    %159 = arith.addi %158, %c6_i32_123 : i32
    %160 = arith.index_cast %159 : i32 to index
    %c0_124 = arith.constant 0 : index
    %c0_125 = arith.constant 0 : index
    %161 = vector.load %arg7[%160, %c0_124, %c0_125] : memref<18x4x18xf32, #tpu.memory_space<vmem>>, vector<1x4x18xf32>
    %162 = vector.shape_cast %161 : vector<1x4x18xf32> to vector<4x18xf32>
    %163 = vector.extract_strided_slice %162 {offsets = [0, 0], sizes = [4, 16], strides = [1, 1]} : vector<4x18xf32> to vector<4x16xf32>
    %c12_126 = arith.constant 12 : index
    %c96_127 = arith.constant 96 : index
    %164 = vector.load %arg8[%c12_126, %c96_127] : memref<36x128xf32, #tpu.memory_space<vmem>>, vector<4x16xf32>
    tpu.vector_store %arg8[%c12_126, %c96_127], %163 {strides = array<i32>} : memref<36x128xf32, #tpu.memory_space<vmem>>, vector<4x16xf32>,
    %165 = vector.extract_strided_slice %162 {offsets = [0, 1], sizes = [4, 16], strides = [1, 1]} : vector<4x18xf32> to vector<4x16xf32>
    %c16_128 = arith.constant 16 : index
    %c96_129 = arith.constant 96 : index
    %166 = vector.load %arg8[%c16_128, %c96_129] : memref<36x128xf32, #tpu.memory_space<vmem>>, vector<4x16xf32>
    tpu.vector_store %arg8[%c16_128, %c96_129], %165 {strides = array<i32>} : memref<36x128xf32, #tpu.memory_space<vmem>>, vector<4x16xf32>,
    %167 = vector.extract_strided_slice %162 {offsets = [0, 2], sizes = [4, 16], strides = [1, 1]} : vector<4x18xf32> to vector<4x16xf32>
    %c20_130 = arith.constant 20 : index
    %c96_131 = arith.constant 96 : index
    %168 = vector.load %arg8[%c20_130, %c96_131] : memref<36x128xf32, #tpu.memory_space<vmem>>, vector<4x16xf32>
    tpu.vector_store %arg8[%c20_130, %c96_131], %167 {strides = array<i32>} : memref<36x128xf32, #tpu.memory_space<vmem>>, vector<4x16xf32>,
    %c1_i32_132 = arith.constant 1 : i32
    %169 = arith.addi %3, %c1_i32_132 : i32
    %c7_i32_133 = arith.constant 7 : i32
    %170 = arith.addi %169, %c7_i32_133 : i32
    %171 = arith.index_cast %170 : i32 to index
    %c0_134 = arith.constant 0 : index
    %c0_135 = arith.constant 0 : index
    %172 = vector.load %arg7[%171, %c0_134, %c0_135] : memref<18x4x18xf32, #tpu.memory_space<vmem>>, vector<1x4x18xf32>
    %173 = vector.shape_cast %172 : vector<1x4x18xf32> to vector<4x18xf32>
    %174 = vector.extract_strided_slice %173 {offsets = [0, 0], sizes = [4, 16], strides = [1, 1]} : vector<4x18xf32> to vector<4x16xf32>
    %c12_136 = arith.constant 12 : index
    %c112_137 = arith.constant 112 : index
    %175 = vector.load %arg8[%c12_136, %c112_137] : memref<36x128xf32, #tpu.memory_space<vmem>>, vector<4x16xf32>
    tpu.vector_store %arg8[%c12_136, %c112_137], %174 {strides = array<i32>} : memref<36x128xf32, #tpu.memory_space<vmem>>, vector<4x16xf32>,
    %176 = vector.extract_strided_slice %173 {offsets = [0, 1], sizes = [4, 16], strides = [1, 1]} : vector<4x18xf32> to vector<4x16xf32>
    %c16_138 = arith.constant 16 : index
    %c112_139 = arith.constant 112 : index
    %177 = vector.load %arg8[%c16_138, %c112_139] : memref<36x128xf32, #tpu.memory_space<vmem>>, vector<4x16xf32>
    tpu.vector_store %arg8[%c16_138, %c112_139], %176 {strides = array<i32>} : memref<36x128xf32, #tpu.memory_space<vmem>>, vector<4x16xf32>,
    %178 = vector.extract_strided_slice %173 {offsets = [0, 2], sizes = [4, 16], strides = [1, 1]} : vector<4x18xf32> to vector<4x16xf32>
    %c20_140 = arith.constant 20 : index
    %c112_141 = arith.constant 112 : index
    %179 = vector.load %arg8[%c20_140, %c112_141] : memref<36x128xf32, #tpu.memory_space<vmem>>, vector<4x16xf32>
    tpu.vector_store %arg8[%c20_140, %c112_141], %178 {strides = array<i32>} : memref<36x128xf32, #tpu.memory_space<vmem>>, vector<4x16xf32>,
    %c2_i32_142 = arith.constant 2 : i32
    %180 = arith.addi %3, %c2_i32_142 : i32
    %c0_i32_143 = arith.constant 0 : i32
    %181 = arith.addi %180, %c0_i32_143 : i32
    %182 = arith.index_cast %181 : i32 to index
    %c0_144 = arith.constant 0 : index
    %c0_145 = arith.constant 0 : index
    %183 = vector.load %arg7[%182, %c0_144, %c0_145] : memref<18x4x18xf32, #tpu.memory_space<vmem>>, vector<1x4x18xf32>
    %184 = vector.shape_cast %183 : vector<1x4x18xf32> to vector<4x18xf32>
    %185 = vector.extract_strided_slice %184 {offsets = [0, 0], sizes = [4, 16], strides = [1, 1]} : vector<4x18xf32> to vector<4x16xf32>
    %c24 = arith.constant 24 : index
    %c0_146 = arith.constant 0 : index
    %186 = vector.load %arg8[%c24, %c0_146] : memref<36x128xf32, #tpu.memory_space<vmem>>, vector<4x16xf32>
    tpu.vector_store %arg8[%c24, %c0_146], %185 {strides = array<i32>} : memref<36x128xf32, #tpu.memory_space<vmem>>, vector<4x16xf32>,
    %187 = vector.extract_strided_slice %184 {offsets = [0, 1], sizes = [4, 16], strides = [1, 1]} : vector<4x18xf32> to vector<4x16xf32>
    %c28 = arith.constant 28 : index
    %c0_147 = arith.constant 0 : index
    %188 = vector.load %arg8[%c28, %c0_147] : memref<36x128xf32, #tpu.memory_space<vmem>>, vector<4x16xf32>
    tpu.vector_store %arg8[%c28, %c0_147], %187 {strides = array<i32>} : memref<36x128xf32, #tpu.memory_space<vmem>>, vector<4x16xf32>,
    %189 = vector.extract_strided_slice %184 {offsets = [0, 2], sizes = [4, 16], strides = [1, 1]} : vector<4x18xf32> to vector<4x16xf32>
    %c32_148 = arith.constant 32 : index
    %c0_149 = arith.constant 0 : index
    %190 = vector.load %arg8[%c32_148, %c0_149] : memref<36x128xf32, #tpu.memory_space<vmem>>, vector<4x16xf32>
    tpu.vector_store %arg8[%c32_148, %c0_149], %189 {strides = array<i32>} : memref<36x128xf32, #tpu.memory_space<vmem>>, vector<4x16xf32>,
    %c2_i32_150 = arith.constant 2 : i32
    %191 = arith.addi %3, %c2_i32_150 : i32
    %c1_i32_151 = arith.constant 1 : i32
    %192 = arith.addi %191, %c1_i32_151 : i32
    %193 = arith.index_cast %192 : i32 to index
    %c0_152 = arith.constant 0 : index
    %c0_153 = arith.constant 0 : index
    %194 = vector.load %arg7[%193, %c0_152, %c0_153] : memref<18x4x18xf32, #tpu.memory_space<vmem>>, vector<1x4x18xf32>
    %195 = vector.shape_cast %194 : vector<1x4x18xf32> to vector<4x18xf32>
    %196 = vector.extract_strided_slice %195 {offsets = [0, 0], sizes = [4, 16], strides = [1, 1]} : vector<4x18xf32> to vector<4x16xf32>
    %c24_154 = arith.constant 24 : index
    %c16_155 = arith.constant 16 : index
    %197 = vector.load %arg8[%c24_154, %c16_155] : memref<36x128xf32, #tpu.memory_space<vmem>>, vector<4x16xf32>
    tpu.vector_store %arg8[%c24_154, %c16_155], %196 {strides = array<i32>} : memref<36x128xf32, #tpu.memory_space<vmem>>, vector<4x16xf32>,
    %198 = vector.extract_strided_slice %195 {offsets = [0, 1], sizes = [4, 16], strides = [1, 1]} : vector<4x18xf32> to vector<4x16xf32>
    %c28_156 = arith.constant 28 : index
    %c16_157 = arith.constant 16 : index
    %199 = vector.load %arg8[%c28_156, %c16_157] : memref<36x128xf32, #tpu.memory_space<vmem>>, vector<4x16xf32>
    tpu.vector_store %arg8[%c28_156, %c16_157], %198 {strides = array<i32>} : memref<36x128xf32, #tpu.memory_space<vmem>>, vector<4x16xf32>,
    %200 = vector.extract_strided_slice %195 {offsets = [0, 2], sizes = [4, 16], strides = [1, 1]} : vector<4x18xf32> to vector<4x16xf32>
    %c32_158 = arith.constant 32 : index
    %c16_159 = arith.constant 16 : index
    %201 = vector.load %arg8[%c32_158, %c16_159] : memref<36x128xf32, #tpu.memory_space<vmem>>, vector<4x16xf32>
    tpu.vector_store %arg8[%c32_158, %c16_159], %200 {strides = array<i32>} : memref<36x128xf32, #tpu.memory_space<vmem>>, vector<4x16xf32>,
    %c2_i32_160 = arith.constant 2 : i32
    %202 = arith.addi %3, %c2_i32_160 : i32
    %c2_i32_161 = arith.constant 2 : i32
    %203 = arith.addi %202, %c2_i32_161 : i32
    %204 = arith.index_cast %203 : i32 to index
    %c0_162 = arith.constant 0 : index
    %c0_163 = arith.constant 0 : index
    %205 = vector.load %arg7[%204, %c0_162, %c0_163] : memref<18x4x18xf32, #tpu.memory_space<vmem>>, vector<1x4x18xf32>
    %206 = vector.shape_cast %205 : vector<1x4x18xf32> to vector<4x18xf32>
    %207 = vector.extract_strided_slice %206 {offsets = [0, 0], sizes = [4, 16], strides = [1, 1]} : vector<4x18xf32> to vector<4x16xf32>
    %c24_164 = arith.constant 24 : index
    %c32_165 = arith.constant 32 : index
    %208 = vector.load %arg8[%c24_164, %c32_165] : memref<36x128xf32, #tpu.memory_space<vmem>>, vector<4x16xf32>
    tpu.vector_store %arg8[%c24_164, %c32_165], %207 {strides = array<i32>} : memref<36x128xf32, #tpu.memory_space<vmem>>, vector<4x16xf32>,
    %209 = vector.extract_strided_slice %206 {offsets = [0, 1], sizes = [4, 16], strides = [1, 1]} : vector<4x18xf32> to vector<4x16xf32>
    %c28_166 = arith.constant 28 : index
    %c32_167 = arith.constant 32 : index
    %210 = vector.load %arg8[%c28_166, %c32_167] : memref<36x128xf32, #tpu.memory_space<vmem>>, vector<4x16xf32>
    tpu.vector_store %arg8[%c28_166, %c32_167], %209 {strides = array<i32>} : memref<36x128xf32, #tpu.memory_space<vmem>>, vector<4x16xf32>,
    %211 = vector.extract_strided_slice %206 {offsets = [0, 2], sizes = [4, 16], strides = [1, 1]} : vector<4x18xf32> to vector<4x16xf32>
    %c32_168 = arith.constant 32 : index
    %c32_169 = arith.constant 32 : index
    %212 = vector.load %arg8[%c32_168, %c32_169] : memref<36x128xf32, #tpu.memory_space<vmem>>, vector<4x16xf32>
    tpu.vector_store %arg8[%c32_168, %c32_169], %211 {strides = array<i32>} : memref<36x128xf32, #tpu.memory_space<vmem>>, vector<4x16xf32>,
    %c2_i32_170 = arith.constant 2 : i32
    %213 = arith.addi %3, %c2_i32_170 : i32
    %c3_i32_171 = arith.constant 3 : i32
    %214 = arith.addi %213, %c3_i32_171 : i32
    %215 = arith.index_cast %214 : i32 to index
    %c0_172 = arith.constant 0 : index
    %c0_173 = arith.constant 0 : index
    %216 = vector.load %arg7[%215, %c0_172, %c0_173] : memref<18x4x18xf32, #tpu.memory_space<vmem>>, vector<1x4x18xf32>
    %217 = vector.shape_cast %216 : vector<1x4x18xf32> to vector<4x18xf32>
    %218 = vector.extract_strided_slice %217 {offsets = [0, 0], sizes = [4, 16], strides = [1, 1]} : vector<4x18xf32> to vector<4x16xf32>
    %c24_174 = arith.constant 24 : index
    %c48_175 = arith.constant 48 : index
    %219 = vector.load %arg8[%c24_174, %c48_175] : memref<36x128xf32, #tpu.memory_space<vmem>>, vector<4x16xf32>
    tpu.vector_store %arg8[%c24_174, %c48_175], %218 {strides = array<i32>} : memref<36x128xf32, #tpu.memory_space<vmem>>, vector<4x16xf32>,
    %220 = vector.extract_strided_slice %217 {offsets = [0, 1], sizes = [4, 16], strides = [1, 1]} : vector<4x18xf32> to vector<4x16xf32>
    %c28_176 = arith.constant 28 : index
    %c48_177 = arith.constant 48 : index
    %221 = vector.load %arg8[%c28_176, %c48_177] : memref<36x128xf32, #tpu.memory_space<vmem>>, vector<4x16xf32>
    tpu.vector_store %arg8[%c28_176, %c48_177], %220 {strides = array<i32>} : memref<36x128xf32, #tpu.memory_space<vmem>>, vector<4x16xf32>,
    %222 = vector.extract_strided_slice %217 {offsets = [0, 2], sizes = [4, 16], strides = [1, 1]} : vector<4x18xf32> to vector<4x16xf32>
    %c32_178 = arith.constant 32 : index
    %c48_179 = arith.constant 48 : index
    %223 = vector.load %arg8[%c32_178, %c48_179] : memref<36x128xf32, #tpu.memory_space<vmem>>, vector<4x16xf32>
    tpu.vector_store %arg8[%c32_178, %c48_179], %222 {strides = array<i32>} : memref<36x128xf32, #tpu.memory_space<vmem>>, vector<4x16xf32>,
    %c2_i32_180 = arith.constant 2 : i32
    %224 = arith.addi %3, %c2_i32_180 : i32
    %c4_i32_181 = arith.constant 4 : i32
    %225 = arith.addi %224, %c4_i32_181 : i32
    %226 = arith.index_cast %225 : i32 to index
    %c0_182 = arith.constant 0 : index
    %c0_183 = arith.constant 0 : index
    %227 = vector.load %arg7[%226, %c0_182, %c0_183] : memref<18x4x18xf32, #tpu.memory_space<vmem>>, vector<1x4x18xf32>
    %228 = vector.shape_cast %227 : vector<1x4x18xf32> to vector<4x18xf32>
    %229 = vector.extract_strided_slice %228 {offsets = [0, 0], sizes = [4, 16], strides = [1, 1]} : vector<4x18xf32> to vector<4x16xf32>
    %c24_184 = arith.constant 24 : index
    %c64_185 = arith.constant 64 : index
    %230 = vector.load %arg8[%c24_184, %c64_185] : memref<36x128xf32, #tpu.memory_space<vmem>>, vector<4x16xf32>
    tpu.vector_store %arg8[%c24_184, %c64_185], %229 {strides = array<i32>} : memref<36x128xf32, #tpu.memory_space<vmem>>, vector<4x16xf32>,
    %231 = vector.extract_strided_slice %228 {offsets = [0, 1], sizes = [4, 16], strides = [1, 1]} : vector<4x18xf32> to vector<4x16xf32>
    %c28_186 = arith.constant 28 : index
    %c64_187 = arith.constant 64 : index
    %232 = vector.load %arg8[%c28_186, %c64_187] : memref<36x128xf32, #tpu.memory_space<vmem>>, vector<4x16xf32>
    tpu.vector_store %arg8[%c28_186, %c64_187], %231 {strides = array<i32>} : memref<36x128xf32, #tpu.memory_space<vmem>>, vector<4x16xf32>,
    %233 = vector.extract_strided_slice %228 {offsets = [0, 2], sizes = [4, 16], strides = [1, 1]} : vector<4x18xf32> to vector<4x16xf32>
    %c32_188 = arith.constant 32 : index
    %c64_189 = arith.constant 64 : index
    %234 = vector.load %arg8[%c32_188, %c64_189] : memref<36x128xf32, #tpu.memory_space<vmem>>, vector<4x16xf32>
    tpu.vector_store %arg8[%c32_188, %c64_189], %233 {strides = array<i32>} : memref<36x128xf32, #tpu.memory_space<vmem>>, vector<4x16xf32>,
    %c2_i32_190 = arith.constant 2 : i32
    %235 = arith.addi %3, %c2_i32_190 : i32
    %c5_i32_191 = arith.constant 5 : i32
    %236 = arith.addi %235, %c5_i32_191 : i32
    %237 = arith.index_cast %236 : i32 to index
    %c0_192 = arith.constant 0 : index
    %c0_193 = arith.constant 0 : index
    %238 = vector.load %arg7[%237, %c0_192, %c0_193] : memref<18x4x18xf32, #tpu.memory_space<vmem>>, vector<1x4x18xf32>
    %239 = vector.shape_cast %238 : vector<1x4x18xf32> to vector<4x18xf32>
    %240 = vector.extract_strided_slice %239 {offsets = [0, 0], sizes = [4, 16], strides = [1, 1]} : vector<4x18xf32> to vector<4x16xf32>
    %c24_194 = arith.constant 24 : index
    %c80_195 = arith.constant 80 : index
    %241 = vector.load %arg8[%c24_194, %c80_195] : memref<36x128xf32, #tpu.memory_space<vmem>>, vector<4x16xf32>
    tpu.vector_store %arg8[%c24_194, %c80_195], %240 {strides = array<i32>} : memref<36x128xf32, #tpu.memory_space<vmem>>, vector<4x16xf32>,
    %242 = vector.extract_strided_slice %239 {offsets = [0, 1], sizes = [4, 16], strides = [1, 1]} : vector<4x18xf32> to vector<4x16xf32>
    %c28_196 = arith.constant 28 : index
    %c80_197 = arith.constant 80 : index
    %243 = vector.load %arg8[%c28_196, %c80_197] : memref<36x128xf32, #tpu.memory_space<vmem>>, vector<4x16xf32>
    tpu.vector_store %arg8[%c28_196, %c80_197], %242 {strides = array<i32>} : memref<36x128xf32, #tpu.memory_space<vmem>>, vector<4x16xf32>,
    %244 = vector.extract_strided_slice %239 {offsets = [0, 2], sizes = [4, 16], strides = [1, 1]} : vector<4x18xf32> to vector<4x16xf32>
    %c32_198 = arith.constant 32 : index
    %c80_199 = arith.constant 80 : index
    %245 = vector.load %arg8[%c32_198, %c80_199] : memref<36x128xf32, #tpu.memory_space<vmem>>, vector<4x16xf32>
    tpu.vector_store %arg8[%c32_198, %c80_199], %244 {strides = array<i32>} : memref<36x128xf32, #tpu.memory_space<vmem>>, vector<4x16xf32>,
    %c2_i32_200 = arith.constant 2 : i32
    %246 = arith.addi %3, %c2_i32_200 : i32
    %c6_i32_201 = arith.constant 6 : i32
    %247 = arith.addi %246, %c6_i32_201 : i32
    %248 = arith.index_cast %247 : i32 to index
    %c0_202 = arith.constant 0 : index
    %c0_203 = arith.constant 0 : index
    %249 = vector.load %arg7[%248, %c0_202, %c0_203] : memref<18x4x18xf32, #tpu.memory_space<vmem>>, vector<1x4x18xf32>
    %250 = vector.shape_cast %249 : vector<1x4x18xf32> to vector<4x18xf32>
    %251 = vector.extract_strided_slice %250 {offsets = [0, 0], sizes = [4, 16], strides = [1, 1]} : vector<4x18xf32> to vector<4x16xf32>
    %c24_204 = arith.constant 24 : index
    %c96_205 = arith.constant 96 : index
    %252 = vector.load %arg8[%c24_204, %c96_205] : memref<36x128xf32, #tpu.memory_space<vmem>>, vector<4x16xf32>
    tpu.vector_store %arg8[%c24_204, %c96_205], %251 {strides = array<i32>} : memref<36x128xf32, #tpu.memory_space<vmem>>, vector<4x16xf32>,
    %253 = vector.extract_strided_slice %250 {offsets = [0, 1], sizes = [4, 16], strides = [1, 1]} : vector<4x18xf32> to vector<4x16xf32>
    %c28_206 = arith.constant 28 : index
    %c96_207 = arith.constant 96 : index
    %254 = vector.load %arg8[%c28_206, %c96_207] : memref<36x128xf32, #tpu.memory_space<vmem>>, vector<4x16xf32>
    tpu.vector_store %arg8[%c28_206, %c96_207], %253 {strides = array<i32>} : memref<36x128xf32, #tpu.memory_space<vmem>>, vector<4x16xf32>,
    %255 = vector.extract_strided_slice %250 {offsets = [0, 2], sizes = [4, 16], strides = [1, 1]} : vector<4x18xf32> to vector<4x16xf32>
    %c32_208 = arith.constant 32 : index
    %c96_209 = arith.constant 96 : index
    %256 = vector.load %arg8[%c32_208, %c96_209] : memref<36x128xf32, #tpu.memory_space<vmem>>, vector<4x16xf32>
    tpu.vector_store %arg8[%c32_208, %c96_209], %255 {strides = array<i32>} : memref<36x128xf32, #tpu.memory_space<vmem>>, vector<4x16xf32>,
    %c2_i32_210 = arith.constant 2 : i32
    %257 = arith.addi %3, %c2_i32_210 : i32
    %c7_i32_211 = arith.constant 7 : i32
    %258 = arith.addi %257, %c7_i32_211 : i32
    %259 = arith.index_cast %258 : i32 to index
    %c0_212 = arith.constant 0 : index
    %c0_213 = arith.constant 0 : index
    %260 = vector.load %arg7[%259, %c0_212, %c0_213] : memref<18x4x18xf32, #tpu.memory_space<vmem>>, vector<1x4x18xf32>
    %261 = vector.shape_cast %260 : vector<1x4x18xf32> to vector<4x18xf32>
    %262 = vector.extract_strided_slice %261 {offsets = [0, 0], sizes = [4, 16], strides = [1, 1]} : vector<4x18xf32> to vector<4x16xf32>
    %c24_214 = arith.constant 24 : index
    %c112_215 = arith.constant 112 : index
    %263 = vector.load %arg8[%c24_214, %c112_215] : memref<36x128xf32, #tpu.memory_space<vmem>>, vector<4x16xf32>
    tpu.vector_store %arg8[%c24_214, %c112_215], %262 {strides = array<i32>} : memref<36x128xf32, #tpu.memory_space<vmem>>, vector<4x16xf32>,
    %264 = vector.extract_strided_slice %261 {offsets = [0, 1], sizes = [4, 16], strides = [1, 1]} : vector<4x18xf32> to vector<4x16xf32>
    %c28_216 = arith.constant 28 : index
    %c112_217 = arith.constant 112 : index
    %265 = vector.load %arg8[%c28_216, %c112_217] : memref<36x128xf32, #tpu.memory_space<vmem>>, vector<4x16xf32>
    tpu.vector_store %arg8[%c28_216, %c112_217], %264 {strides = array<i32>} : memref<36x128xf32, #tpu.memory_space<vmem>>, vector<4x16xf32>,
    %266 = vector.extract_strided_slice %261 {offsets = [0, 2], sizes = [4, 16], strides = [1, 1]} : vector<4x18xf32> to vector<4x16xf32>
    %c32_218 = arith.constant 32 : index
    %c112_219 = arith.constant 112 : index
    %267 = vector.load %arg8[%c32_218, %c112_219] : memref<36x128xf32, #tpu.memory_space<vmem>>, vector<4x16xf32>
    tpu.vector_store %arg8[%c32_218, %c112_219], %266 {strides = array<i32>} : memref<36x128xf32, #tpu.memory_space<vmem>>, vector<4x16xf32>,
    %c0_220 = arith.constant 0 : index
    %c0_221 = arith.constant 0 : index
    %268 = vector.load %arg3[%c0_220, %c0_221] : memref<8x36xf32, #tpu.memory_space<vmem>>, vector<8x36xf32>
    %c0_222 = arith.constant 0 : index
    %c0_223 = arith.constant 0 : index
    %269 = vector.load %arg8[%c0_222, %c0_223] : memref<36x128xf32, #tpu.memory_space<vmem>>, vector<36x128xf32>
    %cst = arith.constant dense<0.000000e+00> : vector<8x128xf32>
    %270 = tpu.matmul %268, %269, %cst {dimension_numbers = #tpu.dot_dimension_numbers<[1], [0], [0], [1], [0, 0, 1, 1], [], []>} : vector<8x36xf32>, vector<36x128xf32>, vector<8x128xf32> -> vector<8x128xf32>
    %c0_224 = arith.constant 0 : index
    %c0_225 = arith.constant 0 : index
    %271 = vector.load %arg4[%c0_224, %c0_225] : memref<8x1xf32, #tpu.memory_space<vmem>>, vector<8x1xf32>
    %272 = vector.broadcast %271 : vector<8x1xf32> to vector<8x128xf32>
    %273 = arith.addf %270, %272 : vector<8x128xf32>
    %cst_226 = arith.constant dense<0.000000e+00> : vector<8xf32>
    %274 = vector.multi_reduction <add>, %273, %cst_226 [1] : vector<8x128xf32> to vector<8xf32>
    %275 = vector.shape_cast %274 : vector<8xf32> to vector<8x1xf32>
    %cst_227 = arith.constant 7.812500e-03 : f32
    %276 = vector.broadcast %cst_227 : f32 to vector<8x1xf32>
    %277 = arith.mulf %275, %276 : vector<8x1xf32>
    %278 = vector.broadcast %277 : vector<8x1xf32> to vector<8x128xf32>
    %279 = arith.subf %273, %278 : vector<8x128xf32>
    %280 = arith.mulf %279, %279 : vector<8x128xf32>
    %cst_228 = arith.constant dense<0.000000e+00> : vector<8xf32>
    %281 = vector.multi_reduction <add>, %280, %cst_228 [1] : vector<8x128xf32> to vector<8xf32>
    %282 = vector.shape_cast %281 : vector<8xf32> to vector<8x1xf32>
    %c0_229 = arith.constant 0 : index
    %c0_230 = arith.constant 0 : index
    %c0_231 = arith.constant 0 : index
    %283 = vector.load %arg5[%c0_229, %c0_230, %c0_231] : memref<1x8x128xf32, #tpu.memory_space<vmem>>, vector<1x8x128xf32>
    %284 = vector.shape_cast %283 : vector<1x8x128xf32> to vector<8x128xf32>
    %285 = vector.shape_cast %273 : vector<8x128xf32> to vector<1x8x128xf32>
    tpu.vector_store %arg5[%c0_229, %c0_230, %c0_231], %285 {strides = array<i32>} : memref<1x8x128xf32, #tpu.memory_space<vmem>>, vector<1x8x128xf32>,
    %c0_232 = arith.constant 0 : index
    %c0_233 = arith.constant 0 : index
    %c0_234 = arith.constant 0 : index
    %c0_235 = arith.constant 0 : index
    %286 = vector.load %arg6[%c0_232, %c0_233, %c0_234, %c0_235] : memref<1x1x8x2xf32, #tpu.memory_space<vmem>>, vector<1x1x8x1xf32>
    %287 = vector.shape_cast %286 : vector<1x1x8x1xf32> to vector<8x1xf32>
    %288 = vector.shape_cast %277 : vector<8x1xf32> to vector<1x1x8x1xf32>
    tpu.vector_store %arg6[%c0_232, %c0_233, %c0_234, %c0_235], %288 {strides = array<i32>} : memref<1x1x8x2xf32, #tpu.memory_space<vmem>>, vector<1x1x8x1xf32>,
    %c0_236 = arith.constant 0 : index
    %c0_237 = arith.constant 0 : index
    %c0_238 = arith.constant 0 : index
    %c1 = arith.constant 1 : index
    %289 = vector.load %arg6[%c0_236, %c0_237, %c0_238, %c1] : memref<1x1x8x2xf32, #tpu.memory_space<vmem>>, vector<1x1x8x1xf32>
    %290 = vector.shape_cast %289 : vector<1x1x8x1xf32> to vector<8x1xf32>
    %291 = vector.shape_cast %282 : vector<8x1xf32> to vector<1x1x8x1xf32>
    tpu.vector_store %arg6[%c0_236, %c0_237, %c0_238, %c1], %291 {strides = array<i32>} : memref<1x1x8x2xf32, #tpu.memory_space<vmem>>, vector<1x1x8x1xf32>,
    return
  }
  func.func @transform_0(%arg0: i32, %arg1: i32) -> (i32, i32, i32, i32) {
    %c0_i32 = arith.constant 0 : i32
    %c0_i32_0 = arith.constant 0 : i32
    %c0_i32_1 = arith.constant 0 : i32
    %c0_i32_2 = arith.constant 0 : i32
    return %arg0, %c0_i32, %c0_i32_0, %c0_i32_1 : i32, i32, i32, i32
  }
  func.func @transform_1(%arg0: i32, %arg1: i32) -> (i32, i32) {
    %c0_i32 = arith.constant 0 : i32
    %c0_i32_0 = arith.constant 0 : i32
    %c0_i32_1 = arith.constant 0 : i32
    return %c0_i32, %c0_i32_0 : i32, i32
  }
  func.func @transform_2(%arg0: i32, %arg1: i32) -> (i32, i32) {
    %c0_i32 = arith.constant 0 : i32
    %c0_i32_0 = arith.constant 0 : i32
    %c0_i32_1 = arith.constant 0 : i32
    return %c0_i32, %c0_i32_0 : i32, i32
  }
  func.func @transform_3(%arg0: i32, %arg1: i32) -> (i32, i32, i32) {
    %c0_i32 = arith.constant 0 : i32
    %c0_i32_0 = arith.constant 0 : i32
    return %arg0, %c0_i32, %arg1 : i32, i32, i32
  }
  func.func @transform_4(%arg0: i32, %arg1: i32) -> (i32, i32, i32, i32) {
    %c0_i32 = arith.constant 0 : i32
    %c0_i32_0 = arith.constant 0 : i32
    %c0_i32_1 = arith.constant 0 : i32
    return %arg0, %arg1, %c0_i32, %c0_i32_0 : i32, i32, i32, i32
  }
}

module attributes {stable_mosaic.version = 11 : i64} {
  func.func @_bn_relu_conv2_kernel(%arg0: i32, %arg1: i32, %arg2: memref<1x8x256xf32, #tpu.memory_space<vmem>>, %arg3: memref<8x1xf32, #tpu.memory_space<vmem>>, %arg4: memref<8x1xf32, #tpu.memory_space<vmem>>, %arg5: memref<8x72xf32, #tpu.memory_space<vmem>>, %arg6: memref<8x1xf32, #tpu.memory_space<vmem>>, %arg7: memref<1x8x128xf32, #tpu.memory_space<vmem>>, %arg8: memref<1x1x8x2xf32, #tpu.memory_space<vmem>>, %arg9: memref<18x8x18xf32, #tpu.memory_space<vmem>>, %arg10: memref<72x128xf32, #tpu.memory_space<vmem>>) attributes {dimension_semantics = [#tpu.dimension_semantics<parallel>, #tpu.dimension_semantics<arbitrary>], iteration_bounds = array<i64: 2, 2>, scalar_prefetch = 0 : i64, scratch_operands = 2 : i64, tpu.core_type = #tpu.core_type<tc>, window_params = [{transform_indices = @transform_0, window_bounds = array<i64: 1, 8, 256>}, {pipeline_mode = #tpu.pipeline_mode<synchronous>, transform_indices = @transform_1, window_bounds = array<i64: 8, 1>}, {pipeline_mode = #tpu.pipeline_mode<synchronous>, transform_indices = @transform_2, window_bounds = array<i64: 8, 1>}, {pipeline_mode = #tpu.pipeline_mode<synchronous>, transform_indices = @transform_3, window_bounds = array<i64: 8, 72>}, {pipeline_mode = #tpu.pipeline_mode<synchronous>, transform_indices = @transform_4, window_bounds = array<i64: 8, 1>}, {transform_indices = @transform_5, window_bounds = array<i64: 1, 8, 128>}, {transform_indices = @transform_6, window_bounds = array<i64: 1, 1, 8, 2>}]} {
    %c0_i32 = arith.constant 0 : i32
    %0 = arith.cmpi eq, %arg1, %c0_i32 : i32
    %1 = arith.extui %0 : i1 to i32
    %c0_i32_0 = arith.constant 0 : i32
    %2 = arith.cmpi ne, %1, %c0_i32_0 : i32
    scf.if %2 {
      %cst_241 = arith.constant 0.000000e+00 : f32
      %292 = vector.broadcast %cst_241 : f32 to vector<1x8x18xf32>
      %c0_242 = arith.constant 0 : index
      %c0_243 = arith.constant 0 : index
      %c0_244 = arith.constant 0 : index
      %293 = vector.load %arg9[%c0_242, %c0_243, %c0_244] : memref<18x8x18xf32, #tpu.memory_space<vmem>>, vector<1x8x18xf32>
      tpu.vector_store %arg9[%c0_242, %c0_243, %c0_244], %292 {strides = array<i32>} : memref<18x8x18xf32, #tpu.memory_space<vmem>>, vector<1x8x18xf32>,
      %cst_245 = arith.constant 0.000000e+00 : f32
      %294 = vector.broadcast %cst_245 : f32 to vector<1x8x18xf32>
      %c17 = arith.constant 17 : index
      %c0_246 = arith.constant 0 : index
      %c0_247 = arith.constant 0 : index
      %295 = vector.load %arg9[%c17, %c0_246, %c0_247] : memref<18x8x18xf32, #tpu.memory_space<vmem>>, vector<1x8x18xf32>
      tpu.vector_store %arg9[%c17, %c0_246, %c0_247], %294 {strides = array<i32>} : memref<18x8x18xf32, #tpu.memory_space<vmem>>, vector<1x8x18xf32>,
      %cst_248 = arith.constant 0.000000e+00 : f32
      %296 = vector.broadcast %cst_248 : f32 to vector<18x8x1xf32>
      %c0_249 = arith.constant 0 : index
      %c0_250 = arith.constant 0 : index
      %c0_251 = arith.constant 0 : index
      %297 = vector.load %arg9[%c0_249, %c0_250, %c0_251] : memref<18x8x18xf32, #tpu.memory_space<vmem>>, vector<18x8x1xf32>
      tpu.vector_store %arg9[%c0_249, %c0_250, %c0_251], %296 {strides = array<i32>} : memref<18x8x18xf32, #tpu.memory_space<vmem>>, vector<18x8x1xf32>,
      %cst_252 = arith.constant 0.000000e+00 : f32
      %298 = vector.broadcast %cst_252 : f32 to vector<18x8x1xf32>
      %c0_253 = arith.constant 0 : index
      %c0_254 = arith.constant 0 : index
      %c17_255 = arith.constant 17 : index
      %299 = vector.load %arg9[%c0_253, %c0_254, %c17_255] : memref<18x8x18xf32, #tpu.memory_space<vmem>>, vector<18x8x1xf32>
      tpu.vector_store %arg9[%c0_253, %c0_254, %c17_255], %298 {strides = array<i32>} : memref<18x8x18xf32, #tpu.memory_space<vmem>>, vector<18x8x1xf32>,
      %c0_256 = arith.constant 0 : index
      %c0_257 = arith.constant 0 : index
      %c0_258 = arith.constant 0 : index
      %300 = vector.load %arg2[%c0_256, %c0_257, %c0_258] : memref<1x8x256xf32, #tpu.memory_space<vmem>>, vector<1x8x256xf32>
      %301 = vector.shape_cast %300 : vector<1x8x256xf32> to vector<8x256xf32>
      %c0_259 = arith.constant 0 : index
      %c0_260 = arith.constant 0 : index
      %302 = vector.load %arg3[%c0_259, %c0_260] : memref<8x1xf32, #tpu.memory_space<vmem>>, vector<8x1xf32>
      %303 = vector.broadcast %302 : vector<8x1xf32> to vector<8x256xf32>
      %304 = arith.mulf %301, %303 : vector<8x256xf32>
      %c0_261 = arith.constant 0 : index
      %c0_262 = arith.constant 0 : index
      %305 = vector.load %arg4[%c0_261, %c0_262] : memref<8x1xf32, #tpu.memory_space<vmem>>, vector<8x1xf32>
      %306 = vector.broadcast %305 : vector<8x1xf32> to vector<8x256xf32>
      %307 = arith.addf %304, %306 : vector<8x256xf32>
      %cst_263 = arith.constant 0.000000e+00 : f32
      %308 = vector.broadcast %cst_263 : f32 to vector<8x256xf32>
      %309 = arith.maximumf %307, %308 : vector<8x256xf32>
      %310 = vector.extract_strided_slice %309 {offsets = [0, 0], sizes = [8, 16], strides = [1, 1]} : vector<8x256xf32> to vector<8x16xf32>
      %c1_264 = arith.constant 1 : index
      %c0_265 = arith.constant 0 : index
      %c1_266 = arith.constant 1 : index
      %311 = vector.load %arg9[%c1_264, %c0_265, %c1_266] : memref<18x8x18xf32, #tpu.memory_space<vmem>>, vector<1x8x16xf32>
      %312 = vector.shape_cast %311 : vector<1x8x16xf32> to vector<8x16xf32>
      %313 = vector.shape_cast %310 : vector<8x16xf32> to vector<1x8x16xf32>
      tpu.vector_store %arg9[%c1_264, %c0_265, %c1_266], %313 {strides = array<i32>} : memref<18x8x18xf32, #tpu.memory_space<vmem>>, vector<1x8x16xf32>,
      %314 = vector.extract_strided_slice %309 {offsets = [0, 16], sizes = [8, 16], strides = [1, 1]} : vector<8x256xf32> to vector<8x16xf32>
      %c2 = arith.constant 2 : index
      %c0_267 = arith.constant 0 : index
      %c1_268 = arith.constant 1 : index
      %315 = vector.load %arg9[%c2, %c0_267, %c1_268] : memref<18x8x18xf32, #tpu.memory_space<vmem>>, vector<1x8x16xf32>
      %316 = vector.shape_cast %315 : vector<1x8x16xf32> to vector<8x16xf32>
      %317 = vector.shape_cast %314 : vector<8x16xf32> to vector<1x8x16xf32>
      tpu.vector_store %arg9[%c2, %c0_267, %c1_268], %317 {strides = array<i32>} : memref<18x8x18xf32, #tpu.memory_space<vmem>>, vector<1x8x16xf32>,
      %318 = vector.extract_strided_slice %309 {offsets = [0, 32], sizes = [8, 16], strides = [1, 1]} : vector<8x256xf32> to vector<8x16xf32>
      %c3 = arith.constant 3 : index
      %c0_269 = arith.constant 0 : index
      %c1_270 = arith.constant 1 : index
      %319 = vector.load %arg9[%c3, %c0_269, %c1_270] : memref<18x8x18xf32, #tpu.memory_space<vmem>>, vector<1x8x16xf32>
      %320 = vector.shape_cast %319 : vector<1x8x16xf32> to vector<8x16xf32>
      %321 = vector.shape_cast %318 : vector<8x16xf32> to vector<1x8x16xf32>
      tpu.vector_store %arg9[%c3, %c0_269, %c1_270], %321 {strides = array<i32>} : memref<18x8x18xf32, #tpu.memory_space<vmem>>, vector<1x8x16xf32>,
      %322 = vector.extract_strided_slice %309 {offsets = [0, 48], sizes = [8, 16], strides = [1, 1]} : vector<8x256xf32> to vector<8x16xf32>
      %c4 = arith.constant 4 : index
      %c0_271 = arith.constant 0 : index
      %c1_272 = arith.constant 1 : index
      %323 = vector.load %arg9[%c4, %c0_271, %c1_272] : memref<18x8x18xf32, #tpu.memory_space<vmem>>, vector<1x8x16xf32>
      %324 = vector.shape_cast %323 : vector<1x8x16xf32> to vector<8x16xf32>
      %325 = vector.shape_cast %322 : vector<8x16xf32> to vector<1x8x16xf32>
      tpu.vector_store %arg9[%c4, %c0_271, %c1_272], %325 {strides = array<i32>} : memref<18x8x18xf32, #tpu.memory_space<vmem>>, vector<1x8x16xf32>,
      %326 = vector.extract_strided_slice %309 {offsets = [0, 64], sizes = [8, 16], strides = [1, 1]} : vector<8x256xf32> to vector<8x16xf32>
      %c5 = arith.constant 5 : index
      %c0_273 = arith.constant 0 : index
      %c1_274 = arith.constant 1 : index
      %327 = vector.load %arg9[%c5, %c0_273, %c1_274] : memref<18x8x18xf32, #tpu.memory_space<vmem>>, vector<1x8x16xf32>
      %328 = vector.shape_cast %327 : vector<1x8x16xf32> to vector<8x16xf32>
      %329 = vector.shape_cast %326 : vector<8x16xf32> to vector<1x8x16xf32>
      tpu.vector_store %arg9[%c5, %c0_273, %c1_274], %329 {strides = array<i32>} : memref<18x8x18xf32, #tpu.memory_space<vmem>>, vector<1x8x16xf32>,
      %330 = vector.extract_strided_slice %309 {offsets = [0, 80], sizes = [8, 16], strides = [1, 1]} : vector<8x256xf32> to vector<8x16xf32>
      %c6 = arith.constant 6 : index
      %c0_275 = arith.constant 0 : index
      %c1_276 = arith.constant 1 : index
      %331 = vector.load %arg9[%c6, %c0_275, %c1_276] : memref<18x8x18xf32, #tpu.memory_space<vmem>>, vector<1x8x16xf32>
      %332 = vector.shape_cast %331 : vector<1x8x16xf32> to vector<8x16xf32>
      %333 = vector.shape_cast %330 : vector<8x16xf32> to vector<1x8x16xf32>
      tpu.vector_store %arg9[%c6, %c0_275, %c1_276], %333 {strides = array<i32>} : memref<18x8x18xf32, #tpu.memory_space<vmem>>, vector<1x8x16xf32>,
      %334 = vector.extract_strided_slice %309 {offsets = [0, 96], sizes = [8, 16], strides = [1, 1]} : vector<8x256xf32> to vector<8x16xf32>
      %c7 = arith.constant 7 : index
      %c0_277 = arith.constant 0 : index
      %c1_278 = arith.constant 1 : index
      %335 = vector.load %arg9[%c7, %c0_277, %c1_278] : memref<18x8x18xf32, #tpu.memory_space<vmem>>, vector<1x8x16xf32>
      %336 = vector.shape_cast %335 : vector<1x8x16xf32> to vector<8x16xf32>
      %337 = vector.shape_cast %334 : vector<8x16xf32> to vector<1x8x16xf32>
      tpu.vector_store %arg9[%c7, %c0_277, %c1_278], %337 {strides = array<i32>} : memref<18x8x18xf32, #tpu.memory_space<vmem>>, vector<1x8x16xf32>,
      %338 = vector.extract_strided_slice %309 {offsets = [0, 112], sizes = [8, 16], strides = [1, 1]} : vector<8x256xf32> to vector<8x16xf32>
      %c8_279 = arith.constant 8 : index
      %c0_280 = arith.constant 0 : index
      %c1_281 = arith.constant 1 : index
      %339 = vector.load %arg9[%c8_279, %c0_280, %c1_281] : memref<18x8x18xf32, #tpu.memory_space<vmem>>, vector<1x8x16xf32>
      %340 = vector.shape_cast %339 : vector<1x8x16xf32> to vector<8x16xf32>
      %341 = vector.shape_cast %338 : vector<8x16xf32> to vector<1x8x16xf32>
      tpu.vector_store %arg9[%c8_279, %c0_280, %c1_281], %341 {strides = array<i32>} : memref<18x8x18xf32, #tpu.memory_space<vmem>>, vector<1x8x16xf32>,
      %342 = vector.extract_strided_slice %309 {offsets = [0, 128], sizes = [8, 16], strides = [1, 1]} : vector<8x256xf32> to vector<8x16xf32>
      %c9 = arith.constant 9 : index
      %c0_282 = arith.constant 0 : index
      %c1_283 = arith.constant 1 : index
      %343 = vector.load %arg9[%c9, %c0_282, %c1_283] : memref<18x8x18xf32, #tpu.memory_space<vmem>>, vector<1x8x16xf32>
      %344 = vector.shape_cast %343 : vector<1x8x16xf32> to vector<8x16xf32>
      %345 = vector.shape_cast %342 : vector<8x16xf32> to vector<1x8x16xf32>
      tpu.vector_store %arg9[%c9, %c0_282, %c1_283], %345 {strides = array<i32>} : memref<18x8x18xf32, #tpu.memory_space<vmem>>, vector<1x8x16xf32>,
      %346 = vector.extract_strided_slice %309 {offsets = [0, 144], sizes = [8, 16], strides = [1, 1]} : vector<8x256xf32> to vector<8x16xf32>
      %c10 = arith.constant 10 : index
      %c0_284 = arith.constant 0 : index
      %c1_285 = arith.constant 1 : index
      %347 = vector.load %arg9[%c10, %c0_284, %c1_285] : memref<18x8x18xf32, #tpu.memory_space<vmem>>, vector<1x8x16xf32>
      %348 = vector.shape_cast %347 : vector<1x8x16xf32> to vector<8x16xf32>
      %349 = vector.shape_cast %346 : vector<8x16xf32> to vector<1x8x16xf32>
      tpu.vector_store %arg9[%c10, %c0_284, %c1_285], %349 {strides = array<i32>} : memref<18x8x18xf32, #tpu.memory_space<vmem>>, vector<1x8x16xf32>,
      %350 = vector.extract_strided_slice %309 {offsets = [0, 160], sizes = [8, 16], strides = [1, 1]} : vector<8x256xf32> to vector<8x16xf32>
      %c11 = arith.constant 11 : index
      %c0_286 = arith.constant 0 : index
      %c1_287 = arith.constant 1 : index
      %351 = vector.load %arg9[%c11, %c0_286, %c1_287] : memref<18x8x18xf32, #tpu.memory_space<vmem>>, vector<1x8x16xf32>
      %352 = vector.shape_cast %351 : vector<1x8x16xf32> to vector<8x16xf32>
      %353 = vector.shape_cast %350 : vector<8x16xf32> to vector<1x8x16xf32>
      tpu.vector_store %arg9[%c11, %c0_286, %c1_287], %353 {strides = array<i32>} : memref<18x8x18xf32, #tpu.memory_space<vmem>>, vector<1x8x16xf32>,
      %354 = vector.extract_strided_slice %309 {offsets = [0, 176], sizes = [8, 16], strides = [1, 1]} : vector<8x256xf32> to vector<8x16xf32>
      %c12 = arith.constant 12 : index
      %c0_288 = arith.constant 0 : index
      %c1_289 = arith.constant 1 : index
      %355 = vector.load %arg9[%c12, %c0_288, %c1_289] : memref<18x8x18xf32, #tpu.memory_space<vmem>>, vector<1x8x16xf32>
      %356 = vector.shape_cast %355 : vector<1x8x16xf32> to vector<8x16xf32>
      %357 = vector.shape_cast %354 : vector<8x16xf32> to vector<1x8x16xf32>
      tpu.vector_store %arg9[%c12, %c0_288, %c1_289], %357 {strides = array<i32>} : memref<18x8x18xf32, #tpu.memory_space<vmem>>, vector<1x8x16xf32>,
      %358 = vector.extract_strided_slice %309 {offsets = [0, 192], sizes = [8, 16], strides = [1, 1]} : vector<8x256xf32> to vector<8x16xf32>
      %c13 = arith.constant 13 : index
      %c0_290 = arith.constant 0 : index
      %c1_291 = arith.constant 1 : index
      %359 = vector.load %arg9[%c13, %c0_290, %c1_291] : memref<18x8x18xf32, #tpu.memory_space<vmem>>, vector<1x8x16xf32>
      %360 = vector.shape_cast %359 : vector<1x8x16xf32> to vector<8x16xf32>
      %361 = vector.shape_cast %358 : vector<8x16xf32> to vector<1x8x16xf32>
      tpu.vector_store %arg9[%c13, %c0_290, %c1_291], %361 {strides = array<i32>} : memref<18x8x18xf32, #tpu.memory_space<vmem>>, vector<1x8x16xf32>,
      %362 = vector.extract_strided_slice %309 {offsets = [0, 208], sizes = [8, 16], strides = [1, 1]} : vector<8x256xf32> to vector<8x16xf32>
      %c14 = arith.constant 14 : index
      %c0_292 = arith.constant 0 : index
      %c1_293 = arith.constant 1 : index
      %363 = vector.load %arg9[%c14, %c0_292, %c1_293] : memref<18x8x18xf32, #tpu.memory_space<vmem>>, vector<1x8x16xf32>
      %364 = vector.shape_cast %363 : vector<1x8x16xf32> to vector<8x16xf32>
      %365 = vector.shape_cast %362 : vector<8x16xf32> to vector<1x8x16xf32>
      tpu.vector_store %arg9[%c14, %c0_292, %c1_293], %365 {strides = array<i32>} : memref<18x8x18xf32, #tpu.memory_space<vmem>>, vector<1x8x16xf32>,
      %366 = vector.extract_strided_slice %309 {offsets = [0, 224], sizes = [8, 16], strides = [1, 1]} : vector<8x256xf32> to vector<8x16xf32>
      %c15 = arith.constant 15 : index
      %c0_294 = arith.constant 0 : index
      %c1_295 = arith.constant 1 : index
      %367 = vector.load %arg9[%c15, %c0_294, %c1_295] : memref<18x8x18xf32, #tpu.memory_space<vmem>>, vector<1x8x16xf32>
      %368 = vector.shape_cast %367 : vector<1x8x16xf32> to vector<8x16xf32>
      %369 = vector.shape_cast %366 : vector<8x16xf32> to vector<1x8x16xf32>
      tpu.vector_store %arg9[%c15, %c0_294, %c1_295], %369 {strides = array<i32>} : memref<18x8x18xf32, #tpu.memory_space<vmem>>, vector<1x8x16xf32>,
      %370 = vector.extract_strided_slice %309 {offsets = [0, 240], sizes = [8, 16], strides = [1, 1]} : vector<8x256xf32> to vector<8x16xf32>
      %c16_296 = arith.constant 16 : index
      %c0_297 = arith.constant 0 : index
      %c1_298 = arith.constant 1 : index
      %371 = vector.load %arg9[%c16_296, %c0_297, %c1_298] : memref<18x8x18xf32, #tpu.memory_space<vmem>>, vector<1x8x16xf32>
      %372 = vector.shape_cast %371 : vector<1x8x16xf32> to vector<8x16xf32>
      %373 = vector.shape_cast %370 : vector<8x16xf32> to vector<1x8x16xf32>
      tpu.vector_store %arg9[%c16_296, %c0_297, %c1_298], %373 {strides = array<i32>} : memref<18x8x18xf32, #tpu.memory_space<vmem>>, vector<1x8x16xf32>,
    } else {
    }
    %c8_i32 = arith.constant 8 : i32
    %3 = arith.muli %arg1, %c8_i32 : i32
    %c0_i32_1 = arith.constant 0 : i32
    %4 = arith.addi %3, %c0_i32_1 : i32
    %c0_i32_2 = arith.constant 0 : i32
    %5 = arith.addi %4, %c0_i32_2 : i32
    %6 = arith.index_cast %5 : i32 to index
    %c0 = arith.constant 0 : index
    %c0_3 = arith.constant 0 : index
    %7 = vector.load %arg9[%6, %c0, %c0_3] : memref<18x8x18xf32, #tpu.memory_space<vmem>>, vector<1x8x18xf32>
    %8 = vector.shape_cast %7 : vector<1x8x18xf32> to vector<8x18xf32>
    %9 = vector.extract_strided_slice %8 {offsets = [0, 0], sizes = [8, 16], strides = [1, 1]} : vector<8x18xf32> to vector<8x16xf32>
    %c0_4 = arith.constant 0 : index
    %c0_5 = arith.constant 0 : index
    %10 = vector.load %arg10[%c0_4, %c0_5] : memref<72x128xf32, #tpu.memory_space<vmem>>, vector<8x16xf32>
    tpu.vector_store %arg10[%c0_4, %c0_5], %9 {strides = array<i32>} : memref<72x128xf32, #tpu.memory_space<vmem>>, vector<8x16xf32>,
    %11 = vector.extract_strided_slice %8 {offsets = [0, 1], sizes = [8, 16], strides = [1, 1]} : vector<8x18xf32> to vector<8x16xf32>
    %c8 = arith.constant 8 : index
    %c0_6 = arith.constant 0 : index
    %12 = vector.load %arg10[%c8, %c0_6] : memref<72x128xf32, #tpu.memory_space<vmem>>, vector<8x16xf32>
    tpu.vector_store %arg10[%c8, %c0_6], %11 {strides = array<i32>} : memref<72x128xf32, #tpu.memory_space<vmem>>, vector<8x16xf32>,
    %13 = vector.extract_strided_slice %8 {offsets = [0, 2], sizes = [8, 16], strides = [1, 1]} : vector<8x18xf32> to vector<8x16xf32>
    %c16 = arith.constant 16 : index
    %c0_7 = arith.constant 0 : index
    %14 = vector.load %arg10[%c16, %c0_7] : memref<72x128xf32, #tpu.memory_space<vmem>>, vector<8x16xf32>
    tpu.vector_store %arg10[%c16, %c0_7], %13 {strides = array<i32>} : memref<72x128xf32, #tpu.memory_space<vmem>>, vector<8x16xf32>,
    %c0_i32_8 = arith.constant 0 : i32
    %15 = arith.addi %3, %c0_i32_8 : i32
    %c1_i32 = arith.constant 1 : i32
    %16 = arith.addi %15, %c1_i32 : i32
    %17 = arith.index_cast %16 : i32 to index
    %c0_9 = arith.constant 0 : index
    %c0_10 = arith.constant 0 : index
    %18 = vector.load %arg9[%17, %c0_9, %c0_10] : memref<18x8x18xf32, #tpu.memory_space<vmem>>, vector<1x8x18xf32>
    %19 = vector.shape_cast %18 : vector<1x8x18xf32> to vector<8x18xf32>
    %20 = vector.extract_strided_slice %19 {offsets = [0, 0], sizes = [8, 16], strides = [1, 1]} : vector<8x18xf32> to vector<8x16xf32>
    %c0_11 = arith.constant 0 : index
    %c16_12 = arith.constant 16 : index
    %21 = vector.load %arg10[%c0_11, %c16_12] : memref<72x128xf32, #tpu.memory_space<vmem>>, vector<8x16xf32>
    tpu.vector_store %arg10[%c0_11, %c16_12], %20 {strides = array<i32>} : memref<72x128xf32, #tpu.memory_space<vmem>>, vector<8x16xf32>,
    %22 = vector.extract_strided_slice %19 {offsets = [0, 1], sizes = [8, 16], strides = [1, 1]} : vector<8x18xf32> to vector<8x16xf32>
    %c8_13 = arith.constant 8 : index
    %c16_14 = arith.constant 16 : index
    %23 = vector.load %arg10[%c8_13, %c16_14] : memref<72x128xf32, #tpu.memory_space<vmem>>, vector<8x16xf32>
    tpu.vector_store %arg10[%c8_13, %c16_14], %22 {strides = array<i32>} : memref<72x128xf32, #tpu.memory_space<vmem>>, vector<8x16xf32>,
    %24 = vector.extract_strided_slice %19 {offsets = [0, 2], sizes = [8, 16], strides = [1, 1]} : vector<8x18xf32> to vector<8x16xf32>
    %c16_15 = arith.constant 16 : index
    %c16_16 = arith.constant 16 : index
    %25 = vector.load %arg10[%c16_15, %c16_16] : memref<72x128xf32, #tpu.memory_space<vmem>>, vector<8x16xf32>
    tpu.vector_store %arg10[%c16_15, %c16_16], %24 {strides = array<i32>} : memref<72x128xf32, #tpu.memory_space<vmem>>, vector<8x16xf32>,
    %c0_i32_17 = arith.constant 0 : i32
    %26 = arith.addi %3, %c0_i32_17 : i32
    %c2_i32 = arith.constant 2 : i32
    %27 = arith.addi %26, %c2_i32 : i32
    %28 = arith.index_cast %27 : i32 to index
    %c0_18 = arith.constant 0 : index
    %c0_19 = arith.constant 0 : index
    %29 = vector.load %arg9[%28, %c0_18, %c0_19] : memref<18x8x18xf32, #tpu.memory_space<vmem>>, vector<1x8x18xf32>
    %30 = vector.shape_cast %29 : vector<1x8x18xf32> to vector<8x18xf32>
    %31 = vector.extract_strided_slice %30 {offsets = [0, 0], sizes = [8, 16], strides = [1, 1]} : vector<8x18xf32> to vector<8x16xf32>
    %c0_20 = arith.constant 0 : index
    %c32 = arith.constant 32 : index
    %32 = vector.load %arg10[%c0_20, %c32] : memref<72x128xf32, #tpu.memory_space<vmem>>, vector<8x16xf32>
    tpu.vector_store %arg10[%c0_20, %c32], %31 {strides = array<i32>} : memref<72x128xf32, #tpu.memory_space<vmem>>, vector<8x16xf32>,
    %33 = vector.extract_strided_slice %30 {offsets = [0, 1], sizes = [8, 16], strides = [1, 1]} : vector<8x18xf32> to vector<8x16xf32>
    %c8_21 = arith.constant 8 : index
    %c32_22 = arith.constant 32 : index
    %34 = vector.load %arg10[%c8_21, %c32_22] : memref<72x128xf32, #tpu.memory_space<vmem>>, vector<8x16xf32>
    tpu.vector_store %arg10[%c8_21, %c32_22], %33 {strides = array<i32>} : memref<72x128xf32, #tpu.memory_space<vmem>>, vector<8x16xf32>,
    %35 = vector.extract_strided_slice %30 {offsets = [0, 2], sizes = [8, 16], strides = [1, 1]} : vector<8x18xf32> to vector<8x16xf32>
    %c16_23 = arith.constant 16 : index
    %c32_24 = arith.constant 32 : index
    %36 = vector.load %arg10[%c16_23, %c32_24] : memref<72x128xf32, #tpu.memory_space<vmem>>, vector<8x16xf32>
    tpu.vector_store %arg10[%c16_23, %c32_24], %35 {strides = array<i32>} : memref<72x128xf32, #tpu.memory_space<vmem>>, vector<8x16xf32>,
    %c0_i32_25 = arith.constant 0 : i32
    %37 = arith.addi %3, %c0_i32_25 : i32
    %c3_i32 = arith.constant 3 : i32
    %38 = arith.addi %37, %c3_i32 : i32
    %39 = arith.index_cast %38 : i32 to index
    %c0_26 = arith.constant 0 : index
    %c0_27 = arith.constant 0 : index
    %40 = vector.load %arg9[%39, %c0_26, %c0_27] : memref<18x8x18xf32, #tpu.memory_space<vmem>>, vector<1x8x18xf32>
    %41 = vector.shape_cast %40 : vector<1x8x18xf32> to vector<8x18xf32>
    %42 = vector.extract_strided_slice %41 {offsets = [0, 0], sizes = [8, 16], strides = [1, 1]} : vector<8x18xf32> to vector<8x16xf32>
    %c0_28 = arith.constant 0 : index
    %c48 = arith.constant 48 : index
    %43 = vector.load %arg10[%c0_28, %c48] : memref<72x128xf32, #tpu.memory_space<vmem>>, vector<8x16xf32>
    tpu.vector_store %arg10[%c0_28, %c48], %42 {strides = array<i32>} : memref<72x128xf32, #tpu.memory_space<vmem>>, vector<8x16xf32>,
    %44 = vector.extract_strided_slice %41 {offsets = [0, 1], sizes = [8, 16], strides = [1, 1]} : vector<8x18xf32> to vector<8x16xf32>
    %c8_29 = arith.constant 8 : index
    %c48_30 = arith.constant 48 : index
    %45 = vector.load %arg10[%c8_29, %c48_30] : memref<72x128xf32, #tpu.memory_space<vmem>>, vector<8x16xf32>
    tpu.vector_store %arg10[%c8_29, %c48_30], %44 {strides = array<i32>} : memref<72x128xf32, #tpu.memory_space<vmem>>, vector<8x16xf32>,
    %46 = vector.extract_strided_slice %41 {offsets = [0, 2], sizes = [8, 16], strides = [1, 1]} : vector<8x18xf32> to vector<8x16xf32>
    %c16_31 = arith.constant 16 : index
    %c48_32 = arith.constant 48 : index
    %47 = vector.load %arg10[%c16_31, %c48_32] : memref<72x128xf32, #tpu.memory_space<vmem>>, vector<8x16xf32>
    tpu.vector_store %arg10[%c16_31, %c48_32], %46 {strides = array<i32>} : memref<72x128xf32, #tpu.memory_space<vmem>>, vector<8x16xf32>,
    %c0_i32_33 = arith.constant 0 : i32
    %48 = arith.addi %3, %c0_i32_33 : i32
    %c4_i32 = arith.constant 4 : i32
    %49 = arith.addi %48, %c4_i32 : i32
    %50 = arith.index_cast %49 : i32 to index
    %c0_34 = arith.constant 0 : index
    %c0_35 = arith.constant 0 : index
    %51 = vector.load %arg9[%50, %c0_34, %c0_35] : memref<18x8x18xf32, #tpu.memory_space<vmem>>, vector<1x8x18xf32>
    %52 = vector.shape_cast %51 : vector<1x8x18xf32> to vector<8x18xf32>
    %53 = vector.extract_strided_slice %52 {offsets = [0, 0], sizes = [8, 16], strides = [1, 1]} : vector<8x18xf32> to vector<8x16xf32>
    %c0_36 = arith.constant 0 : index
    %c64 = arith.constant 64 : index
    %54 = vector.load %arg10[%c0_36, %c64] : memref<72x128xf32, #tpu.memory_space<vmem>>, vector<8x16xf32>
    tpu.vector_store %arg10[%c0_36, %c64], %53 {strides = array<i32>} : memref<72x128xf32, #tpu.memory_space<vmem>>, vector<8x16xf32>,
    %55 = vector.extract_strided_slice %52 {offsets = [0, 1], sizes = [8, 16], strides = [1, 1]} : vector<8x18xf32> to vector<8x16xf32>
    %c8_37 = arith.constant 8 : index
    %c64_38 = arith.constant 64 : index
    %56 = vector.load %arg10[%c8_37, %c64_38] : memref<72x128xf32, #tpu.memory_space<vmem>>, vector<8x16xf32>
    tpu.vector_store %arg10[%c8_37, %c64_38], %55 {strides = array<i32>} : memref<72x128xf32, #tpu.memory_space<vmem>>, vector<8x16xf32>,
    %57 = vector.extract_strided_slice %52 {offsets = [0, 2], sizes = [8, 16], strides = [1, 1]} : vector<8x18xf32> to vector<8x16xf32>
    %c16_39 = arith.constant 16 : index
    %c64_40 = arith.constant 64 : index
    %58 = vector.load %arg10[%c16_39, %c64_40] : memref<72x128xf32, #tpu.memory_space<vmem>>, vector<8x16xf32>
    tpu.vector_store %arg10[%c16_39, %c64_40], %57 {strides = array<i32>} : memref<72x128xf32, #tpu.memory_space<vmem>>, vector<8x16xf32>,
    %c0_i32_41 = arith.constant 0 : i32
    %59 = arith.addi %3, %c0_i32_41 : i32
    %c5_i32 = arith.constant 5 : i32
    %60 = arith.addi %59, %c5_i32 : i32
    %61 = arith.index_cast %60 : i32 to index
    %c0_42 = arith.constant 0 : index
    %c0_43 = arith.constant 0 : index
    %62 = vector.load %arg9[%61, %c0_42, %c0_43] : memref<18x8x18xf32, #tpu.memory_space<vmem>>, vector<1x8x18xf32>
    %63 = vector.shape_cast %62 : vector<1x8x18xf32> to vector<8x18xf32>
    %64 = vector.extract_strided_slice %63 {offsets = [0, 0], sizes = [8, 16], strides = [1, 1]} : vector<8x18xf32> to vector<8x16xf32>
    %c0_44 = arith.constant 0 : index
    %c80 = arith.constant 80 : index
    %65 = vector.load %arg10[%c0_44, %c80] : memref<72x128xf32, #tpu.memory_space<vmem>>, vector<8x16xf32>
    tpu.vector_store %arg10[%c0_44, %c80], %64 {strides = array<i32>} : memref<72x128xf32, #tpu.memory_space<vmem>>, vector<8x16xf32>,
    %66 = vector.extract_strided_slice %63 {offsets = [0, 1], sizes = [8, 16], strides = [1, 1]} : vector<8x18xf32> to vector<8x16xf32>
    %c8_45 = arith.constant 8 : index
    %c80_46 = arith.constant 80 : index
    %67 = vector.load %arg10[%c8_45, %c80_46] : memref<72x128xf32, #tpu.memory_space<vmem>>, vector<8x16xf32>
    tpu.vector_store %arg10[%c8_45, %c80_46], %66 {strides = array<i32>} : memref<72x128xf32, #tpu.memory_space<vmem>>, vector<8x16xf32>,
    %68 = vector.extract_strided_slice %63 {offsets = [0, 2], sizes = [8, 16], strides = [1, 1]} : vector<8x18xf32> to vector<8x16xf32>
    %c16_47 = arith.constant 16 : index
    %c80_48 = arith.constant 80 : index
    %69 = vector.load %arg10[%c16_47, %c80_48] : memref<72x128xf32, #tpu.memory_space<vmem>>, vector<8x16xf32>
    tpu.vector_store %arg10[%c16_47, %c80_48], %68 {strides = array<i32>} : memref<72x128xf32, #tpu.memory_space<vmem>>, vector<8x16xf32>,
    %c0_i32_49 = arith.constant 0 : i32
    %70 = arith.addi %3, %c0_i32_49 : i32
    %c6_i32 = arith.constant 6 : i32
    %71 = arith.addi %70, %c6_i32 : i32
    %72 = arith.index_cast %71 : i32 to index
    %c0_50 = arith.constant 0 : index
    %c0_51 = arith.constant 0 : index
    %73 = vector.load %arg9[%72, %c0_50, %c0_51] : memref<18x8x18xf32, #tpu.memory_space<vmem>>, vector<1x8x18xf32>
    %74 = vector.shape_cast %73 : vector<1x8x18xf32> to vector<8x18xf32>
    %75 = vector.extract_strided_slice %74 {offsets = [0, 0], sizes = [8, 16], strides = [1, 1]} : vector<8x18xf32> to vector<8x16xf32>
    %c0_52 = arith.constant 0 : index
    %c96 = arith.constant 96 : index
    %76 = vector.load %arg10[%c0_52, %c96] : memref<72x128xf32, #tpu.memory_space<vmem>>, vector<8x16xf32>
    tpu.vector_store %arg10[%c0_52, %c96], %75 {strides = array<i32>} : memref<72x128xf32, #tpu.memory_space<vmem>>, vector<8x16xf32>,
    %77 = vector.extract_strided_slice %74 {offsets = [0, 1], sizes = [8, 16], strides = [1, 1]} : vector<8x18xf32> to vector<8x16xf32>
    %c8_53 = arith.constant 8 : index
    %c96_54 = arith.constant 96 : index
    %78 = vector.load %arg10[%c8_53, %c96_54] : memref<72x128xf32, #tpu.memory_space<vmem>>, vector<8x16xf32>
    tpu.vector_store %arg10[%c8_53, %c96_54], %77 {strides = array<i32>} : memref<72x128xf32, #tpu.memory_space<vmem>>, vector<8x16xf32>,
    %79 = vector.extract_strided_slice %74 {offsets = [0, 2], sizes = [8, 16], strides = [1, 1]} : vector<8x18xf32> to vector<8x16xf32>
    %c16_55 = arith.constant 16 : index
    %c96_56 = arith.constant 96 : index
    %80 = vector.load %arg10[%c16_55, %c96_56] : memref<72x128xf32, #tpu.memory_space<vmem>>, vector<8x16xf32>
    tpu.vector_store %arg10[%c16_55, %c96_56], %79 {strides = array<i32>} : memref<72x128xf32, #tpu.memory_space<vmem>>, vector<8x16xf32>,
    %c0_i32_57 = arith.constant 0 : i32
    %81 = arith.addi %3, %c0_i32_57 : i32
    %c7_i32 = arith.constant 7 : i32
    %82 = arith.addi %81, %c7_i32 : i32
    %83 = arith.index_cast %82 : i32 to index
    %c0_58 = arith.constant 0 : index
    %c0_59 = arith.constant 0 : index
    %84 = vector.load %arg9[%83, %c0_58, %c0_59] : memref<18x8x18xf32, #tpu.memory_space<vmem>>, vector<1x8x18xf32>
    %85 = vector.shape_cast %84 : vector<1x8x18xf32> to vector<8x18xf32>
    %86 = vector.extract_strided_slice %85 {offsets = [0, 0], sizes = [8, 16], strides = [1, 1]} : vector<8x18xf32> to vector<8x16xf32>
    %c0_60 = arith.constant 0 : index
    %c112 = arith.constant 112 : index
    %87 = vector.load %arg10[%c0_60, %c112] : memref<72x128xf32, #tpu.memory_space<vmem>>, vector<8x16xf32>
    tpu.vector_store %arg10[%c0_60, %c112], %86 {strides = array<i32>} : memref<72x128xf32, #tpu.memory_space<vmem>>, vector<8x16xf32>,
    %88 = vector.extract_strided_slice %85 {offsets = [0, 1], sizes = [8, 16], strides = [1, 1]} : vector<8x18xf32> to vector<8x16xf32>
    %c8_61 = arith.constant 8 : index
    %c112_62 = arith.constant 112 : index
    %89 = vector.load %arg10[%c8_61, %c112_62] : memref<72x128xf32, #tpu.memory_space<vmem>>, vector<8x16xf32>
    tpu.vector_store %arg10[%c8_61, %c112_62], %88 {strides = array<i32>} : memref<72x128xf32, #tpu.memory_space<vmem>>, vector<8x16xf32>,
    %90 = vector.extract_strided_slice %85 {offsets = [0, 2], sizes = [8, 16], strides = [1, 1]} : vector<8x18xf32> to vector<8x16xf32>
    %c16_63 = arith.constant 16 : index
    %c112_64 = arith.constant 112 : index
    %91 = vector.load %arg10[%c16_63, %c112_64] : memref<72x128xf32, #tpu.memory_space<vmem>>, vector<8x16xf32>
    tpu.vector_store %arg10[%c16_63, %c112_64], %90 {strides = array<i32>} : memref<72x128xf32, #tpu.memory_space<vmem>>, vector<8x16xf32>,
    %c1_i32_65 = arith.constant 1 : i32
    %92 = arith.addi %3, %c1_i32_65 : i32
    %c0_i32_66 = arith.constant 0 : i32
    %93 = arith.addi %92, %c0_i32_66 : i32
    %94 = arith.index_cast %93 : i32 to index
    %c0_67 = arith.constant 0 : index
    %c0_68 = arith.constant 0 : index
    %95 = vector.load %arg9[%94, %c0_67, %c0_68] : memref<18x8x18xf32, #tpu.memory_space<vmem>>, vector<1x8x18xf32>
    %96 = vector.shape_cast %95 : vector<1x8x18xf32> to vector<8x18xf32>
    %97 = vector.extract_strided_slice %96 {offsets = [0, 0], sizes = [8, 16], strides = [1, 1]} : vector<8x18xf32> to vector<8x16xf32>
    %c24 = arith.constant 24 : index
    %c0_69 = arith.constant 0 : index
    %98 = vector.load %arg10[%c24, %c0_69] : memref<72x128xf32, #tpu.memory_space<vmem>>, vector<8x16xf32>
    tpu.vector_store %arg10[%c24, %c0_69], %97 {strides = array<i32>} : memref<72x128xf32, #tpu.memory_space<vmem>>, vector<8x16xf32>,
    %99 = vector.extract_strided_slice %96 {offsets = [0, 1], sizes = [8, 16], strides = [1, 1]} : vector<8x18xf32> to vector<8x16xf32>
    %c32_70 = arith.constant 32 : index
    %c0_71 = arith.constant 0 : index
    %100 = vector.load %arg10[%c32_70, %c0_71] : memref<72x128xf32, #tpu.memory_space<vmem>>, vector<8x16xf32>
    tpu.vector_store %arg10[%c32_70, %c0_71], %99 {strides = array<i32>} : memref<72x128xf32, #tpu.memory_space<vmem>>, vector<8x16xf32>,
    %101 = vector.extract_strided_slice %96 {offsets = [0, 2], sizes = [8, 16], strides = [1, 1]} : vector<8x18xf32> to vector<8x16xf32>
    %c40 = arith.constant 40 : index
    %c0_72 = arith.constant 0 : index
    %102 = vector.load %arg10[%c40, %c0_72] : memref<72x128xf32, #tpu.memory_space<vmem>>, vector<8x16xf32>
    tpu.vector_store %arg10[%c40, %c0_72], %101 {strides = array<i32>} : memref<72x128xf32, #tpu.memory_space<vmem>>, vector<8x16xf32>,
    %c1_i32_73 = arith.constant 1 : i32
    %103 = arith.addi %3, %c1_i32_73 : i32
    %c1_i32_74 = arith.constant 1 : i32
    %104 = arith.addi %103, %c1_i32_74 : i32
    %105 = arith.index_cast %104 : i32 to index
    %c0_75 = arith.constant 0 : index
    %c0_76 = arith.constant 0 : index
    %106 = vector.load %arg9[%105, %c0_75, %c0_76] : memref<18x8x18xf32, #tpu.memory_space<vmem>>, vector<1x8x18xf32>
    %107 = vector.shape_cast %106 : vector<1x8x18xf32> to vector<8x18xf32>
    %108 = vector.extract_strided_slice %107 {offsets = [0, 0], sizes = [8, 16], strides = [1, 1]} : vector<8x18xf32> to vector<8x16xf32>
    %c24_77 = arith.constant 24 : index
    %c16_78 = arith.constant 16 : index
    %109 = vector.load %arg10[%c24_77, %c16_78] : memref<72x128xf32, #tpu.memory_space<vmem>>, vector<8x16xf32>
    tpu.vector_store %arg10[%c24_77, %c16_78], %108 {strides = array<i32>} : memref<72x128xf32, #tpu.memory_space<vmem>>, vector<8x16xf32>,
    %110 = vector.extract_strided_slice %107 {offsets = [0, 1], sizes = [8, 16], strides = [1, 1]} : vector<8x18xf32> to vector<8x16xf32>
    %c32_79 = arith.constant 32 : index
    %c16_80 = arith.constant 16 : index
    %111 = vector.load %arg10[%c32_79, %c16_80] : memref<72x128xf32, #tpu.memory_space<vmem>>, vector<8x16xf32>
    tpu.vector_store %arg10[%c32_79, %c16_80], %110 {strides = array<i32>} : memref<72x128xf32, #tpu.memory_space<vmem>>, vector<8x16xf32>,
    %112 = vector.extract_strided_slice %107 {offsets = [0, 2], sizes = [8, 16], strides = [1, 1]} : vector<8x18xf32> to vector<8x16xf32>
    %c40_81 = arith.constant 40 : index
    %c16_82 = arith.constant 16 : index
    %113 = vector.load %arg10[%c40_81, %c16_82] : memref<72x128xf32, #tpu.memory_space<vmem>>, vector<8x16xf32>
    tpu.vector_store %arg10[%c40_81, %c16_82], %112 {strides = array<i32>} : memref<72x128xf32, #tpu.memory_space<vmem>>, vector<8x16xf32>,
    %c1_i32_83 = arith.constant 1 : i32
    %114 = arith.addi %3, %c1_i32_83 : i32
    %c2_i32_84 = arith.constant 2 : i32
    %115 = arith.addi %114, %c2_i32_84 : i32
    %116 = arith.index_cast %115 : i32 to index
    %c0_85 = arith.constant 0 : index
    %c0_86 = arith.constant 0 : index
    %117 = vector.load %arg9[%116, %c0_85, %c0_86] : memref<18x8x18xf32, #tpu.memory_space<vmem>>, vector<1x8x18xf32>
    %118 = vector.shape_cast %117 : vector<1x8x18xf32> to vector<8x18xf32>
    %119 = vector.extract_strided_slice %118 {offsets = [0, 0], sizes = [8, 16], strides = [1, 1]} : vector<8x18xf32> to vector<8x16xf32>
    %c24_87 = arith.constant 24 : index
    %c32_88 = arith.constant 32 : index
    %120 = vector.load %arg10[%c24_87, %c32_88] : memref<72x128xf32, #tpu.memory_space<vmem>>, vector<8x16xf32>
    tpu.vector_store %arg10[%c24_87, %c32_88], %119 {strides = array<i32>} : memref<72x128xf32, #tpu.memory_space<vmem>>, vector<8x16xf32>,
    %121 = vector.extract_strided_slice %118 {offsets = [0, 1], sizes = [8, 16], strides = [1, 1]} : vector<8x18xf32> to vector<8x16xf32>
    %c32_89 = arith.constant 32 : index
    %c32_90 = arith.constant 32 : index
    %122 = vector.load %arg10[%c32_89, %c32_90] : memref<72x128xf32, #tpu.memory_space<vmem>>, vector<8x16xf32>
    tpu.vector_store %arg10[%c32_89, %c32_90], %121 {strides = array<i32>} : memref<72x128xf32, #tpu.memory_space<vmem>>, vector<8x16xf32>,
    %123 = vector.extract_strided_slice %118 {offsets = [0, 2], sizes = [8, 16], strides = [1, 1]} : vector<8x18xf32> to vector<8x16xf32>
    %c40_91 = arith.constant 40 : index
    %c32_92 = arith.constant 32 : index
    %124 = vector.load %arg10[%c40_91, %c32_92] : memref<72x128xf32, #tpu.memory_space<vmem>>, vector<8x16xf32>
    tpu.vector_store %arg10[%c40_91, %c32_92], %123 {strides = array<i32>} : memref<72x128xf32, #tpu.memory_space<vmem>>, vector<8x16xf32>,
    %c1_i32_93 = arith.constant 1 : i32
    %125 = arith.addi %3, %c1_i32_93 : i32
    %c3_i32_94 = arith.constant 3 : i32
    %126 = arith.addi %125, %c3_i32_94 : i32
    %127 = arith.index_cast %126 : i32 to index
    %c0_95 = arith.constant 0 : index
    %c0_96 = arith.constant 0 : index
    %128 = vector.load %arg9[%127, %c0_95, %c0_96] : memref<18x8x18xf32, #tpu.memory_space<vmem>>, vector<1x8x18xf32>
    %129 = vector.shape_cast %128 : vector<1x8x18xf32> to vector<8x18xf32>
    %130 = vector.extract_strided_slice %129 {offsets = [0, 0], sizes = [8, 16], strides = [1, 1]} : vector<8x18xf32> to vector<8x16xf32>
    %c24_97 = arith.constant 24 : index
    %c48_98 = arith.constant 48 : index
    %131 = vector.load %arg10[%c24_97, %c48_98] : memref<72x128xf32, #tpu.memory_space<vmem>>, vector<8x16xf32>
    tpu.vector_store %arg10[%c24_97, %c48_98], %130 {strides = array<i32>} : memref<72x128xf32, #tpu.memory_space<vmem>>, vector<8x16xf32>,
    %132 = vector.extract_strided_slice %129 {offsets = [0, 1], sizes = [8, 16], strides = [1, 1]} : vector<8x18xf32> to vector<8x16xf32>
    %c32_99 = arith.constant 32 : index
    %c48_100 = arith.constant 48 : index
    %133 = vector.load %arg10[%c32_99, %c48_100] : memref<72x128xf32, #tpu.memory_space<vmem>>, vector<8x16xf32>
    tpu.vector_store %arg10[%c32_99, %c48_100], %132 {strides = array<i32>} : memref<72x128xf32, #tpu.memory_space<vmem>>, vector<8x16xf32>,
    %134 = vector.extract_strided_slice %129 {offsets = [0, 2], sizes = [8, 16], strides = [1, 1]} : vector<8x18xf32> to vector<8x16xf32>
    %c40_101 = arith.constant 40 : index
    %c48_102 = arith.constant 48 : index
    %135 = vector.load %arg10[%c40_101, %c48_102] : memref<72x128xf32, #tpu.memory_space<vmem>>, vector<8x16xf32>
    tpu.vector_store %arg10[%c40_101, %c48_102], %134 {strides = array<i32>} : memref<72x128xf32, #tpu.memory_space<vmem>>, vector<8x16xf32>,
    %c1_i32_103 = arith.constant 1 : i32
    %136 = arith.addi %3, %c1_i32_103 : i32
    %c4_i32_104 = arith.constant 4 : i32
    %137 = arith.addi %136, %c4_i32_104 : i32
    %138 = arith.index_cast %137 : i32 to index
    %c0_105 = arith.constant 0 : index
    %c0_106 = arith.constant 0 : index
    %139 = vector.load %arg9[%138, %c0_105, %c0_106] : memref<18x8x18xf32, #tpu.memory_space<vmem>>, vector<1x8x18xf32>
    %140 = vector.shape_cast %139 : vector<1x8x18xf32> to vector<8x18xf32>
    %141 = vector.extract_strided_slice %140 {offsets = [0, 0], sizes = [8, 16], strides = [1, 1]} : vector<8x18xf32> to vector<8x16xf32>
    %c24_107 = arith.constant 24 : index
    %c64_108 = arith.constant 64 : index
    %142 = vector.load %arg10[%c24_107, %c64_108] : memref<72x128xf32, #tpu.memory_space<vmem>>, vector<8x16xf32>
    tpu.vector_store %arg10[%c24_107, %c64_108], %141 {strides = array<i32>} : memref<72x128xf32, #tpu.memory_space<vmem>>, vector<8x16xf32>,
    %143 = vector.extract_strided_slice %140 {offsets = [0, 1], sizes = [8, 16], strides = [1, 1]} : vector<8x18xf32> to vector<8x16xf32>
    %c32_109 = arith.constant 32 : index
    %c64_110 = arith.constant 64 : index
    %144 = vector.load %arg10[%c32_109, %c64_110] : memref<72x128xf32, #tpu.memory_space<vmem>>, vector<8x16xf32>
    tpu.vector_store %arg10[%c32_109, %c64_110], %143 {strides = array<i32>} : memref<72x128xf32, #tpu.memory_space<vmem>>, vector<8x16xf32>,
    %145 = vector.extract_strided_slice %140 {offsets = [0, 2], sizes = [8, 16], strides = [1, 1]} : vector<8x18xf32> to vector<8x16xf32>
    %c40_111 = arith.constant 40 : index
    %c64_112 = arith.constant 64 : index
    %146 = vector.load %arg10[%c40_111, %c64_112] : memref<72x128xf32, #tpu.memory_space<vmem>>, vector<8x16xf32>
    tpu.vector_store %arg10[%c40_111, %c64_112], %145 {strides = array<i32>} : memref<72x128xf32, #tpu.memory_space<vmem>>, vector<8x16xf32>,
    %c1_i32_113 = arith.constant 1 : i32
    %147 = arith.addi %3, %c1_i32_113 : i32
    %c5_i32_114 = arith.constant 5 : i32
    %148 = arith.addi %147, %c5_i32_114 : i32
    %149 = arith.index_cast %148 : i32 to index
    %c0_115 = arith.constant 0 : index
    %c0_116 = arith.constant 0 : index
    %150 = vector.load %arg9[%149, %c0_115, %c0_116] : memref<18x8x18xf32, #tpu.memory_space<vmem>>, vector<1x8x18xf32>
    %151 = vector.shape_cast %150 : vector<1x8x18xf32> to vector<8x18xf32>
    %152 = vector.extract_strided_slice %151 {offsets = [0, 0], sizes = [8, 16], strides = [1, 1]} : vector<8x18xf32> to vector<8x16xf32>
    %c24_117 = arith.constant 24 : index
    %c80_118 = arith.constant 80 : index
    %153 = vector.load %arg10[%c24_117, %c80_118] : memref<72x128xf32, #tpu.memory_space<vmem>>, vector<8x16xf32>
    tpu.vector_store %arg10[%c24_117, %c80_118], %152 {strides = array<i32>} : memref<72x128xf32, #tpu.memory_space<vmem>>, vector<8x16xf32>,
    %154 = vector.extract_strided_slice %151 {offsets = [0, 1], sizes = [8, 16], strides = [1, 1]} : vector<8x18xf32> to vector<8x16xf32>
    %c32_119 = arith.constant 32 : index
    %c80_120 = arith.constant 80 : index
    %155 = vector.load %arg10[%c32_119, %c80_120] : memref<72x128xf32, #tpu.memory_space<vmem>>, vector<8x16xf32>
    tpu.vector_store %arg10[%c32_119, %c80_120], %154 {strides = array<i32>} : memref<72x128xf32, #tpu.memory_space<vmem>>, vector<8x16xf32>,
    %156 = vector.extract_strided_slice %151 {offsets = [0, 2], sizes = [8, 16], strides = [1, 1]} : vector<8x18xf32> to vector<8x16xf32>
    %c40_121 = arith.constant 40 : index
    %c80_122 = arith.constant 80 : index
    %157 = vector.load %arg10[%c40_121, %c80_122] : memref<72x128xf32, #tpu.memory_space<vmem>>, vector<8x16xf32>
    tpu.vector_store %arg10[%c40_121, %c80_122], %156 {strides = array<i32>} : memref<72x128xf32, #tpu.memory_space<vmem>>, vector<8x16xf32>,
    %c1_i32_123 = arith.constant 1 : i32
    %158 = arith.addi %3, %c1_i32_123 : i32
    %c6_i32_124 = arith.constant 6 : i32
    %159 = arith.addi %158, %c6_i32_124 : i32
    %160 = arith.index_cast %159 : i32 to index
    %c0_125 = arith.constant 0 : index
    %c0_126 = arith.constant 0 : index
    %161 = vector.load %arg9[%160, %c0_125, %c0_126] : memref<18x8x18xf32, #tpu.memory_space<vmem>>, vector<1x8x18xf32>
    %162 = vector.shape_cast %161 : vector<1x8x18xf32> to vector<8x18xf32>
    %163 = vector.extract_strided_slice %162 {offsets = [0, 0], sizes = [8, 16], strides = [1, 1]} : vector<8x18xf32> to vector<8x16xf32>
    %c24_127 = arith.constant 24 : index
    %c96_128 = arith.constant 96 : index
    %164 = vector.load %arg10[%c24_127, %c96_128] : memref<72x128xf32, #tpu.memory_space<vmem>>, vector<8x16xf32>
    tpu.vector_store %arg10[%c24_127, %c96_128], %163 {strides = array<i32>} : memref<72x128xf32, #tpu.memory_space<vmem>>, vector<8x16xf32>,
    %165 = vector.extract_strided_slice %162 {offsets = [0, 1], sizes = [8, 16], strides = [1, 1]} : vector<8x18xf32> to vector<8x16xf32>
    %c32_129 = arith.constant 32 : index
    %c96_130 = arith.constant 96 : index
    %166 = vector.load %arg10[%c32_129, %c96_130] : memref<72x128xf32, #tpu.memory_space<vmem>>, vector<8x16xf32>
    tpu.vector_store %arg10[%c32_129, %c96_130], %165 {strides = array<i32>} : memref<72x128xf32, #tpu.memory_space<vmem>>, vector<8x16xf32>,
    %167 = vector.extract_strided_slice %162 {offsets = [0, 2], sizes = [8, 16], strides = [1, 1]} : vector<8x18xf32> to vector<8x16xf32>
    %c40_131 = arith.constant 40 : index
    %c96_132 = arith.constant 96 : index
    %168 = vector.load %arg10[%c40_131, %c96_132] : memref<72x128xf32, #tpu.memory_space<vmem>>, vector<8x16xf32>
    tpu.vector_store %arg10[%c40_131, %c96_132], %167 {strides = array<i32>} : memref<72x128xf32, #tpu.memory_space<vmem>>, vector<8x16xf32>,
    %c1_i32_133 = arith.constant 1 : i32
    %169 = arith.addi %3, %c1_i32_133 : i32
    %c7_i32_134 = arith.constant 7 : i32
    %170 = arith.addi %169, %c7_i32_134 : i32
    %171 = arith.index_cast %170 : i32 to index
    %c0_135 = arith.constant 0 : index
    %c0_136 = arith.constant 0 : index
    %172 = vector.load %arg9[%171, %c0_135, %c0_136] : memref<18x8x18xf32, #tpu.memory_space<vmem>>, vector<1x8x18xf32>
    %173 = vector.shape_cast %172 : vector<1x8x18xf32> to vector<8x18xf32>
    %174 = vector.extract_strided_slice %173 {offsets = [0, 0], sizes = [8, 16], strides = [1, 1]} : vector<8x18xf32> to vector<8x16xf32>
    %c24_137 = arith.constant 24 : index
    %c112_138 = arith.constant 112 : index
    %175 = vector.load %arg10[%c24_137, %c112_138] : memref<72x128xf32, #tpu.memory_space<vmem>>, vector<8x16xf32>
    tpu.vector_store %arg10[%c24_137, %c112_138], %174 {strides = array<i32>} : memref<72x128xf32, #tpu.memory_space<vmem>>, vector<8x16xf32>,
    %176 = vector.extract_strided_slice %173 {offsets = [0, 1], sizes = [8, 16], strides = [1, 1]} : vector<8x18xf32> to vector<8x16xf32>
    %c32_139 = arith.constant 32 : index
    %c112_140 = arith.constant 112 : index
    %177 = vector.load %arg10[%c32_139, %c112_140] : memref<72x128xf32, #tpu.memory_space<vmem>>, vector<8x16xf32>
    tpu.vector_store %arg10[%c32_139, %c112_140], %176 {strides = array<i32>} : memref<72x128xf32, #tpu.memory_space<vmem>>, vector<8x16xf32>,
    %178 = vector.extract_strided_slice %173 {offsets = [0, 2], sizes = [8, 16], strides = [1, 1]} : vector<8x18xf32> to vector<8x16xf32>
    %c40_141 = arith.constant 40 : index
    %c112_142 = arith.constant 112 : index
    %179 = vector.load %arg10[%c40_141, %c112_142] : memref<72x128xf32, #tpu.memory_space<vmem>>, vector<8x16xf32>
    tpu.vector_store %arg10[%c40_141, %c112_142], %178 {strides = array<i32>} : memref<72x128xf32, #tpu.memory_space<vmem>>, vector<8x16xf32>,
    %c2_i32_143 = arith.constant 2 : i32
    %180 = arith.addi %3, %c2_i32_143 : i32
    %c0_i32_144 = arith.constant 0 : i32
    %181 = arith.addi %180, %c0_i32_144 : i32
    %182 = arith.index_cast %181 : i32 to index
    %c0_145 = arith.constant 0 : index
    %c0_146 = arith.constant 0 : index
    %183 = vector.load %arg9[%182, %c0_145, %c0_146] : memref<18x8x18xf32, #tpu.memory_space<vmem>>, vector<1x8x18xf32>
    %184 = vector.shape_cast %183 : vector<1x8x18xf32> to vector<8x18xf32>
    %185 = vector.extract_strided_slice %184 {offsets = [0, 0], sizes = [8, 16], strides = [1, 1]} : vector<8x18xf32> to vector<8x16xf32>
    %c48_147 = arith.constant 48 : index
    %c0_148 = arith.constant 0 : index
    %186 = vector.load %arg10[%c48_147, %c0_148] : memref<72x128xf32, #tpu.memory_space<vmem>>, vector<8x16xf32>
    tpu.vector_store %arg10[%c48_147, %c0_148], %185 {strides = array<i32>} : memref<72x128xf32, #tpu.memory_space<vmem>>, vector<8x16xf32>,
    %187 = vector.extract_strided_slice %184 {offsets = [0, 1], sizes = [8, 16], strides = [1, 1]} : vector<8x18xf32> to vector<8x16xf32>
    %c56 = arith.constant 56 : index
    %c0_149 = arith.constant 0 : index
    %188 = vector.load %arg10[%c56, %c0_149] : memref<72x128xf32, #tpu.memory_space<vmem>>, vector<8x16xf32>
    tpu.vector_store %arg10[%c56, %c0_149], %187 {strides = array<i32>} : memref<72x128xf32, #tpu.memory_space<vmem>>, vector<8x16xf32>,
    %189 = vector.extract_strided_slice %184 {offsets = [0, 2], sizes = [8, 16], strides = [1, 1]} : vector<8x18xf32> to vector<8x16xf32>
    %c64_150 = arith.constant 64 : index
    %c0_151 = arith.constant 0 : index
    %190 = vector.load %arg10[%c64_150, %c0_151] : memref<72x128xf32, #tpu.memory_space<vmem>>, vector<8x16xf32>
    tpu.vector_store %arg10[%c64_150, %c0_151], %189 {strides = array<i32>} : memref<72x128xf32, #tpu.memory_space<vmem>>, vector<8x16xf32>,
    %c2_i32_152 = arith.constant 2 : i32
    %191 = arith.addi %3, %c2_i32_152 : i32
    %c1_i32_153 = arith.constant 1 : i32
    %192 = arith.addi %191, %c1_i32_153 : i32
    %193 = arith.index_cast %192 : i32 to index
    %c0_154 = arith.constant 0 : index
    %c0_155 = arith.constant 0 : index
    %194 = vector.load %arg9[%193, %c0_154, %c0_155] : memref<18x8x18xf32, #tpu.memory_space<vmem>>, vector<1x8x18xf32>
    %195 = vector.shape_cast %194 : vector<1x8x18xf32> to vector<8x18xf32>
    %196 = vector.extract_strided_slice %195 {offsets = [0, 0], sizes = [8, 16], strides = [1, 1]} : vector<8x18xf32> to vector<8x16xf32>
    %c48_156 = arith.constant 48 : index
    %c16_157 = arith.constant 16 : index
    %197 = vector.load %arg10[%c48_156, %c16_157] : memref<72x128xf32, #tpu.memory_space<vmem>>, vector<8x16xf32>
    tpu.vector_store %arg10[%c48_156, %c16_157], %196 {strides = array<i32>} : memref<72x128xf32, #tpu.memory_space<vmem>>, vector<8x16xf32>,
    %198 = vector.extract_strided_slice %195 {offsets = [0, 1], sizes = [8, 16], strides = [1, 1]} : vector<8x18xf32> to vector<8x16xf32>
    %c56_158 = arith.constant 56 : index
    %c16_159 = arith.constant 16 : index
    %199 = vector.load %arg10[%c56_158, %c16_159] : memref<72x128xf32, #tpu.memory_space<vmem>>, vector<8x16xf32>
    tpu.vector_store %arg10[%c56_158, %c16_159], %198 {strides = array<i32>} : memref<72x128xf32, #tpu.memory_space<vmem>>, vector<8x16xf32>,
    %200 = vector.extract_strided_slice %195 {offsets = [0, 2], sizes = [8, 16], strides = [1, 1]} : vector<8x18xf32> to vector<8x16xf32>
    %c64_160 = arith.constant 64 : index
    %c16_161 = arith.constant 16 : index
    %201 = vector.load %arg10[%c64_160, %c16_161] : memref<72x128xf32, #tpu.memory_space<vmem>>, vector<8x16xf32>
    tpu.vector_store %arg10[%c64_160, %c16_161], %200 {strides = array<i32>} : memref<72x128xf32, #tpu.memory_space<vmem>>, vector<8x16xf32>,
    %c2_i32_162 = arith.constant 2 : i32
    %202 = arith.addi %3, %c2_i32_162 : i32
    %c2_i32_163 = arith.constant 2 : i32
    %203 = arith.addi %202, %c2_i32_163 : i32
    %204 = arith.index_cast %203 : i32 to index
    %c0_164 = arith.constant 0 : index
    %c0_165 = arith.constant 0 : index
    %205 = vector.load %arg9[%204, %c0_164, %c0_165] : memref<18x8x18xf32, #tpu.memory_space<vmem>>, vector<1x8x18xf32>
    %206 = vector.shape_cast %205 : vector<1x8x18xf32> to vector<8x18xf32>
    %207 = vector.extract_strided_slice %206 {offsets = [0, 0], sizes = [8, 16], strides = [1, 1]} : vector<8x18xf32> to vector<8x16xf32>
    %c48_166 = arith.constant 48 : index
    %c32_167 = arith.constant 32 : index
    %208 = vector.load %arg10[%c48_166, %c32_167] : memref<72x128xf32, #tpu.memory_space<vmem>>, vector<8x16xf32>
    tpu.vector_store %arg10[%c48_166, %c32_167], %207 {strides = array<i32>} : memref<72x128xf32, #tpu.memory_space<vmem>>, vector<8x16xf32>,
    %209 = vector.extract_strided_slice %206 {offsets = [0, 1], sizes = [8, 16], strides = [1, 1]} : vector<8x18xf32> to vector<8x16xf32>
    %c56_168 = arith.constant 56 : index
    %c32_169 = arith.constant 32 : index
    %210 = vector.load %arg10[%c56_168, %c32_169] : memref<72x128xf32, #tpu.memory_space<vmem>>, vector<8x16xf32>
    tpu.vector_store %arg10[%c56_168, %c32_169], %209 {strides = array<i32>} : memref<72x128xf32, #tpu.memory_space<vmem>>, vector<8x16xf32>,
    %211 = vector.extract_strided_slice %206 {offsets = [0, 2], sizes = [8, 16], strides = [1, 1]} : vector<8x18xf32> to vector<8x16xf32>
    %c64_170 = arith.constant 64 : index
    %c32_171 = arith.constant 32 : index
    %212 = vector.load %arg10[%c64_170, %c32_171] : memref<72x128xf32, #tpu.memory_space<vmem>>, vector<8x16xf32>
    tpu.vector_store %arg10[%c64_170, %c32_171], %211 {strides = array<i32>} : memref<72x128xf32, #tpu.memory_space<vmem>>, vector<8x16xf32>,
    %c2_i32_172 = arith.constant 2 : i32
    %213 = arith.addi %3, %c2_i32_172 : i32
    %c3_i32_173 = arith.constant 3 : i32
    %214 = arith.addi %213, %c3_i32_173 : i32
    %215 = arith.index_cast %214 : i32 to index
    %c0_174 = arith.constant 0 : index
    %c0_175 = arith.constant 0 : index
    %216 = vector.load %arg9[%215, %c0_174, %c0_175] : memref<18x8x18xf32, #tpu.memory_space<vmem>>, vector<1x8x18xf32>
    %217 = vector.shape_cast %216 : vector<1x8x18xf32> to vector<8x18xf32>
    %218 = vector.extract_strided_slice %217 {offsets = [0, 0], sizes = [8, 16], strides = [1, 1]} : vector<8x18xf32> to vector<8x16xf32>
    %c48_176 = arith.constant 48 : index
    %c48_177 = arith.constant 48 : index
    %219 = vector.load %arg10[%c48_176, %c48_177] : memref<72x128xf32, #tpu.memory_space<vmem>>, vector<8x16xf32>
    tpu.vector_store %arg10[%c48_176, %c48_177], %218 {strides = array<i32>} : memref<72x128xf32, #tpu.memory_space<vmem>>, vector<8x16xf32>,
    %220 = vector.extract_strided_slice %217 {offsets = [0, 1], sizes = [8, 16], strides = [1, 1]} : vector<8x18xf32> to vector<8x16xf32>
    %c56_178 = arith.constant 56 : index
    %c48_179 = arith.constant 48 : index
    %221 = vector.load %arg10[%c56_178, %c48_179] : memref<72x128xf32, #tpu.memory_space<vmem>>, vector<8x16xf32>
    tpu.vector_store %arg10[%c56_178, %c48_179], %220 {strides = array<i32>} : memref<72x128xf32, #tpu.memory_space<vmem>>, vector<8x16xf32>,
    %222 = vector.extract_strided_slice %217 {offsets = [0, 2], sizes = [8, 16], strides = [1, 1]} : vector<8x18xf32> to vector<8x16xf32>
    %c64_180 = arith.constant 64 : index
    %c48_181 = arith.constant 48 : index
    %223 = vector.load %arg10[%c64_180, %c48_181] : memref<72x128xf32, #tpu.memory_space<vmem>>, vector<8x16xf32>
    tpu.vector_store %arg10[%c64_180, %c48_181], %222 {strides = array<i32>} : memref<72x128xf32, #tpu.memory_space<vmem>>, vector<8x16xf32>,
    %c2_i32_182 = arith.constant 2 : i32
    %224 = arith.addi %3, %c2_i32_182 : i32
    %c4_i32_183 = arith.constant 4 : i32
    %225 = arith.addi %224, %c4_i32_183 : i32
    %226 = arith.index_cast %225 : i32 to index
    %c0_184 = arith.constant 0 : index
    %c0_185 = arith.constant 0 : index
    %227 = vector.load %arg9[%226, %c0_184, %c0_185] : memref<18x8x18xf32, #tpu.memory_space<vmem>>, vector<1x8x18xf32>
    %228 = vector.shape_cast %227 : vector<1x8x18xf32> to vector<8x18xf32>
    %229 = vector.extract_strided_slice %228 {offsets = [0, 0], sizes = [8, 16], strides = [1, 1]} : vector<8x18xf32> to vector<8x16xf32>
    %c48_186 = arith.constant 48 : index
    %c64_187 = arith.constant 64 : index
    %230 = vector.load %arg10[%c48_186, %c64_187] : memref<72x128xf32, #tpu.memory_space<vmem>>, vector<8x16xf32>
    tpu.vector_store %arg10[%c48_186, %c64_187], %229 {strides = array<i32>} : memref<72x128xf32, #tpu.memory_space<vmem>>, vector<8x16xf32>,
    %231 = vector.extract_strided_slice %228 {offsets = [0, 1], sizes = [8, 16], strides = [1, 1]} : vector<8x18xf32> to vector<8x16xf32>
    %c56_188 = arith.constant 56 : index
    %c64_189 = arith.constant 64 : index
    %232 = vector.load %arg10[%c56_188, %c64_189] : memref<72x128xf32, #tpu.memory_space<vmem>>, vector<8x16xf32>
    tpu.vector_store %arg10[%c56_188, %c64_189], %231 {strides = array<i32>} : memref<72x128xf32, #tpu.memory_space<vmem>>, vector<8x16xf32>,
    %233 = vector.extract_strided_slice %228 {offsets = [0, 2], sizes = [8, 16], strides = [1, 1]} : vector<8x18xf32> to vector<8x16xf32>
    %c64_190 = arith.constant 64 : index
    %c64_191 = arith.constant 64 : index
    %234 = vector.load %arg10[%c64_190, %c64_191] : memref<72x128xf32, #tpu.memory_space<vmem>>, vector<8x16xf32>
    tpu.vector_store %arg10[%c64_190, %c64_191], %233 {strides = array<i32>} : memref<72x128xf32, #tpu.memory_space<vmem>>, vector<8x16xf32>,
    %c2_i32_192 = arith.constant 2 : i32
    %235 = arith.addi %3, %c2_i32_192 : i32
    %c5_i32_193 = arith.constant 5 : i32
    %236 = arith.addi %235, %c5_i32_193 : i32
    %237 = arith.index_cast %236 : i32 to index
    %c0_194 = arith.constant 0 : index
    %c0_195 = arith.constant 0 : index
    %238 = vector.load %arg9[%237, %c0_194, %c0_195] : memref<18x8x18xf32, #tpu.memory_space<vmem>>, vector<1x8x18xf32>
    %239 = vector.shape_cast %238 : vector<1x8x18xf32> to vector<8x18xf32>
    %240 = vector.extract_strided_slice %239 {offsets = [0, 0], sizes = [8, 16], strides = [1, 1]} : vector<8x18xf32> to vector<8x16xf32>
    %c48_196 = arith.constant 48 : index
    %c80_197 = arith.constant 80 : index
    %241 = vector.load %arg10[%c48_196, %c80_197] : memref<72x128xf32, #tpu.memory_space<vmem>>, vector<8x16xf32>
    tpu.vector_store %arg10[%c48_196, %c80_197], %240 {strides = array<i32>} : memref<72x128xf32, #tpu.memory_space<vmem>>, vector<8x16xf32>,
    %242 = vector.extract_strided_slice %239 {offsets = [0, 1], sizes = [8, 16], strides = [1, 1]} : vector<8x18xf32> to vector<8x16xf32>
    %c56_198 = arith.constant 56 : index
    %c80_199 = arith.constant 80 : index
    %243 = vector.load %arg10[%c56_198, %c80_199] : memref<72x128xf32, #tpu.memory_space<vmem>>, vector<8x16xf32>
    tpu.vector_store %arg10[%c56_198, %c80_199], %242 {strides = array<i32>} : memref<72x128xf32, #tpu.memory_space<vmem>>, vector<8x16xf32>,
    %244 = vector.extract_strided_slice %239 {offsets = [0, 2], sizes = [8, 16], strides = [1, 1]} : vector<8x18xf32> to vector<8x16xf32>
    %c64_200 = arith.constant 64 : index
    %c80_201 = arith.constant 80 : index
    %245 = vector.load %arg10[%c64_200, %c80_201] : memref<72x128xf32, #tpu.memory_space<vmem>>, vector<8x16xf32>
    tpu.vector_store %arg10[%c64_200, %c80_201], %244 {strides = array<i32>} : memref<72x128xf32, #tpu.memory_space<vmem>>, vector<8x16xf32>,
    %c2_i32_202 = arith.constant 2 : i32
    %246 = arith.addi %3, %c2_i32_202 : i32
    %c6_i32_203 = arith.constant 6 : i32
    %247 = arith.addi %246, %c6_i32_203 : i32
    %248 = arith.index_cast %247 : i32 to index
    %c0_204 = arith.constant 0 : index
    %c0_205 = arith.constant 0 : index
    %249 = vector.load %arg9[%248, %c0_204, %c0_205] : memref<18x8x18xf32, #tpu.memory_space<vmem>>, vector<1x8x18xf32>
    %250 = vector.shape_cast %249 : vector<1x8x18xf32> to vector<8x18xf32>
    %251 = vector.extract_strided_slice %250 {offsets = [0, 0], sizes = [8, 16], strides = [1, 1]} : vector<8x18xf32> to vector<8x16xf32>
    %c48_206 = arith.constant 48 : index
    %c96_207 = arith.constant 96 : index
    %252 = vector.load %arg10[%c48_206, %c96_207] : memref<72x128xf32, #tpu.memory_space<vmem>>, vector<8x16xf32>
    tpu.vector_store %arg10[%c48_206, %c96_207], %251 {strides = array<i32>} : memref<72x128xf32, #tpu.memory_space<vmem>>, vector<8x16xf32>,
    %253 = vector.extract_strided_slice %250 {offsets = [0, 1], sizes = [8, 16], strides = [1, 1]} : vector<8x18xf32> to vector<8x16xf32>
    %c56_208 = arith.constant 56 : index
    %c96_209 = arith.constant 96 : index
    %254 = vector.load %arg10[%c56_208, %c96_209] : memref<72x128xf32, #tpu.memory_space<vmem>>, vector<8x16xf32>
    tpu.vector_store %arg10[%c56_208, %c96_209], %253 {strides = array<i32>} : memref<72x128xf32, #tpu.memory_space<vmem>>, vector<8x16xf32>,
    %255 = vector.extract_strided_slice %250 {offsets = [0, 2], sizes = [8, 16], strides = [1, 1]} : vector<8x18xf32> to vector<8x16xf32>
    %c64_210 = arith.constant 64 : index
    %c96_211 = arith.constant 96 : index
    %256 = vector.load %arg10[%c64_210, %c96_211] : memref<72x128xf32, #tpu.memory_space<vmem>>, vector<8x16xf32>
    tpu.vector_store %arg10[%c64_210, %c96_211], %255 {strides = array<i32>} : memref<72x128xf32, #tpu.memory_space<vmem>>, vector<8x16xf32>,
    %c2_i32_212 = arith.constant 2 : i32
    %257 = arith.addi %3, %c2_i32_212 : i32
    %c7_i32_213 = arith.constant 7 : i32
    %258 = arith.addi %257, %c7_i32_213 : i32
    %259 = arith.index_cast %258 : i32 to index
    %c0_214 = arith.constant 0 : index
    %c0_215 = arith.constant 0 : index
    %260 = vector.load %arg9[%259, %c0_214, %c0_215] : memref<18x8x18xf32, #tpu.memory_space<vmem>>, vector<1x8x18xf32>
    %261 = vector.shape_cast %260 : vector<1x8x18xf32> to vector<8x18xf32>
    %262 = vector.extract_strided_slice %261 {offsets = [0, 0], sizes = [8, 16], strides = [1, 1]} : vector<8x18xf32> to vector<8x16xf32>
    %c48_216 = arith.constant 48 : index
    %c112_217 = arith.constant 112 : index
    %263 = vector.load %arg10[%c48_216, %c112_217] : memref<72x128xf32, #tpu.memory_space<vmem>>, vector<8x16xf32>
    tpu.vector_store %arg10[%c48_216, %c112_217], %262 {strides = array<i32>} : memref<72x128xf32, #tpu.memory_space<vmem>>, vector<8x16xf32>,
    %264 = vector.extract_strided_slice %261 {offsets = [0, 1], sizes = [8, 16], strides = [1, 1]} : vector<8x18xf32> to vector<8x16xf32>
    %c56_218 = arith.constant 56 : index
    %c112_219 = arith.constant 112 : index
    %265 = vector.load %arg10[%c56_218, %c112_219] : memref<72x128xf32, #tpu.memory_space<vmem>>, vector<8x16xf32>
    tpu.vector_store %arg10[%c56_218, %c112_219], %264 {strides = array<i32>} : memref<72x128xf32, #tpu.memory_space<vmem>>, vector<8x16xf32>,
    %266 = vector.extract_strided_slice %261 {offsets = [0, 2], sizes = [8, 16], strides = [1, 1]} : vector<8x18xf32> to vector<8x16xf32>
    %c64_220 = arith.constant 64 : index
    %c112_221 = arith.constant 112 : index
    %267 = vector.load %arg10[%c64_220, %c112_221] : memref<72x128xf32, #tpu.memory_space<vmem>>, vector<8x16xf32>
    tpu.vector_store %arg10[%c64_220, %c112_221], %266 {strides = array<i32>} : memref<72x128xf32, #tpu.memory_space<vmem>>, vector<8x16xf32>,
    %c0_222 = arith.constant 0 : index
    %c0_223 = arith.constant 0 : index
    %268 = vector.load %arg5[%c0_222, %c0_223] : memref<8x72xf32, #tpu.memory_space<vmem>>, vector<8x72xf32>
    %c0_224 = arith.constant 0 : index
    %c0_225 = arith.constant 0 : index
    %269 = vector.load %arg10[%c0_224, %c0_225] : memref<72x128xf32, #tpu.memory_space<vmem>>, vector<72x128xf32>
    %cst = arith.constant dense<0.000000e+00> : vector<8x128xf32>
    %270 = tpu.matmul %268, %269, %cst {dimension_numbers = #tpu.dot_dimension_numbers<[1], [0], [0], [1], [0, 0, 1, 1], [], []>} : vector<8x72xf32>, vector<72x128xf32>, vector<8x128xf32> -> vector<8x128xf32>
    %c0_226 = arith.constant 0 : index
    %c0_227 = arith.constant 0 : index
    %271 = vector.load %arg6[%c0_226, %c0_227] : memref<8x1xf32, #tpu.memory_space<vmem>>, vector<8x1xf32>
    %272 = vector.broadcast %271 : vector<8x1xf32> to vector<8x128xf32>
    %273 = arith.addf %270, %272 : vector<8x128xf32>
    %cst_228 = arith.constant dense<0.000000e+00> : vector<8xf32>
    %274 = vector.multi_reduction <add>, %273, %cst_228 [1] : vector<8x128xf32> to vector<8xf32>
    %275 = vector.shape_cast %274 : vector<8xf32> to vector<8x1xf32>
    %cst_229 = arith.constant 7.812500e-03 : f32
    %276 = vector.broadcast %cst_229 : f32 to vector<8x1xf32>
    %277 = arith.mulf %275, %276 : vector<8x1xf32>
    %278 = vector.broadcast %277 : vector<8x1xf32> to vector<8x128xf32>
    %279 = arith.subf %273, %278 : vector<8x128xf32>
    %280 = arith.mulf %279, %279 : vector<8x128xf32>
    %cst_230 = arith.constant dense<0.000000e+00> : vector<8xf32>
    %281 = vector.multi_reduction <add>, %280, %cst_230 [1] : vector<8x128xf32> to vector<8xf32>
    %282 = vector.shape_cast %281 : vector<8xf32> to vector<8x1xf32>
    %c0_231 = arith.constant 0 : index
    %c0_232 = arith.constant 0 : index
    %c0_233 = arith.constant 0 : index
    %283 = vector.load %arg7[%c0_231, %c0_232, %c0_233] : memref<1x8x128xf32, #tpu.memory_space<vmem>>, vector<1x8x128xf32>
    %284 = vector.shape_cast %283 : vector<1x8x128xf32> to vector<8x128xf32>
    %285 = vector.shape_cast %273 : vector<8x128xf32> to vector<1x8x128xf32>
    tpu.vector_store %arg7[%c0_231, %c0_232, %c0_233], %285 {strides = array<i32>} : memref<1x8x128xf32, #tpu.memory_space<vmem>>, vector<1x8x128xf32>,
    %c0_234 = arith.constant 0 : index
    %c0_235 = arith.constant 0 : index
    %c0_236 = arith.constant 0 : index
    %c0_237 = arith.constant 0 : index
    %286 = vector.load %arg8[%c0_234, %c0_235, %c0_236, %c0_237] : memref<1x1x8x2xf32, #tpu.memory_space<vmem>>, vector<1x1x8x1xf32>
    %287 = vector.shape_cast %286 : vector<1x1x8x1xf32> to vector<8x1xf32>
    %288 = vector.shape_cast %277 : vector<8x1xf32> to vector<1x1x8x1xf32>
    tpu.vector_store %arg8[%c0_234, %c0_235, %c0_236, %c0_237], %288 {strides = array<i32>} : memref<1x1x8x2xf32, #tpu.memory_space<vmem>>, vector<1x1x8x1xf32>,
    %c0_238 = arith.constant 0 : index
    %c0_239 = arith.constant 0 : index
    %c0_240 = arith.constant 0 : index
    %c1 = arith.constant 1 : index
    %289 = vector.load %arg8[%c0_238, %c0_239, %c0_240, %c1] : memref<1x1x8x2xf32, #tpu.memory_space<vmem>>, vector<1x1x8x1xf32>
    %290 = vector.shape_cast %289 : vector<1x1x8x1xf32> to vector<8x1xf32>
    %291 = vector.shape_cast %282 : vector<8x1xf32> to vector<1x1x8x1xf32>
    tpu.vector_store %arg8[%c0_238, %c0_239, %c0_240, %c1], %291 {strides = array<i32>} : memref<1x1x8x2xf32, #tpu.memory_space<vmem>>, vector<1x1x8x1xf32>,
    return
  }
  func.func @transform_0(%arg0: i32, %arg1: i32) -> (i32, i32, i32) {
    %c0_i32 = arith.constant 0 : i32
    %c0_i32_0 = arith.constant 0 : i32
    %c0_i32_1 = arith.constant 0 : i32
    return %arg0, %c0_i32, %c0_i32_0 : i32, i32, i32
  }
  func.func @transform_1(%arg0: i32, %arg1: i32) -> (i32, i32) {
    %c0_i32 = arith.constant 0 : i32
    %c0_i32_0 = arith.constant 0 : i32
    %c0_i32_1 = arith.constant 0 : i32
    return %c0_i32, %c0_i32_0 : i32, i32
  }
  func.func @transform_2(%arg0: i32, %arg1: i32) -> (i32, i32) {
    %c0_i32 = arith.constant 0 : i32
    %c0_i32_0 = arith.constant 0 : i32
    %c0_i32_1 = arith.constant 0 : i32
    return %c0_i32, %c0_i32_0 : i32, i32
  }
  func.func @transform_3(%arg0: i32, %arg1: i32) -> (i32, i32) {
    %c0_i32 = arith.constant 0 : i32
    %c0_i32_0 = arith.constant 0 : i32
    %c0_i32_1 = arith.constant 0 : i32
    return %c0_i32, %c0_i32_0 : i32, i32
  }
  func.func @transform_4(%arg0: i32, %arg1: i32) -> (i32, i32) {
    %c0_i32 = arith.constant 0 : i32
    %c0_i32_0 = arith.constant 0 : i32
    %c0_i32_1 = arith.constant 0 : i32
    return %c0_i32, %c0_i32_0 : i32, i32
  }
  func.func @transform_5(%arg0: i32, %arg1: i32) -> (i32, i32, i32) {
    %c0_i32 = arith.constant 0 : i32
    %c0_i32_0 = arith.constant 0 : i32
    return %arg0, %c0_i32, %arg1 : i32, i32, i32
  }
  func.func @transform_6(%arg0: i32, %arg1: i32) -> (i32, i32, i32, i32) {
    %c0_i32 = arith.constant 0 : i32
    %c0_i32_0 = arith.constant 0 : i32
    %c0_i32_1 = arith.constant 0 : i32
    return %arg0, %arg1, %c0_i32, %c0_i32_0 : i32, i32, i32, i32
  }
}

</mosaic_0001>

<bundles_post_ra>
// kernel: _lambda_.5
= control target key start
LH: loop header
LB: loop body
LE: loop exit
PB: predicated region body
PF: predicated region fallthrough
CT: control target
= control target key end

     0   :  { %s419_s12 = smov 0   ;;  %s421_s13 = smov 0   ;;  %s476_s0 = inlined_call_operand.vmem [shape: f32[2,8,256], index: 0, kind: input, shape index: {}]   ;;  %s477_s1 = inlined_call_operand.vmem [shape: f32[8,1], index: 1, kind: input, shape index: {}]   ;;  %s478_s2 = inlined_call_operand.vmem [shape: f32[8,1], index: 2, kind: input, shape index: {}]   ;;  %s479_s3 = inlined_call_operand.vmem [shape: f32[2,8,256], index: 3, kind: output, shape index: {}]  }
   0x1   :  { %s423_s14 = smov 0   ;;  %s425_s15 = smov 0  }
   0x2   :  { %s427_s16 = smov 0  }
   0x3 LB: > { %s22_s17 = sadd.s32 1, %s388_s14  ;;  %s25_s18 = sadd.s32 1, %s392_s15  ;;  %s396_s16 = sphi %s427_s16, %s13_s16   ;;  %s392_s15 = sphi %s425_s15, %s483_s15   ;;  %s388_s14 = sphi %s423_s14, %s482_s14   ;;  %s384_s13 = sphi %s421_s13, %s481_s13   ;;  %s380_s12 = sphi %s419_s12, %s480_s12  }
   0x4   : > { %p23_p0 = scmp.ge.s32.totalorder %s22_s17, 2  ;;  %p309_p1 = scmp.ge.s32.totalorder %s396_s16, 1 }
   0x5   : > { %p156_p2 = scmp.lt.s32.totalorder %s396_s16, 5 }
   0x6   : > { %s485_s17 = smov (%p23_p0, %s22_s17), 0  ;;  %s487_s18 = smov (!%p23_p0, %s25_s18), %s392_s15 }
   0x7   : > { %p157_p3 = pnand %p309_p1, %p156_p2  ;;  %p27_p4 = scmp.ge.s32.totalorder %s487_s18, 2 }
   0x8   : > { %v203_v0 = vld [vmem:[%s477_s1] sm:$0xff] (!%p157_p3)  ;;  %v398_v1 = vmov (!%p157_p3), 0   ;;  %p186_p5 = scmp.lt.s32.totalorder (!%p157_p3), %s384_s13, 1  ;;  %p188_p6 = scmp.lt.s32.totalorder (!%p157_p3), %s380_s12, 1 }
   0x9   : > { %s489_s18 = smov (%p27_p4, %s487_s18), 0  ;;  %160 = sbr.rel (%p157_p3) target bundleno = 148 (0x94), region = 32 }
   0xa   : > { %357 = vset.pattern.permute.xlu0 (!%p157_p3), %v398_v1  ;;  %v210_v2 = vld [vmem:[%s478_s2] sm:$0xff] (!%p157_p3) }
   0xb   : > { %206 = vperm.xlu0 (!%p157_p3), %357, %v203_v0  }
   0xf   : > { %213 = vperm.xlu0 (!%p157_p3), %357, %v210_v2  }
  0x10   : > { %s491_s13 = smov (!%p186_p5, %s384_s13), 1  ;;  %s493_s12 = smov (!%p188_p6, %s380_s12), 1 }
  0x11   : > { %s310_s23 = sshll.u32 %s491_s13, 1 }
  0x12   : > { %s191_s24 = sadd.s32 %s310_s23, %s493_s12 }
  0x13   : > { %s311_s25 = sshll.u32 %s191_s24, 3 }
  0x14   : > { %s193_s28 = scalar_lea.vmem %s476_s0, %s311_s25  ;;  %s201_s4 = scalar_lea.vmem %s479_s3, %s311_s25 }
  0x15   : > { %v202_v4 = vld [vmem:[%s193_s28] sm:$0xff] }
  0x8a   : > { %v207_v3 = vpop.permute.xlu0 %206 }
  0x8b   : > { %v209_v5 = vmul.f32 %v207_v3, %v202_v4 }
  0x8e   : > { %v214_v6 = vpop.permute.xlu0 %213 }
  0x8f   : > { %v216_v7 = vadd.f32 %v214_v6, %v209_v5 }
  0x91   : > { %v217_v8 = vmax.f32 %v216_v7, 0.0 }
  0x93   : > { %218 = vst [vmem:[%s201_s4] sm:$0xff] %v217_v8 }
  0x94 PF: > { %s13_s16 = sadd.s32 1, %s396_s16   ;;  %s480_s12 = smov %s388_s14 }
  0x95   : > { %p10_p7 = scmp.ge.s32.totalorder %s13_s16, 6   ;;  %s481_s13 = smov %s392_s15 }
  0x96   : > { %s482_s14 = smov %s485_s17  ;;  %s483_s15 = smov %s489_s18 }
  0x97   :  { %12 = sbr.rel (!%p10_p7) target bundleno = 3 (0x3), region = 62 }

// kernel: _lambda_.4
= control target key start
LH: loop header
LB: loop body
LE: loop exit
PB: predicated region body
PF: predicated region fallthrough
CT: control target
= control target key end

     0   :  { %s1378_s21 = smov 0   ;;  %s1380_s22 = smov 0   ;;  %s1740_s0 = inlined_call_operand.vmem [shape: f32[2,8,256], index: 0, kind: input, shape index: {}]   ;;  %s1741_s1 = inlined_call_operand.vmem [shape: f32[8,1], index: 1, kind: input, shape index: {}]   ;;  %s1742_s2 = inlined_call_operand.vmem [shape: f32[8,1], index: 2, kind: input, shape index: {}]   ;;  %s1743_s3 = inlined_call_operand.vmem [shape: f32[8,72], index: 3, kind: input, shape index: {}]   ;;  %s1744_s4 = inlined_call_operand.vmem [shape: f32[8,1], index: 4, kind: input, shape index: {}]   ;;  %s1745_s5 = inlined_call_operand.vmem [shape: f32[2,8,256], index: 5, kind: output, shape index: {0}]   ;;  %s1746_s6 = inlined_call_operand.vmem [shape: f32[2,2,8,2], index: 6, kind: output, shape index: {1}]  }
   0x1   :  { %s1382_s23 = smov 0   ;;  %s1384_s24 = smov 0  }
   0x2   :  { %s1386_s25 = smov 0  }
   0x3 LB: > { %s26_s26 = sadd.s32 1, %s1296_s23  ;;  %s29_s27 = sadd.s32 1, %s1300_s24  ;;  %s1304_s25 = sphi %s1386_s25, %s17_s25   ;;  %s1300_s24 = sphi %s1384_s24, %s1775_s24   ;;  %s1296_s23 = sphi %s1382_s23, %s1774_s23   ;;  %s1292_s22 = sphi %s1380_s22, %s1773_s22   ;;  %s1288_s21 = sphi %s1378_s21, %s1772_s21  }
   0x4   : > { %p27_p0 = scmp.ge.s32.totalorder %s26_s26, 2  ;;  %p1078_p1 = scmp.ge.s32.totalorder %s1304_s25, 1 }
   0x5   : > { %p231_p2 = scmp.lt.s32.totalorder %s1304_s25, 5 }
   0x6   : > { %s1777_s26 = smov (%p27_p0, %s26_s26), 0  ;;  %s1779_s27 = smov (!%p27_p0, %s29_s27), %s1300_s24 }
   0x7   : > { %p232_p3 = pnand %p1078_p1, %p231_p2  ;;  %p31_p4 = scmp.ge.s32.totalorder %s1779_s27, 2 }
   0x8   : > { %p272_p5 = scmp.lt.s32.totalorder (!%p232_p3), %s1292_s22, 1  ;;  %p279_p6 = scmp.lt.s32.totalorder (!%p232_p3), %s1288_s21, 1 }
   0x9   : > { %s1781_s27 = smov (%p31_p4, %s1779_s27), 0  ;;  %235 = sbr.rel (%p232_p3) target bundleno = 1076 (0x434), region = 40 }
   0xa   : > { %p1085_p7 = scmp.ne.s32.totalorder (!%p232_p3), %s1288_s21, 0 }
  0x10   : > { %s1783_s22 = smov (!%p272_p5, %s1292_s22), 1  ;;  %296 = sbr.rel (%p1085_p7) target bundleno = 304 (0x130), region = 44 }
  0x11   : > { %s280_s28 = scalar_select %p279_p6, %s1288_s21, 1 }
  0x12   : > { %s1132_s29 = sshll.u32 %s1783_s22, 4  ;;  %s1081_s30 = sshll.u32 %s1783_s22, 1  ;;  %v341_v0 = vld [vmem:[%s1741_s1] sm:$0xff] (!%p1085_p7)  ;;  %v1306_v1 = vmov (!%p1085_p7), 0   ;;  %vm301_vm0 = vcmask (!%p1085_p7), 7168   ;;  %v1307_v3 = vmov (!%p1085_p7), 0.0  }
  0x13   : > { %s1415_s9 = scalar_lea.vmem %s1740_s0, %s1132_s29  ;;  %s282_s10 = sadd.s32 %s1081_s30, %s280_s28  ;;  %1263 = vset.pattern.permute.xlu0 (!%p1085_p7), %v1306_v1  ;;  %v349_v2 = vld [vmem:[%s1742_s2] sm:$0xff] (!%p1085_p7)  ;;  %305 = vst.msk [vmem:[#allocation2 + $0x18] sm:$0xff] (!%p1085_p7), %vm301_vm0, %v1307_v3  ;;  %vm320_vm1 = vcmask (!%p1085_p7), 146568   ;;  %303 = vst.msk [vmem:[#allocation2 + $0x8] sm:$0xff] (!%p1085_p7), %vm301_vm0, %v1307_v3  ;;  %vm297_vm2 = vcmask (!%p1085_p7), 146432   ;;  %vm364_vm3 = vcmask (!%p1085_p7), 138248  }
  0x14   : > { %s1082_s11 = sshll.u32 %s282_s10, 3  ;;  %344 = vperm.xlu0 (!%p1085_p7), %1263, %v341_v0   ;;  %304 = vst.msk [vmem:[#allocation2 + $0x10] sm:$0xff] (!%p1085_p7), %vm301_vm0, %v1307_v3  ;;  %306 = vst.msk [vmem:[#allocation2 + $0x20] sm:$0xff] (!%p1085_p7), %vm301_vm0, %v1307_v3  ;;  %v339_v5 = vld [vmem:[%s1415_s9] sm:$0xff] (!%p1085_p7)  ;;  %s1308_s28 = smov (!%p1085_p7), 97   ;;  %v340_v10 = vld [vmem:[%s1415_s9 + $0x8] sm:$0xff] (!%p1085_p7) }
  0x15   : > { %s1420_s14 = scalar_lea.vmem %s1745_s5, %s1082_s11  ;;  %s1425_s17 = scalar_lea.vmem %s1746_s6, %s1082_s11  ;;  %307 = vst.msk [vmem:[#allocation2 + $0x28] sm:$0xff] (!%p1085_p7), %vm301_vm0, %v1307_v3  ;;  %308 = vst.msk [vmem:[#allocation2 + $0x30] sm:$0xff] (!%p1085_p7), %vm301_vm0, %v1307_v3 }
  0x16   : > { %309 = vst.msk [vmem:[#allocation2 + $0x38] sm:$0xff] (!%p1085_p7), %vm301_vm0, %v1307_v3  ;;  %310 = vst.msk [vmem:[#allocation2 + $0x40] sm:$0xff] (!%p1085_p7), %vm301_vm0, %v1307_v3  ;;  %s1309_s29 = smov (!%p1085_p7), 1   ;;  %s1310_s30 = smov (!%p1085_p7), 65  }
  0x17   : > { %311 = vst.msk [vmem:[#allocation2 + $0x48] sm:$0xff] %vm301_vm0, %v1307_v3  ;;  %312 = vst.msk [vmem:[#allocation2 + $0x50] sm:$0xff] %vm301_vm0, %v1307_v3  ;;  %s1311_s7 = smov 113   ;;  %s1312_s8 = smov 33  }
  0x18   : > { %352 = vperm.xlu0 %1263, %v349_v2   ;;  %313 = vst.msk [vmem:[#allocation2 + $0x58] sm:$0xff] %vm301_vm0, %v1307_v3  ;;  %314 = vst.msk [vmem:[#allocation2 + $0x60] sm:$0xff] %vm301_vm0, %v1307_v3  ;;  %s1313_s10 = smov 81   ;;  %s1314_s11 = smov 49  }
  0x19   : > { %315 = vst.msk [vmem:[#allocation2 + $0x68] sm:$0xff] %vm301_vm0, %v1307_v3  ;;  %316 = vst.msk [vmem:[#allocation2 + $0x70] sm:$0xff] %vm301_vm0, %v1307_v3  ;;  %s1315_s12 = smov 17  }
  0x1a   : > { %317 = vst.msk [vmem:[#allocation2 + $0x78] sm:$0xff] %vm301_vm0, %v1307_v3  ;;  %318 = vst.msk [vmem:[#allocation2 + $0x80] sm:$0xff] %vm301_vm0, %v1307_v3 }
  0x1b   : > { %324 = vst.msk [vmem:[#allocation2 + $0x18] sm:$0xff] %vm320_vm1, %v1307_v3  ;;  %322 = vst.msk [vmem:[#allocation2 + $0x8] sm:$0xff] %vm320_vm1, %v1307_v3 }
  0x1c   : > { %323 = vst.msk [vmem:[#allocation2 + $0x10] sm:$0xff] %vm320_vm1, %v1307_v3  ;;  %325 = vst.msk [vmem:[#allocation2 + $0x20] sm:$0xff] %vm320_vm1, %v1307_v3 }
  0x1d   : > { %326 = vst.msk [vmem:[#allocation2 + $0x28] sm:$0xff] %vm320_vm1, %v1307_v3  ;;  %327 = vst.msk [vmem:[#allocation2 + $0x30] sm:$0xff] %vm320_vm1, %v1307_v3 }
  0x1e   : > { %328 = vst.msk [vmem:[#allocation2 + $0x38] sm:$0xff] %vm320_vm1, %v1307_v3  ;;  %329 = vst.msk [vmem:[#allocation2 + $0x40] sm:$0xff] %vm320_vm1, %v1307_v3 }
  0x1f   : > { %330 = vst.msk [vmem:[#allocation2 + $0x48] sm:$0xff] %vm320_vm1, %v1307_v3  ;;  %331 = vst.msk [vmem:[#allocation2 + $0x50] sm:$0xff] %vm320_vm1, %v1307_v3 }
  0x20   : > { %332 = vst.msk [vmem:[#allocation2 + $0x58] sm:$0xff] %vm320_vm1, %v1307_v3  ;;  %333 = vst.msk [vmem:[#allocation2 + $0x60] sm:$0xff] %vm320_vm1, %v1307_v3 }
  0x21   : > { %334 = vst.msk [vmem:[#allocation2 + $0x68] sm:$0xff] %vm320_vm1, %v1307_v3  ;;  %335 = vst.msk [vmem:[#allocation2 + $0x70] sm:$0xff] %vm320_vm1, %v1307_v3 }
  0x22   : > { %336 = vst.msk [vmem:[#allocation2 + $0x78] sm:$0xff] %vm320_vm1, %v1307_v3  ;;  %337 = vst.msk [vmem:[#allocation2 + $0x80] sm:$0xff] %vm320_vm1, %v1307_v3 }
  0x23   : > { %298 = vst.msk [vmem:[#allocation2] sm:$0xff] %vm297_vm2, %v1307_v3  ;;  %300 = vst.msk [vmem:[#allocation2 + $0x88] sm:$0xff] %vm297_vm2, %v1307_v3 }
  0x24   : > { %302 = vst.msk [vmem:[#allocation2] sm:$0xff] %vm301_vm0, %v1307_v3  ;;  %319 = vst.msk [vmem:[#allocation2 + $0x88] sm:$0xff] %vm301_vm0, %v1307_v3 }
  0x25   : > { %321 = vst.msk [vmem:[#allocation2] sm:$0xff] %vm320_vm1, %v1307_v3  ;;  %338 = vst.msk [vmem:[#allocation2 + $0x88] sm:$0xff] %vm320_vm1, %v1307_v3 }
  0x93   : > { %v345_v4 = vpop.permute.xlu0 %344 }
  0x94   : > { %v347_v6 = vmul.f32 %v345_v4, %v339_v5  ;;  %v348_v11 = vmul.f32 %v345_v4, %v340_v10 }
  0x97   : > { %v353_v7 = vpop.permute.xlu0 %352 }
  0x98   : > { %v355_v8 = vadd.f32 %v353_v7, %v347_v6  ;;  %v356_v12 = vadd.f32 %v353_v7, %v348_v11 }
  0x9a   : > { %v357_v9 = vmax.f32 %v355_v8, 0.0  ;;  %v358_v13 = vmax.f32 %v356_v12, 0.0 }
  0x9c   : > { %371 = vrot.lane.b32.xlu0 %v357_v9, %s1308_s28  ;;  %360 = vrot.lane.b32.xlu1 %v357_v9, %s1309_s29 }
  0xa0   : > { %381 = vrot.lane.b32.xlu0 %v357_v9, %s1310_s30  ;;  %366 = vrot.lane.b32.xlu1 %v357_v9, %s1311_s7 }
  0xa4   : > { %391 = vrot.lane.b32.xlu0 %v357_v9, %s1312_s8  ;;  %376 = vrot.lane.b32.xlu1 %v357_v9, %s1313_s10 }
  0xa8   : > { %402 = vrot.lane.b32.xlu0 %v358_v13, %s1309_s29  ;;  %386 = vrot.lane.b32.xlu1 %v357_v9, %s1314_s11 }
  0xac   : > { %412 = vrot.lane.b32.xlu0 %v358_v13, %s1308_s28  ;;  %396 = vrot.lane.b32.xlu1 %v357_v9, %s1315_s12 }
  0xb0   : > { %422 = vrot.lane.b32.xlu0 %v358_v13, %s1310_s30  ;;  %407 = vrot.lane.b32.xlu1 %v358_v13, %s1311_s7 }
  0xb4   : > { %432 = vrot.lane.b32.xlu0 %v358_v13, %s1312_s8  ;;  %417 = vrot.lane.b32.xlu1 %v358_v13, %s1313_s10 }
  0xb8   : > { %427 = vrot.lane.b32.xlu1 %v358_v13, %s1314_s11 }
  0xbc   : > { %437 = vrot.lane.b32.xlu1 %v358_v13, %s1315_s12 }
 0x10e   : > { %v372_v14 = vpop.permute.xlu0 %371  ;;  %v361_v15 = vpop.permute.xlu1 %360 }
 0x10f   : > { %375 = vst.msk [vmem:[#allocation2 + $0x18] sm:$0xff] %vm364_vm3, %v372_v14  ;;  %365 = vst.msk [vmem:[#allocation2 + $0x8] sm:$0xff] %vm364_vm3, %v361_v15 }
 0x112   : > { %v382_v16 = vpop.permute.xlu0 %381  ;;  %v367_v17 = vpop.permute.xlu1 %366 }
 0x113   : > { %385 = vst.msk [vmem:[#allocation2 + $0x28] sm:$0xff] %vm364_vm3, %v382_v16  ;;  %370 = vst.msk [vmem:[#allocation2 + $0x10] sm:$0xff] %vm364_vm3, %v367_v17 }
 0x116   : > { %v392_v18 = vpop.permute.xlu0 %391  ;;  %v377_v19 = vpop.permute.xlu1 %376 }
 0x117   : > { %395 = vst.msk [vmem:[#allocation2 + $0x38] sm:$0xff] %vm364_vm3, %v392_v18  ;;  %380 = vst.msk [vmem:[#allocation2 + $0x20] sm:$0xff] %vm364_vm3, %v377_v19 }
 0x11a   : > { %v403_v20 = vpop.permute.xlu0 %402  ;;  %v387_v21 = vpop.permute.xlu1 %386 }
 0x11b   : > { %406 = vst.msk [vmem:[#allocation2 + $0x48] sm:$0xff] %vm364_vm3, %v403_v20  ;;  %390 = vst.msk [vmem:[#allocation2 + $0x30] sm:$0xff] %vm364_vm3, %v387_v21 }
 0x11e   : > { %v413_v22 = vpop.permute.xlu0 %412  ;;  %v397_v23 = vpop.permute.xlu1 %396 }
 0x11f   : > { %416 = vst.msk [vmem:[#allocation2 + $0x58] sm:$0xff] %vm364_vm3, %v413_v22  ;;  %400 = vst.msk [vmem:[#allocation2 + $0x40] sm:$0xff] %vm364_vm3, %v397_v23 }
 0x122   : > { %v423_v24 = vpop.permute.xlu0 %422  ;;  %v408_v25 = vpop.permute.xlu1 %407 }
 0x123   : > { %426 = vst.msk [vmem:[#allocation2 + $0x68] sm:$0xff] %vm364_vm3, %v423_v24  ;;  %411 = vst.msk [vmem:[#allocation2 + $0x50] sm:$0xff] %vm364_vm3, %v408_v25 }
 0x126   : > { %v433_v26 = vpop.permute.xlu0 %432  ;;  %v418_v27 = vpop.permute.xlu1 %417 }
 0x127   : > { %436 = vst.msk [vmem:[#allocation2 + $0x78] sm:$0xff] %vm364_vm3, %v433_v26  ;;  %421 = vst.msk [vmem:[#allocation2 + $0x60] sm:$0xff] %vm364_vm3, %v418_v27 }
 0x12a   : > { %v428_v28 = vpop.permute.xlu1 %427 }
 0x12b   : > { %431 = vst.msk [vmem:[#allocation2 + $0x70] sm:$0xff] %vm364_vm3, %v428_v28 }
 0x12e   : > { %v438_v29 = vpop.permute.xlu1 %437 }
 0x12f   : > { %441 = vst.msk [vmem:[#allocation2 + $0x80] sm:$0xff] %vm364_vm3, %v438_v29 }
 0x130 PF: > { %s1133_s9 = sshll.u32 %s1288_s21, 6  ;;  %vm446_vm4 = vcmask 130048   ;;  %s1316_s15 = smov 15   ;;  %v1334_v38 = vmov 0.0|0.0   ;;  %vm465_vm5 = vcmask 261248   ;;  %vm483_vm6 = vcmask 392448  }
 0x131   : > { %s1491_s13 = scalar_lea.vmem [#allocation2], %s1133_s9  ;;  %s1317_s16 = smov 127   ;;  %1174 = vmatprep.subr.bf16.mxu0 %v1334_v38  ;;  %vm501_vm7 = vcmask 523648   ;;  %vm519_vm8 = vcmask 654848   ;;  %vm1340_vm9 = vmmov 0   ;;  %v1341_v51 = vmov 0.0  }
 0x132   : > { %s1750_s21 = smov 32   ;;  %s1747_s18 = smov 16   ;;  %1171 = vmatprep.mubr.msk.f32.mxu0 %vm1340_vm9, %v1341_v51  ;;  %vm537_vm10 = vcmask 786048   ;;  %v1342_v52 = vmov 0   ;;  %v817_v53 = vld [vmem:[%s1744_s4] sm:$0xff]  ;;  %vm555_vm11 = vcmask 917248  }
 0x133   : > { %s1753_s19 = smov 48   ;;  %s1321_s20 = smov 31   ;;  %1264 = vset.pattern.permute.xlu1 %v1342_v52  ;;  %1265 = vset.pattern.permute.xlu0 %v1342_v52  ;;  %vm573_vm12 = vcmask 1048448   ;;  %vm823_vm13 = vcmask 588800   ;;  %vm905_vm14 = vcmask 7168   ;;  %vm907_vm15 = vcmask 15368  }
 0x134   : > { %s1756_s22 = smov 126   ;;  %s1323_s28 = smov 47  }
 0x135   : > { %s1324_s29 = smov 63   ;;  %s1325_s30 = smov 64  }
 0x136   : > { %v1090_v30 = vld [vmem:[%s1491_s13 + $0x8] sm:$0xff]  ;;  %v445_v31 = vld [vmem:[%s1491_s13] sm:$0xff]  ;;  %v1496_v32 = vld [vmem:[%s1491_s13 + $0x10] sm:$0xff]  ;;  %s1326_s7 = smov 80   ;;  %s1758_s8 = smov 14  }
 0x137   : > { %467 = vrot.lane.b32.xlu1 %v1090_v30, %s1316_s15  ;;  %449 = vrot.lane.b32.xlu0 %v445_v31, %s1317_s16  ;;  %447 = vst.msk [vmem:[#allocation3] sm:$0xff] %vm446_vm4, %v445_v31  ;;  %584 = vst.msk [vmem:[#allocation3 + $0x18] sm:$0xff] %vm446_vm4, %v1090_v30  ;;  %v1508_v33 = vld [vmem:[%s1491_s13 + $0x18] sm:$0xff]  ;;  %v1518_v34 = vld [vmem:[%s1491_s13 + $0x20] sm:$0xff]  ;;  %s1748_s10 = smov 79   ;;  %s1329_s11 = smov 96  }
 0x138   : > { %696 = vst.msk [vmem:[#allocation3 + $0x30] sm:$0xff] %vm446_vm4, %v1496_v32  ;;  %v1525_v35 = vld [vmem:[%s1491_s13 + $0x28] sm:$0xff]  ;;  %v1535_v36 = vld [vmem:[%s1491_s13 + $0x30] sm:$0xff]  ;;  %s1757_s12 = smov 30   ;;  %s1751_s9 = smov 95   ;;  %v1546_v37 = vld [vmem:[%s1491_s13 + $0x38] sm:$0xff] }
 0x139   : > { %v1118_v39 = vld [vmem:[%s1491_s13 + $0x40] sm:$0xff]  ;;  %v1128_v42 = vld [vmem:[%s1491_s13 + $0x48] sm:$0xff]  ;;  %s1769_s13 = smov 30  }
 0x13b   : > { %480 = vrot.lane.b32.xlu1 %v1496_v32, %s1750_s21  ;;  %462 = vrot.lane.b32.xlu0 %v1090_v30, %s1747_s18 }
 0x13f   : > { %498 = vrot.lane.b32.xlu1 %v1508_v33, %s1753_s19  ;;  %485 = vrot.lane.b32.xlu0 %v1496_v32, %s1321_s20 }
 0x143   : > { %453 = vrot.lane.b32.xlu1 %v445_v31, %s1756_s22  ;;  %503 = vrot.lane.b32.xlu0 %v1508_v33, %s1323_s28 }
 0x147   : > { %521 = vrot.lane.b32.xlu1 %v1518_v34, %s1324_s29  ;;  %516 = vrot.lane.b32.xlu0 %v1518_v34, %s1325_s30 }
 0x14b   : > { %534 = vrot.lane.b32.xlu1 %v1525_v35, %s1326_s7  ;;  %471 = vrot.lane.b32.xlu0 %v1090_v30, %s1758_s8 }
 0x14f   : > { %596 = vrot.lane.b32.xlu1 %v1496_v32, %s1747_s18  ;;  %539 = vrot.lane.b32.xlu0 %v1525_v35, %s1748_s10  ;;  %s1332_s18 = smov 112   ;;  %s1759_s10 = smov 46  }
 0x153   : > { %552 = vrot.lane.b32.xlu1 %v1535_v36, %s1329_s11  ;;  %489 = vrot.lane.b32.xlu0 %v1496_v32, %s1757_s12 }
 0x157   : > { %610 = vrot.lane.b32.xlu1 %v1508_v33, %s1750_s21  ;;  %557 = vrot.lane.b32.xlu0 %v1535_v36, %s1751_s9  ;;  %s1754_s21 = smov 111   ;;  %s1760_s9 = smov 62  }
 0x15b   : > { %570 = vrot.lane.b32.xlu1 %v1546_v37, %s1332_s18  ;;  %507 = vrot.lane.b32.xlu0 %v1508_v33, %s1759_s10 }
 0x15f   : > { %624 = vrot.lane.b32.xlu1 %v1518_v34, %s1753_s19  ;;  %575 = vrot.lane.b32.xlu0 %v1546_v37, %s1754_s21  ;;  %s1337_s19 = smov 78   ;;  %s1338_s21 = smov 94  }
 0x163   : > { %586 = vrot.lane.b32.xlu1 %v1090_v30, %s1317_s16  ;;  %525 = vrot.lane.b32.xlu0 %v1518_v34, %s1760_s9 }
 0x167   : > { %638 = vrot.lane.b32.xlu1 %v1525_v35, %s1325_s30  ;;  %590 = vrot.lane.b32.xlu0 %v1090_v30, %s1756_s22  ;;  %s1339_s22 = smov 110  }
 0x16b   : > { %600 = vrot.lane.b32.xlu1 %v1496_v32, %s1316_s15  ;;  %543 = vrot.lane.b32.xlu0 %v1525_v35, %s1337_s19 }
 0x16f   : > { %652 = vrot.lane.b32.xlu1 %v1535_v36, %s1326_s7  ;;  %604 = vrot.lane.b32.xlu0 %v1496_v32, %s1758_s8  ;;  %s1762_s8 = smov 16  }
 0x173   : > { %614 = vrot.lane.b32.xlu1 %v1508_v33, %s1321_s20  ;;  %561 = vrot.lane.b32.xlu0 %v1535_v36, %s1338_s21 }
 0x177   : > { %666 = vrot.lane.b32.xlu1 %v1546_v37, %s1329_s11  ;;  %618 = vrot.lane.b32.xlu0 %v1508_v33, %s1757_s12  ;;  %s1761_s12 = smov 79  }
 0x17b   : > { %628 = vrot.lane.b32.xlu1 %v1518_v34, %s1323_s28  ;;  %579 = vrot.lane.b32.xlu0 %v1546_v37, %s1339_s22 }
 0x17f   : > { %683 = vrot.lane.b32.xlu1 %v1118_v39, %s1332_s18  ;;  %632 = vrot.lane.b32.xlu0 %v1518_v34, %s1759_s10  ;;  %s1763_s10 = smov 95  }
 0x183   : > { %642 = vrot.lane.b32.xlu0 %v1525_v35, %s1324_s29  ;;  %646 = vrot.lane.b32.xlu1 %v1525_v35, %s1760_s9  ;;  %s1764_s9 = smov 32  }
 0x187   : > { %698 = vrot.lane.b32.xlu0 %v1496_v32, %s1317_s16  ;;  %656 = vrot.lane.b32.xlu1 %v1535_v36, %s1761_s12  ;;  %s1765_s16 = smov 111  }
 0x18b   : > { %660 = vrot.lane.b32.xlu0 %v1535_v36, %s1337_s19  ;;  %708 = vrot.lane.b32.xlu1 %v1508_v33, %s1762_s8  ;;  %s1766_s8 = smov 48  }
 0x18f   : > { %712 = vrot.lane.b32.xlu0 %v1508_v33, %s1316_s15  ;;  %670 = vrot.lane.b32.xlu1 %v1546_v37, %s1763_s10  ;;  %s1767_s15 = smov 126  }
 0x193   : > { %674 = vrot.lane.b32.xlu0 %v1546_v37, %s1338_s21  ;;  %722 = vrot.lane.b32.xlu1 %v1518_v34, %s1764_s9 }
 0x197   : > { %726 = vrot.lane.b32.xlu0 %v1518_v34, %s1321_s20  ;;  %687 = vrot.lane.b32.xlu1 %v1118_v39, %s1765_s16  ;;  %s1768_s20 = smov 14  }
 0x19b   : > { %691 = vrot.lane.b32.xlu0 %v1118_v39, %s1339_s22  ;;  %736 = vrot.lane.b32.xlu1 %v1525_v35, %s1766_s8 }
 0x19f   : > { %740 = vrot.lane.b32.xlu0 %v1525_v35, %s1323_s28  ;;  %750 = vrot.lane.b32.xlu1 %v1535_v36, %s1325_s30  ;;  %s1770_s28 = smov 46  }
 0x1a3   : > { %754 = vrot.lane.b32.xlu0 %v1535_v36, %s1324_s29  ;;  %764 = vrot.lane.b32.xlu1 %v1546_v37, %s1326_s7 }
 0x1a7   : > { %768 = vrot.lane.b32.xlu0 %v1546_v37, %s1761_s12  ;;  %702 = vrot.lane.b32.xlu1 %v1496_v32, %s1767_s15 }
 0x1a9   : > { %v468_v40 = vpop.permute.xlu1 %467  ;;  %v450_v41 = vpop.permute.xlu0 %449 }
 0x1aa   : > { %452 = vst.msk [vmem:[#allocation3 + $0x8] sm:$0xff] %vm446_vm4, %v450_v41 }
 0x1ab   : > { %470 = vst.msk [vmem:[#allocation3 + $0x8] sm:$0xff] %vm465_vm5, %v468_v40  ;;  %778 = vrot.lane.b32.xlu0 %v1118_v39, %s1329_s11  ;;  %782 = vrot.lane.b32.xlu1 %v1118_v39, %s1763_s10 }
 0x1ad   : > { %v481_v43 = vpop.permute.xlu1 %480  ;;  %v463_v44 = vpop.permute.xlu0 %462 }
 0x1ae   : > { %466 = vst.msk [vmem:[#allocation3] sm:$0xff] %vm465_vm5, %v463_v44 }
 0x1af   : > { %716 = vrot.lane.b32.xlu0 %v1508_v33, %s1768_s20  ;;  %484 = vst.msk [vmem:[#allocation3] sm:$0xff] %vm483_vm6, %v481_v43  ;;  %795 = vrot.lane.b32.xlu1 %v1128_v42, %s1332_s18  ;;  %s1771_s18 = smov 62  }
 0x1b1   : > { %v499_v45 = vpop.permute.xlu1 %498  ;;  %v486_v46 = vpop.permute.xlu0 %485 }
 0x1b2   : > { %502 = vst.msk [vmem:[#allocation3] sm:$0xff] %vm501_vm7, %v499_v45 }
 0x1b3   : > { %488 = vst.msk [vmem:[#allocation3 + $0x8] sm:$0xff] %vm483_vm6, %v486_v46  ;;  %799 = vrot.lane.b32.xlu0 %v1128_v42, %s1765_s16  ;;  %730 = vrot.lane.b32.xlu1 %v1518_v34, %s1769_s13 }
 0x1b5   : > { %v454_v47 = vpop.permute.xlu1 %453  ;;  %v504_v48 = vpop.permute.xlu0 %503 }
 0x1b6   : > { %456 = vst.msk [vmem:[#allocation3 + $0x10] sm:$0xff] %vm446_vm4, %v454_v47 }
 0x1b7   : > { %506 = vst.msk [vmem:[#allocation3 + $0x8] sm:$0xff] %vm501_vm7, %v504_v48  ;;  %744 = vrot.lane.b32.xlu0 %v1525_v35, %s1770_s28  ;;  %758 = vrot.lane.b32.xlu1 %v1535_v36, %s1771_s18 }
 0x1b9   : > { %v522_v49 = vpop.permute.xlu1 %521  ;;  %v517_v50 = vpop.permute.xlu0 %516 }
 0x1ba   : > { %524 = vst.msk [vmem:[#allocation3 + $0x8] sm:$0xff] %vm519_vm8, %v522_v49  ;;  %520 = vst.msk [vmem:[#allocation3] sm:$0xff] %vm519_vm8, %v517_v50 }
 0x1bb   : > { %772 = vrot.lane.b32.xlu0 %v1546_v37, %s1337_s19  ;;  %786 = vrot.lane.b32.xlu1 %v1118_v39, %s1338_s21 }
 0x1bd   : > { %v535_v54 = vpop.permute.xlu1 %534  ;;  %v472_v55 = vpop.permute.xlu0 %471 }
 0x1be   : > { %538 = vst.msk [vmem:[#allocation3] sm:$0xff] %vm537_vm10, %v535_v54 }
 0x1bf   : > { %474 = vst.msk [vmem:[#allocation3 + $0x10] sm:$0xff] %vm465_vm5, %v472_v55  ;;  %803 = vrot.lane.b32.xlu0 %v1128_v42, %s1339_s22  ;;  %820 = vperm.xlu1 %1264, %v817_v53  }
 0x1c1   : > { %v597_v56 = vpop.permute.xlu1 %596  ;;  %v540_v57 = vpop.permute.xlu0 %539 }
 0x1c2   : > { %599 = vst.msk [vmem:[#allocation3 + $0x18] sm:$0xff] %vm465_vm5, %v597_v56 }
 0x1c3   : > { %542 = vst.msk [vmem:[#allocation3 + $0x8] sm:$0xff] %vm537_vm10, %v540_v57 }
 0x1c5   : > { %v553_v58 = vpop.permute.xlu1 %552  ;;  %v490_v59 = vpop.permute.xlu0 %489 }
 0x1c6   : > { %556 = vst.msk [vmem:[#allocation3] sm:$0xff] %vm555_vm11, %v553_v58 }
 0x1c7   : > { %492 = vst.msk [vmem:[#allocation3 + $0x10] sm:$0xff] %vm483_vm6, %v490_v59 }
 0x1c9   : > { %v611_v60 = vpop.permute.xlu1 %610  ;;  %v558_v61 = vpop.permute.xlu0 %557 }
 0x1ca   : > { %613 = vst.msk [vmem:[#allocation3 + $0x18] sm:$0xff] %vm483_vm6, %v611_v60 }
 0x1cb   : > { %560 = vst.msk [vmem:[#allocation3 + $0x8] sm:$0xff] %vm555_vm11, %v558_v61 }
 0x1cd   : > { %v571_v62 = vpop.permute.xlu1 %570  ;;  %v508_v63 = vpop.permute.xlu0 %507 }
 0x1ce   : > { %574 = vst.msk [vmem:[#allocation3] sm:$0xff] %vm573_vm12, %v571_v62  ;;  %v807_v62 = vld [vmem:[%s1743_s3] sm:$0xff] }
 0x1cf   : > { %510 = vst.msk [vmem:[#allocation3 + $0x10] sm:$0xff] %vm501_vm7, %v508_v63 }
 0x1d1   : > { %v625_v0 = vpop.permute.xlu1 %624  ;;  %v576_v1 = vpop.permute.xlu0 %575 }
 0x1d2   : > { %627 = vst.msk [vmem:[#allocation3 + $0x18] sm:$0xff] %vm501_vm7, %v625_v0 }
 0x1d3   : > { %578 = vst.msk [vmem:[#allocation3 + $0x8] sm:$0xff] %vm573_vm12, %v576_v1 }
 0x1d5   : > { %v587_v2 = vpop.permute.xlu1 %586  ;;  %v526_v3 = vpop.permute.xlu0 %525  ;;  %v808_v4 = vld [vmem:[#allocation3] sm:$0xff] }
 0x1d6   : > { %589 = vst.msk [vmem:[#allocation3 + $0x20] sm:$0xff] %vm446_vm4, %v587_v2 }
 0x1d7   : > { %528 = vst.msk [vmem:[#allocation3 + $0x10] sm:$0xff] %vm519_vm8, %v526_v3 }
 0x1d9   : > { %v639_v5 = vpop.permute.xlu1 %638  ;;  %v591_v6 = vpop.permute.xlu0 %590 }
 0x1da   : > { %v809_v7 = vld [vmem:[#allocation3 + $0x8] sm:$0xff]  ;;  %641 = vst.msk [vmem:[#allocation3 + $0x18] sm:$0xff] %vm519_vm8, %v639_v5 }
 0x1db   : > { %593 = vst.msk [vmem:[#allocation3 + $0x28] sm:$0xff] %vm446_vm4, %v591_v6  ;;  %v1175_v8 = vpack.c.bf16 %v809_v7, %v808_v4 }
 0x1dd   : > { %1176 = vmatpush3.bf16.msra.mxu0 %v1175_v8  ;;  %v601_v9 = vpop.permute.xlu1 %600  ;;  %v544_v10 = vpop.permute.xlu0 %543 }
 0x1de   : > { %1177 = vmatprep.subr.bf16.mxu0 %v1334_v38  ;;  %603 = vst.msk [vmem:[#allocation3 + $0x20] sm:$0xff] %vm465_vm5, %v601_v9 }
 0x1df   : > { %546 = vst.msk [vmem:[#allocation3 + $0x10] sm:$0xff] %vm537_vm10, %v544_v10 }
 0x1e1   : > { %v653_v11 = vpop.permute.xlu1 %652  ;;  %v605_v12 = vpop.permute.xlu0 %604 }
 0x1e2   : > { %655 = vst.msk [vmem:[#allocation3 + $0x18] sm:$0xff] %vm537_vm10, %v653_v11 }
 0x1e3   : > { %607 = vst.msk [vmem:[#allocation3 + $0x28] sm:$0xff] %vm465_vm5, %v605_v12 }
 0x1e5   : > { %v615_v13 = vpop.permute.xlu1 %614  ;;  %v562_v14 = vpop.permute.xlu0 %561 }
 0x1e6   : > { %617 = vst.msk [vmem:[#allocation3 + $0x20] sm:$0xff] %vm483_vm6, %v615_v13 }
 0x1e7   : > { %564 = vst.msk [vmem:[#allocation3 + $0x10] sm:$0xff] %vm555_vm11, %v562_v14 }
 0x1e9   : > { %v667_v15 = vpop.permute.xlu1 %666  ;;  %v619_v16 = vpop.permute.xlu0 %618 }
 0x1ea   : > { %669 = vst.msk [vmem:[#allocation3 + $0x18] sm:$0xff] %vm555_vm11, %v667_v15 }
 0x1eb   : > { %621 = vst.msk [vmem:[#allocation3 + $0x28] sm:$0xff] %vm483_vm6, %v619_v16 }
 0x1ed   : > { %v629_v17 = vpop.permute.xlu1 %628  ;;  %v580_v18 = vpop.permute.xlu0 %579 }
 0x1ee   : > { %631 = vst.msk [vmem:[#allocation3 + $0x20] sm:$0xff] %vm501_vm7, %v629_v17 }
 0x1ef   : > { %582 = vst.msk [vmem:[#allocation3 + $0x10] sm:$0xff] %vm573_vm12, %v580_v18 }
 0x1f1   : > { %v684_v19 = vpop.permute.xlu1 %683  ;;  %v633_v20 = vpop.permute.xlu0 %632 }
 0x1f2   : > { %686 = vst.msk [vmem:[#allocation3 + $0x18] sm:$0xff] %vm573_vm12, %v684_v19 }
 0x1f3   : > { %635 = vst.msk [vmem:[#allocation3 + $0x28] sm:$0xff] %vm501_vm7, %v633_v20 }
 0x1f5   : > { %v643_v21 = vpop.permute.xlu0 %642  ;;  %v647_v22 = vpop.permute.xlu1 %646 }
 0x1f6   : > { %645 = vst.msk [vmem:[#allocation3 + $0x20] sm:$0xff] %vm519_vm8, %v643_v21  ;;  %649 = vst.msk [vmem:[#allocation3 + $0x28] sm:$0xff] %vm519_vm8, %v647_v22  ;;  %v810_v25 = vld [vmem:[#allocation3 + $0x10] sm:$0xff] }
 0x1f9   : > { %v699_v23 = vpop.permute.xlu0 %698  ;;  %v657_v24 = vpop.permute.xlu1 %656  ;;  %v811_v26 = vld [vmem:[#allocation3 + $0x18] sm:$0xff] }
 0x1fa   : > { %701 = vst.msk [vmem:[#allocation3 + $0x38] sm:$0xff] %vm446_vm4, %v699_v23  ;;  %v1178_v27 = vpack.c.bf16 %v811_v26, %v810_v25 }
 0x1fb   : > { %659 = vst.msk [vmem:[#allocation3 + $0x20] sm:$0xff] %vm537_vm10, %v657_v24 }
 0x1fc   : > { %1179 = vmatpush3.bf16.msra.mxu0 %v1178_v27 }
 0x1fd   : > { %v661_v28 = vpop.permute.xlu0 %660  ;;  %v709_v29 = vpop.permute.xlu1 %708  ;;  %1180 = vmatprep.subr.bf16.mxu0 %v1334_v38 }
 0x1fe   : > { %663 = vst.msk [vmem:[#allocation3 + $0x28] sm:$0xff] %vm537_vm10, %v661_v28 }
 0x1ff   : > { %711 = vst.msk [vmem:[#allocation3 + $0x30] sm:$0xff] %vm465_vm5, %v709_v29 }
 0x201   : > { %v713_v30 = vpop.permute.xlu0 %712  ;;  %v671_v31 = vpop.permute.xlu1 %670 }
 0x202   : > { %715 = vst.msk [vmem:[#allocation3 + $0x38] sm:$0xff] %vm465_vm5, %v713_v30 }
 0x203   : > { %673 = vst.msk [vmem:[#allocation3 + $0x20] sm:$0xff] %vm555_vm11, %v671_v31 }
 0x205   : > { %v675_v32 = vpop.permute.xlu0 %674  ;;  %v723_v33 = vpop.permute.xlu1 %722 }
 0x206   : > { %677 = vst.msk [vmem:[#allocation3 + $0x28] sm:$0xff] %vm555_vm11, %v675_v32 }
 0x207   : > { %725 = vst.msk [vmem:[#allocation3 + $0x30] sm:$0xff] %vm483_vm6, %v723_v33 }
 0x209   : > { %v727_v34 = vpop.permute.xlu0 %726  ;;  %v688_v35 = vpop.permute.xlu1 %687 }
 0x20a   : > { %729 = vst.msk [vmem:[#allocation3 + $0x38] sm:$0xff] %vm483_vm6, %v727_v34 }
 0x20b   : > { %690 = vst.msk [vmem:[#allocation3 + $0x20] sm:$0xff] %vm573_vm12, %v688_v35 }
 0x20d   : > { %v692_v36 = vpop.permute.xlu0 %691  ;;  %v737_v37 = vpop.permute.xlu1 %736 }
 0x20e   : > { %694 = vst.msk [vmem:[#allocation3 + $0x28] sm:$0xff] %vm573_vm12, %v692_v36 }
 0x20f   : > { %739 = vst.msk [vmem:[#allocation3 + $0x30] sm:$0xff] %vm501_vm7, %v737_v37 }
 0x211   : > { %v741_v39 = vpop.permute.xlu0 %740  ;;  %v751_v40 = vpop.permute.xlu1 %750 }
 0x212   : > { %743 = vst.msk [vmem:[#allocation3 + $0x38] sm:$0xff] %vm501_vm7, %v741_v39  ;;  %v812_v41 = vld [vmem:[#allocation3 + $0x20] sm:$0xff] }
 0x213   : > { %753 = vst.msk [vmem:[#allocation3 + $0x30] sm:$0xff] %vm519_vm8, %v751_v40 }
 0x215   : > { %v755_v42 = vpop.permute.xlu0 %754  ;;  %v765_v43 = vpop.permute.xlu1 %764  ;;  %v813_v44 = vld [vmem:[#allocation3 + $0x28] sm:$0xff] }
 0x216   : > { %757 = vst.msk [vmem:[#allocation3 + $0x38] sm:$0xff] %vm519_vm8, %v755_v42  ;;  %v1181_v45 = vpack.c.bf16 %v813_v44, %v812_v41 }
 0x217   : > { %767 = vst.msk [vmem:[#allocation3 + $0x30] sm:$0xff] %vm537_vm10, %v765_v43 }
 0x218   : > { %1182 = vmatpush3.bf16.msra.mxu0 %v1181_v45 }
 0x219   : > { %v769_v46 = vpop.permute.xlu0 %768  ;;  %v703_v47 = vpop.permute.xlu1 %702  ;;  %1183 = vmatprep.subr.bf16.mxu0 %v1334_v38 }
 0x21a   : > { %771 = vst.msk [vmem:[#allocation3 + $0x38] sm:$0xff] %vm537_vm10, %v769_v46 }
 0x21b   : > { %705 = vst.msk [vmem:[#allocation3 + $0x40] sm:$0xff] %vm446_vm4, %v703_v47 }
 0x21d   : > { %v779_v48 = vpop.permute.xlu0 %778  ;;  %v783_v49 = vpop.permute.xlu1 %782 }
 0x21e   : > { %781 = vst.msk [vmem:[#allocation3 + $0x30] sm:$0xff] %vm555_vm11, %v779_v48  ;;  %785 = vst.msk [vmem:[#allocation3 + $0x38] sm:$0xff] %vm555_vm11, %v783_v49 }
 0x221   : > { %v717_v50 = vpop.permute.xlu0 %716  ;;  %v796_v52 = vpop.permute.xlu1 %795 }
 0x222   : > { %719 = vst.msk [vmem:[#allocation3 + $0x40] sm:$0xff] %vm465_vm5, %v717_v50 }
 0x223   : > { %798 = vst.msk [vmem:[#allocation3 + $0x30] sm:$0xff] %vm573_vm12, %v796_v52 }
 0x225   : > { %v800_v53 = vpop.permute.xlu0 %799  ;;  %v731_v54 = vpop.permute.xlu1 %730 }
 0x226   : > { %802 = vst.msk [vmem:[#allocation3 + $0x38] sm:$0xff] %vm573_vm12, %v800_v53 }
 0x227   : > { %733 = vst.msk [vmem:[#allocation3 + $0x40] sm:$0xff] %vm483_vm6, %v731_v54 }
 0x229   : > { %v745_v38 = vpop.permute.xlu0 %744  ;;  %v759_v55 = vpop.permute.xlu1 %758 }
 0x22a   : > { %747 = vst.msk [vmem:[#allocation3 + $0x40] sm:$0xff] %vm501_vm7, %v745_v38  ;;  %v814_v56 = vld [vmem:[#allocation3 + $0x30] sm:$0xff] }
 0x22b   : > { %761 = vst.msk [vmem:[#allocation3 + $0x40] sm:$0xff] %vm519_vm8, %v759_v55 }
 0x22d   : > { %v773_v57 = vpop.permute.xlu0 %772  ;;  %v787_v58 = vpop.permute.xlu1 %786  ;;  %v815_v59 = vld [vmem:[#allocation3 + $0x38] sm:$0xff] }
 0x22e   : > { %775 = vst.msk [vmem:[#allocation3 + $0x40] sm:$0xff] %vm537_vm10, %v773_v57  ;;  %v1184_v60 = vpack.c.bf16 %v815_v59, %v814_v56 }
 0x22f   : > { %789 = vst.msk [vmem:[#allocation3 + $0x40] sm:$0xff] %vm555_vm11, %v787_v58 }
 0x230   : > { %1185 = vmatpush3.bf16.msra.mxu0 %v1184_v60 }
 0x231   : > { %v804_v61 = vpop.permute.xlu0 %803  ;;  %1169 = vmatprep.subr.mxu0 %v1341_v51 }
 0x232   : > { %806 = vst.msk [vmem:[#allocation3 + $0x40] sm:$0xff] %vm573_vm12, %v804_v61 }
 0x239   : > { %v816_v63 = vld [vmem:[#allocation3 + $0x40] sm:$0xff] }
 0x23a   : > { %1170 = vmatpush3.msra.mxu0 %v816_v63 }
 0x23b   : > { %1172 = vmatmul.mubr.msk.f32.vlgmr.msra.gmra.mrb[0].mxu0 %vm823_vm13, %v807_v62 }
 0x23e   : > { %v821_v0 = vpop.permute.xlu1 %820 }
 0x30e   : > { %v893_v1 = vpop.f32.mrb[0].mxu0 }
 0x30f   : > { %v894_v2 = vadd.f32 %v893_v1, %v821_v0  ;;  %v1173_v3 = vpop.f32.mrb[1].mxu0 }
 0x311   : > { %904 = vst [vmem:[%s1420_s14] sm:$0xff] %v894_v2  ;;  %897 = vadd.xlane.f32.xlu0 %v894_v2 }
 0x39e   : > { %v898_v51 = vpop.xlane.xlu0 %897 }
 0x39f   : > { %v899_v4 = vmul.f32 0.0078125, %v898_v51 }
 0x3a1   : > { %v900_v5 = vsub.f32 %v894_v2, %v899_v4  ;;  %906 = vst.msk [vmem:[%s1425_s17] sm:$0xff] %vm905_vm14, %v899_v4 }
 0x3a3   : > { %v901_v6 = vmul.f32 %v900_v5, %v900_v5 }
 0x3a5   : > { %902 = vadd.xlane.f32.xlu1 %v901_v6 }
 0x432   : > { %v903_v7 = vpop.xlane.xlu1 %902 }
 0x433   : > { %908 = vst.msk [vmem:[%s1425_s17] sm:$0xff] %vm907_vm15, %v903_v7 }
 0x434 PF: > { %s17_s25 = sadd.s32 1, %s1304_s25   ;;  %s1772_s21 = smov %s1296_s23 }
 0x435   : > { %p14_p8 = scmp.ge.s32.totalorder %s17_s25, 6   ;;  %s1773_s22 = smov %s1300_s24 }
 0x436   : > { %s1774_s23 = smov %s1777_s26  ;;  %s1775_s24 = smov %s1781_s27 }
 0x437   :  { %16 = sbr.rel (!%p14_p8) target bundleno = 3 (0x3), region = 113 }

// kernel: _lambda_.3
= control target key start
LH: loop header
LB: loop body
LE: loop exit
PB: predicated region body
PF: predicated region fallthrough
CT: control target
= control target key end

     0   :  { %s1485_s15 = smov 0   ;;  %s1487_s16 = smov 0   ;;  %s1923_s0 = inlined_call_operand.vmem [shape: f32[2,4,16,16], index: 0, kind: input, shape index: {}]   ;;  %s1924_s1 = inlined_call_operand.vmem [shape: f32[8,36], index: 1, kind: input, shape index: {}]   ;;  %s1925_s2 = inlined_call_operand.vmem [shape: f32[8,1], index: 2, kind: input, shape index: {}]   ;;  %s1926_s3 = inlined_call_operand.vmem [shape: f32[2,8,256], index: 3, kind: output, shape index: {0}]   ;;  %s1927_s4 = inlined_call_operand.vmem [shape: f32[2,2,8,2], index: 4, kind: output, shape index: {1}]  }
   0x1   :  { %s1489_s17 = smov 0   ;;  %s1491_s18 = smov 0  }
   0x2   :  { %s1493_s19 = smov 0  }
   0x3 LB: > { %s24_s20 = sadd.s32 1, %s1421_s17  ;;  %s27_s21 = sadd.s32 1, %s1425_s18  ;;  %s1429_s19 = sphi %s1493_s19, %s15_s19   ;;  %s1425_s18 = sphi %s1491_s18, %s1935_s18   ;;  %s1421_s17 = sphi %s1489_s17, %s1934_s17   ;;  %s1417_s16 = sphi %s1487_s16, %s1933_s16   ;;  %s1413_s15 = sphi %s1485_s15, %s1932_s15  }
   0x4   : > { %p25_p0 = scmp.ge.s32.totalorder %s24_s20, 2  ;;  %p1229_p1 = scmp.ge.s32.totalorder %s1429_s19, 1 }
   0x5   : > { %p181_p2 = scmp.lt.s32.totalorder %s1429_s19, 5 }
   0x6   : > { %s1937_s20 = smov (%p25_p0, %s24_s20), 0  ;;  %s1939_s21 = smov (!%p25_p0, %s27_s21), %s1425_s18 }
   0x7   : > { %p182_p3 = pnand %p1229_p1, %p181_p2  ;;  %p29_p4 = scmp.ge.s32.totalorder %s1939_s21, 2 }
   0x8   : > { %p218_p5 = scmp.lt.s32.totalorder (!%p182_p3), %s1417_s16, 1  ;;  %p225_p6 = scmp.lt.s32.totalorder (!%p182_p3), %s1413_s15, 1 }
   0x9   : > { %s1941_s21 = smov (%p29_p4, %s1939_s21), 0  ;;  %185 = sbr.rel (%p182_p3) target bundleno = 957 (0x3bd), region = 32 }
   0xa   : > { %p1236_p7 = scmp.ne.s32.totalorder (!%p182_p3), %s1413_s15, 0 }
  0x10   : > { %s1943_s16 = smov (!%p218_p5, %s1417_s16), 1  ;;  %242 = sbr.rel (%p1236_p7) target bundleno = 185 (0xb9), region = 36 }
  0x11   : > { %s226_s22 = scalar_select %p225_p6, %s1413_s15, 1 }
  0x12   : > { %s1284_s23 = sshll.u32 %s1943_s16, 6  ;;  %s1232_s24 = sshll.u32 %s1943_s16, 1  ;;  %vm294_vm0 = vcmask (!%p1236_p7), 1041409   ;;  %vm297_vm1 = vcmask (!%p1236_p7), 1042434   ;;  %vm300_vm2 = vcmask (!%p1236_p7), 1043459   ;;  %vm243_vm3 = vcmask (!%p1236_p7), 142336  }
  0x13   : > { %s1522_s27 = scalar_lea.vmem %s1923_s0, %s1284_s23  ;;  %s228_s28 = sadd.s32 %s1232_s24, %s226_s22  ;;  %v1432_v58 = vmov (!%p1236_p7), 0.0   ;;  %vm247_vm4 = vcmask (!%p1236_p7), 3072   ;;  %vm266_vm5 = vcmask (!%p1236_p7), 142472   ;;  %vm306_vm6 = vcmask (!%p1236_p7), 134152  }
  0x14   : > { %s1233_s29 = sshll.u32 %s228_s28, 3  ;;  %v327_v0 = vld [vmem:[%s1522_s27 + $0x2] sm:$0x1] (!%p1236_p7)  ;;  %v328_v1 = vld [vmem:[%s1522_s27 + $0x12] sm:$0x1] (!%p1236_p7)  ;;  %s1431_s10 = smov (!%p1236_p7), 1  }
  0x15   : > { %s1527_s6 = scalar_lea.vmem %s1926_s3, %s1233_s29  ;;  %s1532_s9 = scalar_lea.vmem %s1927_s4, %s1233_s29  ;;  %v329_v2 = vld [vmem:[%s1522_s27 + $0x22] sm:$0x1] (!%p1236_p7)  ;;  %v330_v3 = vld [vmem:[%s1522_s27 + $0x32] sm:$0x1] (!%p1236_p7)  ;;  %v335_v4 = vrot.slane (!%p1236_p7), %v328_v1, 7 }
  0x16   : > { %v337_v5 = vrot.slane (!%p1236_p7), %v329_v2, 6  ;;  %v339_v6 = vrot.slane (!%p1236_p7), %v330_v3, 5  ;;  %v285_v7 = vld [vmem:[%s1522_s27] sm:$0x1] (!%p1236_p7)  ;;  %v286_v8 = vld [vmem:[%s1522_s27 + $0x10] sm:$0x1] (!%p1236_p7) }
  0x17   : > { %v287_v9 = vld [vmem:[%s1522_s27 + $0x20] sm:$0x1]  ;;  %v288_v10 = vld [vmem:[%s1522_s27 + $0x30] sm:$0x1]  ;;  %v336_v11 = vsel %vm294_vm0, %v335_v4, %v327_v0  ;;  %v293_v12 = vrot.slane %v286_v8, 7 }
  0x18   : > { %v296_v13 = vrot.slane %v287_v9, 6  ;;  %v299_v14 = vrot.slane %v288_v10, 5  ;;  %v346_v15 = vld [vmem:[%s1522_s27 + $0x3] sm:$0x1]  ;;  %v338_v16 = vsel %vm297_vm1, %v337_v5, %v336_v11  ;;  %v347_v17 = vld [vmem:[%s1522_s27 + $0x13] sm:$0x1] }
  0x19   : > { %v348_v18 = vld [vmem:[%s1522_s27 + $0x23] sm:$0x1]  ;;  %v349_v19 = vld [vmem:[%s1522_s27 + $0x33] sm:$0x1]  ;;  %v340_v20 = vsel %vm300_vm2, %v339_v6, %v338_v16  ;;  %v295_v21 = vsel %vm294_vm0, %v293_v12, %v285_v7  ;;  %v354_v22 = vrot.slane %v347_v17, 7 }
  0x1a   : > { %v356_v23 = vrot.slane %v348_v18, 6  ;;  %v308_v24 = vld [vmem:[%s1522_s27 + $0x1] sm:$0x1]  ;;  %v309_v25 = vld [vmem:[%s1522_s27 + $0x11] sm:$0x1]  ;;  %341 = vrot.lane.b32.xlu1 %v340_v20, %s1431_s10  ;;  %v298_v26 = vsel %vm297_vm1, %v296_v13, %v295_v21  ;;  %v358_v27 = vrot.slane %v349_v19, 5 }
  0x1b   : > { %v310_v28 = vld [vmem:[%s1522_s27 + $0x21] sm:$0x1]  ;;  %v311_v29 = vld [vmem:[%s1522_s27 + $0x31] sm:$0x1]  ;;  %v316_v30 = vrot.slane %v309_v25, 7  ;;  %v301_v31 = vsel %vm300_vm2, %v299_v14, %v298_v26  ;;  %v355_v32 = vsel %vm294_vm0, %v354_v22, %v346_v15 }
  0x1c   : > { %v318_v33 = vrot.slane %v310_v28, 6  ;;  %v320_v34 = vrot.slane %v311_v29, 5  ;;  %v384_v35 = vld [vmem:[%s1522_s27 + $0x5] sm:$0x1]  ;;  %v385_v36 = vld [vmem:[%s1522_s27 + $0x15] sm:$0x1]  ;;  %302 = vrot.lane.b32.xlu0 %v301_v31, %s1431_s10  ;;  %v357_v37 = vsel %vm297_vm1, %v356_v23, %v355_v32 }
  0x1d   : > { %v317_v38 = vsel %vm294_vm0, %v316_v30, %v308_v24  ;;  %v386_v39 = vld [vmem:[%s1522_s27 + $0x25] sm:$0x1]  ;;  %v387_v40 = vld [vmem:[%s1522_s27 + $0x35] sm:$0x1]  ;;  %v392_v41 = vrot.slane %v385_v36, 7  ;;  %v359_v42 = vsel %vm300_vm2, %v358_v27, %v357_v37 }
  0x1e   : > { %v319_v43 = vsel %vm297_vm1, %v318_v33, %v317_v38  ;;  %v394_v44 = vrot.slane %v386_v39, 6  ;;  %v396_v45 = vrot.slane %v387_v40, 5  ;;  %v365_v46 = vld [vmem:[%s1522_s27 + $0x4] sm:$0x1]  ;;  %v366_v47 = vld [vmem:[%s1522_s27 + $0x14] sm:$0x1]  ;;  %360 = vrot.lane.b32.xlu1 %v359_v42, %s1431_s10 }
  0x1f   : > { %v321_v48 = vsel %vm300_vm2, %v320_v34, %v319_v43  ;;  %v393_v49 = vsel %vm294_vm0, %v392_v41, %v384_v35  ;;  %v367_v50 = vld [vmem:[%s1522_s27 + $0x24] sm:$0x1]  ;;  %v368_v51 = vld [vmem:[%s1522_s27 + $0x34] sm:$0x1]  ;;  %v373_v52 = vrot.slane %v366_v47, 7 }
  0x20   : > { %v395_v53 = vsel %vm297_vm1, %v394_v44, %v393_v49  ;;  %v375_v54 = vrot.slane %v367_v50, 6  ;;  %v377_v55 = vrot.slane %v368_v51, 5  ;;  %v422_v56 = vld [vmem:[%s1522_s27 + $0x7] sm:$0x1]  ;;  %v423_v57 = vld [vmem:[%s1522_s27 + $0x17] sm:$0x1]  ;;  %322 = vrot.lane.b32.xlu0 %v321_v48, %s1431_s10 }
  0x21   : > { %244 = vst.msk [vmem:[#allocation2] sm:$0xf] %vm243_vm3, %v1432_v58  ;;  %246 = vst.msk [vmem:[#allocation2 + $0x44] sm:$0xf] %vm243_vm3, %v1432_v58  ;;  %v397_v59 = vsel %vm300_vm2, %v396_v45, %v395_v53  ;;  %v374_v60 = vsel %vm294_vm0, %v373_v52, %v365_v46  ;;  %v424_v61 = vld [vmem:[%s1522_s27 + $0x27] sm:$0x1] }
  0x22   : > { %v425_v62 = vld [vmem:[%s1522_s27 + $0x37] sm:$0x1]  ;;  %v430_v63 = vrot.slane %v423_v57, 7  ;;  %v376_v0 = vsel %vm297_vm1, %v375_v54, %v374_v60  ;;  %v432_v1 = vrot.slane %v424_v61, 6  ;;  %v403_v3 = vld [vmem:[%s1522_s27 + $0x6] sm:$0x1]  ;;  %398 = vrot.lane.b32.xlu1 %v397_v59, %s1431_s10 }
  0x23   : > { %v434_v2 = vrot.slane %v425_v62, 5  ;;  %v404_v4 = vld [vmem:[%s1522_s27 + $0x16] sm:$0x1]  ;;  %248 = vst.msk [vmem:[#allocation2] sm:$0xf] %vm247_vm4, %v1432_v58  ;;  %v378_v5 = vsel %vm300_vm2, %v377_v55, %v376_v0 }
  0x24   : > { %251 = vst.msk [vmem:[#allocation2 + $0xc] sm:$0xf] %vm247_vm4, %v1432_v58  ;;  %265 = vst.msk [vmem:[#allocation2 + $0x44] sm:$0xf] %vm247_vm4, %v1432_v58  ;;  %v431_v6 = vsel %vm294_vm0, %v430_v63, %v422_v56  ;;  %v405_v7 = vld [vmem:[%s1522_s27 + $0x26] sm:$0x1]  ;;  %379 = vrot.lane.b32.xlu0 %v378_v5, %s1431_s10 }
  0x25   : > { %249 = vst.msk [vmem:[#allocation2 + $0x4] sm:$0xf] %vm247_vm4, %v1432_v58  ;;  %250 = vst.msk [vmem:[#allocation2 + $0x8] sm:$0xf] %vm247_vm4, %v1432_v58  ;;  %v406_v8 = vld [vmem:[%s1522_s27 + $0x36] sm:$0x1]  ;;  %v433_v10 = vsel %vm297_vm1, %v432_v1, %v431_v6 }
  0x26   : > { %252 = vst.msk [vmem:[#allocation2 + $0x10] sm:$0xf] %vm247_vm4, %v1432_v58  ;;  %253 = vst.msk [vmem:[#allocation2 + $0x14] sm:$0xf] %vm247_vm4, %v1432_v58  ;;  %v411_v9 = vrot.slane %v404_v4, 7  ;;  %v413_v11 = vrot.slane %v405_v7, 6  ;;  %v435_v15 = vsel %vm300_vm2, %v434_v2, %v433_v10 }
  0x27   : > { %254 = vst.msk [vmem:[#allocation2 + $0x18] sm:$0xf] %vm247_vm4, %v1432_v58  ;;  %255 = vst.msk [vmem:[#allocation2 + $0x1c] sm:$0xf] %vm247_vm4, %v1432_v58  ;;  %v415_v12 = vrot.slane %v406_v8, 5  ;;  %436 = vrot.lane.b32.xlu1 %v435_v15, %s1431_s10 }
  0x28   : > { %256 = vst.msk [vmem:[#allocation2 + $0x20] sm:$0xf] %vm247_vm4, %v1432_v58  ;;  %257 = vst.msk [vmem:[#allocation2 + $0x24] sm:$0xf] %vm247_vm4, %v1432_v58  ;;  %v460_v13 = vld [vmem:[%s1522_s27 + $0x9] sm:$0x1]  ;;  %v412_v16 = vsel %vm294_vm0, %v411_v9, %v403_v3 }
  0x29   : > { %258 = vst.msk [vmem:[#allocation2 + $0x28] sm:$0xf] %vm247_vm4, %v1432_v58  ;;  %259 = vst.msk [vmem:[#allocation2 + $0x2c] sm:$0xf] %vm247_vm4, %v1432_v58  ;;  %v461_v14 = vld [vmem:[%s1522_s27 + $0x19] sm:$0x1]  ;;  %v414_v20 = vsel %vm297_vm1, %v413_v11, %v412_v16 }
  0x2a   : > { %260 = vst.msk [vmem:[#allocation2 + $0x30] sm:$0xf] %vm247_vm4, %v1432_v58  ;;  %261 = vst.msk [vmem:[#allocation2 + $0x34] sm:$0xf] %vm247_vm4, %v1432_v58  ;;  %v462_v17 = vld [vmem:[%s1522_s27 + $0x29] sm:$0x1]  ;;  %v416_v25 = vsel %vm300_vm2, %v415_v12, %v414_v20 }
  0x2b   : > { %262 = vst.msk [vmem:[#allocation2 + $0x38] sm:$0xf] %vm247_vm4, %v1432_v58  ;;  %263 = vst.msk [vmem:[#allocation2 + $0x3c] sm:$0xf] %vm247_vm4, %v1432_v58  ;;  %v463_v18 = vld [vmem:[%s1522_s27 + $0x39] sm:$0x1]  ;;  %417 = vrot.lane.b32.xlu0 %v416_v25, %s1431_s10 }
  0x2c   : > { %264 = vst.msk [vmem:[#allocation2 + $0x40] sm:$0xf] %vm247_vm4, %v1432_v58  ;;  %v468_v19 = vrot.slane %v461_v14, 7  ;;  %v470_v21 = vrot.slane %v462_v17, 6  ;;  %v472_v22 = vrot.slane %v463_v18, 5 }
  0x2d   : > { %267 = vst.msk [vmem:[#allocation2] sm:$0xf] %vm266_vm5, %v1432_v58  ;;  %270 = vst.msk [vmem:[#allocation2 + $0xc] sm:$0xf] %vm266_vm5, %v1432_v58  ;;  %v441_v23 = vld [vmem:[%s1522_s27 + $0x8] sm:$0x1] }
  0x2e   : > { %284 = vst.msk [vmem:[#allocation2 + $0x44] sm:$0xf] %vm266_vm5, %v1432_v58  ;;  %268 = vst.msk [vmem:[#allocation2 + $0x4] sm:$0xf] %vm266_vm5, %v1432_v58  ;;  %v442_v24 = vld [vmem:[%s1522_s27 + $0x18] sm:$0x1]  ;;  %v469_v26 = vsel %vm294_vm0, %v468_v19, %v460_v13 }
  0x2f   : > { %269 = vst.msk [vmem:[#allocation2 + $0x8] sm:$0xf] %vm266_vm5, %v1432_v58  ;;  %271 = vst.msk [vmem:[#allocation2 + $0x10] sm:$0xf] %vm266_vm5, %v1432_v58  ;;  %v443_v27 = vld [vmem:[%s1522_s27 + $0x28] sm:$0x1]  ;;  %v471_v30 = vsel %vm297_vm1, %v470_v21, %v469_v26 }
  0x30   : > { %272 = vst.msk [vmem:[#allocation2 + $0x14] sm:$0xf] %vm266_vm5, %v1432_v58  ;;  %273 = vst.msk [vmem:[#allocation2 + $0x18] sm:$0xf] %vm266_vm5, %v1432_v58  ;;  %v444_v28 = vld [vmem:[%s1522_s27 + $0x38] sm:$0x1]  ;;  %v473_v35 = vsel %vm300_vm2, %v472_v22, %v471_v30 }
  0x31   : > { %274 = vst.msk [vmem:[#allocation2 + $0x1c] sm:$0xf] %vm266_vm5, %v1432_v58  ;;  %275 = vst.msk [vmem:[#allocation2 + $0x20] sm:$0xf] %vm266_vm5, %v1432_v58  ;;  %v449_v29 = vrot.slane %v442_v24, 7  ;;  %v451_v31 = vrot.slane %v443_v27, 6  ;;  %474 = vrot.lane.b32.xlu1 %v473_v35, %s1431_s10 }
  0x32   : > { %276 = vst.msk [vmem:[#allocation2 + $0x24] sm:$0xf] %vm266_vm5, %v1432_v58  ;;  %277 = vst.msk [vmem:[#allocation2 + $0x28] sm:$0xf] %vm266_vm5, %v1432_v58  ;;  %v453_v32 = vrot.slane %v444_v28, 5 }
  0x33   : > { %278 = vst.msk [vmem:[#allocation2 + $0x2c] sm:$0xf] %vm266_vm5, %v1432_v58  ;;  %279 = vst.msk [vmem:[#allocation2 + $0x30] sm:$0xf] %vm266_vm5, %v1432_v58  ;;  %v498_v33 = vld [vmem:[%s1522_s27 + $0xb] sm:$0x1]  ;;  %v450_v36 = vsel %vm294_vm0, %v449_v29, %v441_v23 }
  0x34   : > { %280 = vst.msk [vmem:[#allocation2 + $0x34] sm:$0xf] %vm266_vm5, %v1432_v58  ;;  %281 = vst.msk [vmem:[#allocation2 + $0x38] sm:$0xf] %vm266_vm5, %v1432_v58  ;;  %v499_v34 = vld [vmem:[%s1522_s27 + $0x1b] sm:$0x1]  ;;  %v452_v40 = vsel %vm297_vm1, %v451_v31, %v450_v36 }
  0x35   : > { %282 = vst.msk [vmem:[#allocation2 + $0x3c] sm:$0xf] %vm266_vm5, %v1432_v58  ;;  %283 = vst.msk [vmem:[#allocation2 + $0x40] sm:$0xf] %vm266_vm5, %v1432_v58  ;;  %v500_v37 = vld [vmem:[%s1522_s27 + $0x2b] sm:$0x1]  ;;  %v454_v45 = vsel %vm300_vm2, %v453_v32, %v452_v40 }
  0x36   : > { %v501_v38 = vld [vmem:[%s1522_s27 + $0x3b] sm:$0x1]  ;;  %v506_v39 = vrot.slane %v499_v34, 7  ;;  %v508_v41 = vrot.slane %v500_v37, 6  ;;  %v479_v43 = vld [vmem:[%s1522_s27 + $0xa] sm:$0x1]  ;;  %455 = vrot.lane.b32.xlu0 %v454_v45, %s1431_s10 }
  0x37   : > { %v510_v42 = vrot.slane %v501_v38, 5  ;;  %v480_v44 = vld [vmem:[%s1522_s27 + $0x1a] sm:$0x1]  ;;  %v481_v47 = vld [vmem:[%s1522_s27 + $0x2a] sm:$0x1] }
  0x38   : > { %v507_v46 = vsel %vm294_vm0, %v506_v39, %v498_v33  ;;  %v482_v48 = vld [vmem:[%s1522_s27 + $0x3a] sm:$0x1]  ;;  %v487_v49 = vrot.slane %v480_v44, 7  ;;  %v489_v51 = vrot.slane %v481_v47, 6  ;;  %v536_v53 = vld [vmem:[%s1522_s27 + $0xd] sm:$0x1] }
  0x39   : > { %v509_v50 = vsel %vm297_vm1, %v508_v41, %v507_v46  ;;  %v491_v52 = vrot.slane %v482_v48, 5  ;;  %v537_v54 = vld [vmem:[%s1522_s27 + $0x1d] sm:$0x1]  ;;  %v538_v57 = vld [vmem:[%s1522_s27 + $0x2d] sm:$0x1] }
  0x3a   : > { %v511_v55 = vsel %vm300_vm2, %v510_v42, %v509_v50  ;;  %v488_v56 = vsel %vm294_vm0, %v487_v49, %v479_v43  ;;  %v539_v58 = vld [vmem:[%s1522_s27 + $0x3d] sm:$0x1]  ;;  %v544_v59 = vrot.slane %v537_v54, 7  ;;  %v546_v61 = vrot.slane %v538_v57, 6  ;;  %v517_v63 = vld [vmem:[%s1522_s27 + $0xc] sm:$0x1] }
  0x3b   : > { %v490_v60 = vsel %vm297_vm1, %v489_v51, %v488_v56  ;;  %v548_v62 = vrot.slane %v539_v58, 5  ;;  %v518_v0 = vld [vmem:[%s1522_s27 + $0x1c] sm:$0x1]  ;;  %512 = vrot.lane.b32.xlu1 %v511_v55, %s1431_s10  ;;  %v519_v3 = vld [vmem:[%s1522_s27 + $0x2c] sm:$0x1] }
  0x3c   : > { %v492_v1 = vsel %vm300_vm2, %v491_v52, %v490_v60  ;;  %v545_v2 = vsel %vm294_vm0, %v544_v59, %v536_v53  ;;  %v520_v4 = vld [vmem:[%s1522_s27 + $0x3c] sm:$0x1]  ;;  %v525_v5 = vrot.slane %v518_v0, 7  ;;  %v527_v7 = vrot.slane %v519_v3, 6  ;;  %v574_v9 = vld [vmem:[%s1522_s27 + $0xf] sm:$0x1] }
  0x3d   : > { %v547_v6 = vsel %vm297_vm1, %v546_v61, %v545_v2  ;;  %v529_v8 = vrot.slane %v520_v4, 5  ;;  %v575_v10 = vld [vmem:[%s1522_s27 + $0x1f] sm:$0x1]  ;;  %493 = vrot.lane.b32.xlu0 %v492_v1, %s1431_s10  ;;  %v576_v13 = vld [vmem:[%s1522_s27 + $0x2f] sm:$0x1] }
  0x3e   : > { %v549_v11 = vsel %vm300_vm2, %v548_v62, %v547_v6  ;;  %v526_v12 = vsel %vm294_vm0, %v525_v5, %v517_v63  ;;  %v577_v14 = vld [vmem:[%s1522_s27 + $0x3f] sm:$0x1]  ;;  %v582_v15 = vrot.slane %v575_v10, 7  ;;  %v584_v17 = vrot.slane %v576_v13, 6  ;;  %v555_v19 = vld [vmem:[%s1522_s27 + $0xe] sm:$0x1] }
  0x3f   : > { %v528_v16 = vsel %vm297_vm1, %v527_v7, %v526_v12  ;;  %v586_v18 = vrot.slane %v577_v14, 5  ;;  %v556_v20 = vld [vmem:[%s1522_s27 + $0x1e] sm:$0x1]  ;;  %550 = vrot.lane.b32.xlu1 %v549_v11, %s1431_s10  ;;  %v557_v23 = vld [vmem:[%s1522_s27 + $0x2e] sm:$0x1] }
  0x40   : > { %v530_v21 = vsel %vm300_vm2, %v529_v8, %v528_v16  ;;  %v583_v22 = vsel %vm294_vm0, %v582_v15, %v574_v9  ;;  %v558_v24 = vld [vmem:[%s1522_s27 + $0x3e] sm:$0x1]  ;;  %v563_v25 = vrot.slane %v556_v20, 7  ;;  %v565_v27 = vrot.slane %v557_v23, 6 }
  0x41   : > { %v585_v26 = vsel %vm297_vm1, %v584_v17, %v583_v22  ;;  %v567_v28 = vrot.slane %v558_v24, 5  ;;  %531 = vrot.lane.b32.xlu0 %v530_v21, %s1431_s10 }
  0x42   : > { %v587_v29 = vsel %vm300_vm2, %v586_v18, %v585_v26  ;;  %v564_v30 = vsel %vm294_vm0, %v563_v25, %v555_v19 }
  0x43   : > { %v566_v31 = vsel %vm297_vm1, %v565_v27, %v564_v30  ;;  %588 = vrot.lane.b32.xlu1 %v587_v29, %s1431_s10 }
  0x44   : > { %v568_v32 = vsel %vm300_vm2, %v567_v28, %v566_v31 }
  0x45   : > { %569 = vrot.lane.b32.xlu0 %v568_v32, %s1431_s10 }
  0x8c   : > { %v342_v33 = vpop.permute.xlu1 %341 }
  0x8d   : > { %345 = vst.msk [vmem:[#allocation2 + $0xc] sm:$0xf] %vm306_vm6, %v342_v33 }
  0x8e   : > { %v303_v34 = vpop.permute.xlu0 %302 }
  0x8f   : > { %307 = vst.msk [vmem:[#allocation2 + $0x4] sm:$0xf] %vm306_vm6, %v303_v34 }
  0x90   : > { %v361_v35 = vpop.permute.xlu1 %360 }
  0x91   : > { %364 = vst.msk [vmem:[#allocation2 + $0x10] sm:$0xf] %vm306_vm6, %v361_v35 }
  0x92   : > { %v323_v36 = vpop.permute.xlu0 %322 }
  0x93   : > { %326 = vst.msk [vmem:[#allocation2 + $0x8] sm:$0xf] %vm306_vm6, %v323_v36 }
  0x94   : > { %v399_v37 = vpop.permute.xlu1 %398 }
  0x95   : > { %402 = vst.msk [vmem:[#allocation2 + $0x18] sm:$0xf] %vm306_vm6, %v399_v37 }
  0x96   : > { %v380_v38 = vpop.permute.xlu0 %379 }
  0x97   : > { %383 = vst.msk [vmem:[#allocation2 + $0x14] sm:$0xf] %vm306_vm6, %v380_v38 }
  0x99   : > { %v437_v39 = vpop.permute.xlu1 %436 }
  0x9a   : > { %440 = vst.msk [vmem:[#allocation2 + $0x20] sm:$0xf] %vm306_vm6, %v437_v39 }
  0x9d   : > { %v418_v40 = vpop.permute.xlu0 %417 }
  0x9e   : > { %421 = vst.msk [vmem:[#allocation2 + $0x1c] sm:$0xf] %vm306_vm6, %v418_v40 }
  0xa3   : > { %v475_v41 = vpop.permute.xlu1 %474 }
  0xa4   : > { %478 = vst.msk [vmem:[#allocation2 + $0x28] sm:$0xf] %vm306_vm6, %v475_v41 }
  0xa8   : > { %v456_v42 = vpop.permute.xlu0 %455 }
  0xa9   : > { %459 = vst.msk [vmem:[#allocation2 + $0x24] sm:$0xf] %vm306_vm6, %v456_v42 }
  0xad   : > { %v513_v43 = vpop.permute.xlu1 %512 }
  0xae   : > { %516 = vst.msk [vmem:[#allocation2 + $0x30] sm:$0xf] %vm306_vm6, %v513_v43 }
  0xaf   : > { %v494_v44 = vpop.permute.xlu0 %493 }
  0xb0   : > { %497 = vst.msk [vmem:[#allocation2 + $0x2c] sm:$0xf] %vm306_vm6, %v494_v44 }
  0xb1   : > { %v551_v45 = vpop.permute.xlu1 %550 }
  0xb2   : > { %554 = vst.msk [vmem:[#allocation2 + $0x38] sm:$0xf] %vm306_vm6, %v551_v45 }
  0xb3   : > { %v532_v46 = vpop.permute.xlu0 %531 }
  0xb4   : > { %535 = vst.msk [vmem:[#allocation2 + $0x34] sm:$0xf] %vm306_vm6, %v532_v46 }
  0xb5   : > { %v589_v47 = vpop.permute.xlu1 %588 }
  0xb6   : > { %592 = vst.msk [vmem:[#allocation2 + $0x40] sm:$0xf] %vm306_vm6, %v589_v47 }
  0xb7   : > { %v570_v48 = vpop.permute.xlu0 %569 }
  0xb8   : > { %573 = vst.msk [vmem:[#allocation2 + $0x3c] sm:$0xf] %vm306_vm6, %v570_v48 }
  0xb9 PF: > { %s1285_s11 = sshll.u32 %s1413_s15, 5  ;;  %vm597_vm7 = vcmask 125952   ;;  %s1433_s13 = smov 16   ;;  %v1456_v5 = vmov 0.0|0.0   ;;  %vm616_vm8 = vcmask 257152   ;;  %vm634_vm9 = vcmask 388352  }
  0xba   : > { %s1718_s12 = scalar_lea.vmem [#allocation2], %s1285_s11  ;;  %s1434_s14 = smov 127   ;;  %1314 = vmatprep.subr.bf16.mxu0 %v1456_v5  ;;  %vm1457_vm10 = vmmov 0   ;;  %v1458_v20 = vmov 0.0   ;;  %vm652_vm11 = vcmask 519552   ;;  %v1459_v21 = vmov 0  }
  0xbb   : > { %s1435_s15 = smov 15   ;;  %s1436_s16 = smov 126   ;;  %1311 = vmatprep.mubr.msk.f32.mxu0 %vm1457_vm10, %v1458_v20  ;;  %1389 = vset.pattern.permute.xlu1 %v1459_v21  ;;  %v964_v22 = vld [vmem:[%s1925_s2] sm:$0xff]  ;;  %vm670_vm12 = vcmask 650752   ;;  %vm688_vm13 = vcmask 781952   ;;  %vm706_vm14 = vcmask 913152  }
  0xbc   : > { %s1928_s22 = smov 14   ;;  %s1438_s23 = smov 31   ;;  %1390 = vset.pattern.permute.xlu0 %v1459_v21  ;;  %vm724_vm15 = vcmask 1044352   ;;  %vm974_vm0 = vcmask 1043456   ;;  %vm970_vm1 = vcmask 293888   ;;  %vm1056_vm2 = vcmask 7168  }
  0xbd   : > { %s1439_s24 = smov 32   ;;  %s1929_s25 = smov 30   ;;  %vm1058_vm3 = vcmask 15368  }
  0xbe   : > { %s1441_s26 = smov 47   ;;  %s1442_s27 = smov 48  }
  0xbf   : > { %v1241_v49 = vld [vmem:[%s1718_s12 + $0x4] sm:$0xf]  ;;  %v596_v50 = vld [vmem:[%s1718_s12] sm:$0xf]  ;;  %v1729_v52 = vld [vmem:[%s1718_s12 + $0x8] sm:$0xf] }
  0xc0   : > { %613 = vrot.lane.b32.xlu1 %v1241_v49, %s1433_s13  ;;  %600 = vrot.lane.b32.xlu0 %v596_v50, %s1434_s14  ;;  %598 = vst.msk [vmem:[#allocation3] sm:$0xf] %vm597_vm7, %v596_v50  ;;  %v1260_v51 = vld [vmem:[%s1718_s12 + $0x4] sm:$0xf]  ;;  %v1261_v53 = vld [vmem:[%s1718_s12 + $0x8] sm:$0xf] }
  0xc1   : > { %735 = vst.msk [vmem:[#allocation3 + $0xc] sm:$0xf] %vm597_vm7, %v1260_v51  ;;  %847 = vst.msk [vmem:[#allocation3 + $0x18] sm:$0xf] %vm597_vm7, %v1729_v52  ;;  %v1244_v54 = vld [vmem:[%s1718_s12 + $0x8] sm:$0xf] }
  0xc2   : > { %v1262_v55 = vld [vmem:[%s1718_s12 + $0xc] sm:$0xf]  ;;  %v1263_v57 = vld [vmem:[%s1718_s12 + $0x10] sm:$0xf]  ;;  %s1443_s28 = smov 46   ;;  %s1444_s29 = smov 63  }
  0xc3   : > { %v1247_v56 = vld [vmem:[%s1718_s12 + $0xc] sm:$0xf]  ;;  %v1250_v58 = vld [vmem:[%s1718_s12 + $0x10] sm:$0xf]  ;;  %s1445_s30 = smov 64   ;;  %s1446_s5 = smov 62  }
  0xc4   : > { %618 = vrot.lane.b32.xlu1 %v1241_v49, %s1435_s15  ;;  %604 = vrot.lane.b32.xlu0 %v596_v50, %s1436_s16  ;;  %v1264_v59 = vld [vmem:[%s1718_s12 + $0x14] sm:$0xf]  ;;  %s1447_s7 = smov 80   ;;  %s1448_s8 = smov 78   ;;  %v1766_v61 = vld [vmem:[%s1718_s12 + $0xc] sm:$0xf] }
  0xc5   : > { %v1253_v60 = vld [vmem:[%s1718_s12 + $0x14] sm:$0xf]  ;;  %s1449_s10 = smov 79   ;;  %v1265_v62 = vld [vmem:[%s1718_s12 + $0x18] sm:$0xf]  ;;  %s1450_s11 = smov 96  }
  0xc6   : > { %v1256_v63 = vld [vmem:[%s1718_s12 + $0x18] sm:$0xf]  ;;  %v1272_v0 = vld [vmem:[%s1718_s12 + $0x10] sm:$0xf]  ;;  %v1266_v1 = vld [vmem:[%s1718_s12 + $0x1c] sm:$0xf] }
  0xc7   : > { %v1259_v2 = vld [vmem:[%s1718_s12 + $0x1c] sm:$0xf]  ;;  %v1273_v3 = vld [vmem:[%s1718_s12 + $0x14] sm:$0xf]  ;;  %v1269_v4 = vld [vmem:[%s1718_s12 + $0x20] sm:$0xf] }
  0xc8   : > { %747 = vrot.lane.b32.xlu1 %v1261_v53, %s1433_s13  ;;  %622 = vrot.lane.b32.xlu0 %v1241_v49, %s1928_s22  ;;  %v1274_v6 = vld [vmem:[%s1718_s12 + $0x18] sm:$0xf]  ;;  %v1275_v7 = vld [vmem:[%s1718_s12 + $0x1c] sm:$0xf] }
  0xc9   : > { %v1276_v8 = vld [vmem:[%s1718_s12 + $0x20] sm:$0xf]  ;;  %v1279_v11 = vld [vmem:[%s1718_s12 + $0x24] sm:$0xf]  ;;  %s1931_s12 = smov 30  }
  0xcc   : > { %636 = vrot.lane.b32.xlu1 %v1244_v54, %s1438_s23  ;;  %631 = vrot.lane.b32.xlu0 %v1244_v54, %s1439_s24 }
  0xd0   : > { %761 = vrot.lane.b32.xlu1 %v1262_v55, %s1439_s24  ;;  %640 = vrot.lane.b32.xlu0 %v1244_v54, %s1929_s25 }
  0xd4   : > { %654 = vrot.lane.b32.xlu1 %v1247_v56, %s1441_s26  ;;  %649 = vrot.lane.b32.xlu0 %v1247_v56, %s1442_s27 }
  0xd8   : > { %775 = vrot.lane.b32.xlu1 %v1263_v57, %s1442_s27  ;;  %658 = vrot.lane.b32.xlu0 %v1247_v56, %s1443_s28 }
  0xdc   : > { %672 = vrot.lane.b32.xlu1 %v1250_v58, %s1444_s29  ;;  %667 = vrot.lane.b32.xlu0 %v1250_v58, %s1445_s30 }
  0xe0   : > { %737 = vrot.lane.b32.xlu1 %v1260_v51, %s1434_s14  ;;  %676 = vrot.lane.b32.xlu0 %v1250_v58, %s1446_s5 }
  0xe4   : > { %789 = vrot.lane.b32.xlu1 %v1264_v59, %s1445_s30  ;;  %741 = vrot.lane.b32.xlu0 %v1260_v51, %s1436_s16 }
  0xe8   : > { %685 = vrot.lane.b32.xlu1 %v1253_v60, %s1447_s7  ;;  %849 = vrot.lane.b32.xlu0 %v1729_v52, %s1434_s14  ;;  %s1451_s14 = smov 94  }
  0xec   : > { %694 = vrot.lane.b32.xlu1 %v1253_v60, %s1448_s8  ;;  %690 = vrot.lane.b32.xlu0 %v1253_v60, %s1449_s10 }
  0xf0   : > { %755 = vrot.lane.b32.xlu1 %v1261_v53, %s1928_s22  ;;  %751 = vrot.lane.b32.xlu0 %v1261_v53, %s1435_s15  ;;  %s1452_s22 = smov 95  }
  0xf4   : > { %859 = vrot.lane.b32.xlu1 %v1766_v61, %s1433_s13  ;;  %803 = vrot.lane.b32.xlu0 %v1265_v62, %s1447_s7  ;;  %s1453_s13 = smov 112  }
  0xf8   : > { %703 = vrot.lane.b32.xlu1 %v1256_v63, %s1450_s11  ;;  %863 = vrot.lane.b32.xlu0 %v1766_v61, %s1435_s15  ;;  %s1454_s15 = smov 110  }
  0xfc   : > { %712 = vrot.lane.b32.xlu1 %v1256_v63, %s1451_s14  ;;  %708 = vrot.lane.b32.xlu0 %v1256_v63, %s1452_s22 }
 0x100   : > { %769 = vrot.lane.b32.xlu1 %v1262_v55, %s1929_s25  ;;  %765 = vrot.lane.b32.xlu0 %v1262_v55, %s1438_s23  ;;  %s1455_s25 = smov 111  }
 0x104   : > { %873 = vrot.lane.b32.xlu1 %v1272_v0, %s1439_s24  ;;  %817 = vrot.lane.b32.xlu0 %v1266_v1, %s1450_s11 }
 0x108   : > { %721 = vrot.lane.b32.xlu1 %v1259_v2, %s1453_s13  ;;  %877 = vrot.lane.b32.xlu0 %v1272_v0, %s1438_s23 }
 0x10c   : > { %730 = vrot.lane.b32.xlu1 %v1259_v2, %s1454_s15  ;;  %726 = vrot.lane.b32.xlu0 %v1259_v2, %s1455_s25 }
 0x110   : > { %783 = vrot.lane.b32.xlu1 %v1263_v57, %s1443_s28  ;;  %779 = vrot.lane.b32.xlu0 %v1263_v57, %s1441_s26 }
 0x114   : > { %887 = vrot.lane.b32.xlu1 %v1273_v3, %s1442_s27  ;;  %834 = vrot.lane.b32.xlu0 %v1269_v4, %s1453_s13 }
 0x118   : > { %793 = vrot.lane.b32.xlu1 %v1264_v59, %s1444_s29  ;;  %891 = vrot.lane.b32.xlu0 %v1273_v3, %s1441_s26 }
 0x11c   : > { %901 = vrot.lane.b32.xlu1 %v1274_v6, %s1445_s30  ;;  %797 = vrot.lane.b32.xlu0 %v1264_v59, %s1446_s5 }
 0x120   : > { %807 = vrot.lane.b32.xlu1 %v1265_v62, %s1449_s10  ;;  %905 = vrot.lane.b32.xlu0 %v1274_v6, %s1444_s29 }
 0x124   : > { %915 = vrot.lane.b32.xlu1 %v1275_v7, %s1447_s7  ;;  %811 = vrot.lane.b32.xlu0 %v1265_v62, %s1448_s8 }
 0x128   : > { %821 = vrot.lane.b32.xlu1 %v1266_v1, %s1452_s22  ;;  %919 = vrot.lane.b32.xlu0 %v1275_v7, %s1449_s10 }
 0x12c   : > { %853 = vrot.lane.b32.xlu1 %v1729_v52, %s1436_s16  ;;  %825 = vrot.lane.b32.xlu0 %v1266_v1, %s1451_s14  ;;  %s1930_s16 = smov 14  }
 0x130   : > { %933 = vrot.lane.b32.xlu1 %v1276_v8, %s1452_s22  ;;  %929 = vrot.lane.b32.xlu0 %v1276_v8, %s1450_s11 }
 0x132   : > { %v614_v9 = vpop.permute.xlu1 %613  ;;  %v601_v10 = vpop.permute.xlu0 %600 }
 0x133   : > { %617 = vst.msk [vmem:[#allocation3] sm:$0xf] %vm616_vm8, %v614_v9 }
 0x134   : > { %603 = vst.msk [vmem:[#allocation3 + $0x4] sm:$0xf] %vm597_vm7, %v601_v10  ;;  %842 = vrot.lane.b32.xlu1 %v1269_v4, %s1454_s15  ;;  %838 = vrot.lane.b32.xlu0 %v1269_v4, %s1455_s25 }
 0x136   : > { %v619_v12 = vpop.permute.xlu1 %618  ;;  %v605_v13 = vpop.permute.xlu0 %604 }
 0x137   : > { %621 = vst.msk [vmem:[#allocation3 + $0x4] sm:$0xf] %vm616_vm8, %v619_v12 }
 0x138   : > { %607 = vst.msk [vmem:[#allocation3 + $0x8] sm:$0xf] %vm597_vm7, %v605_v13  ;;  %867 = vrot.lane.b32.xlu0 %v1766_v61, %s1930_s16  ;;  %946 = vrot.lane.b32.xlu1 %v1279_v11, %s1453_s13 }
 0x13a   : > { %v748_v14 = vpop.permute.xlu1 %747  ;;  %v623_v15 = vpop.permute.xlu0 %622 }
 0x13b   : > { %750 = vst.msk [vmem:[#allocation3 + $0xc] sm:$0xf] %vm616_vm8, %v748_v14  ;;  %625 = vst.msk [vmem:[#allocation3 + $0x8] sm:$0xf] %vm616_vm8, %v623_v15 }
 0x13c   : > { %950 = vrot.lane.b32.xlu0 %v1279_v11, %s1455_s25  ;;  %881 = vrot.lane.b32.xlu1 %v1272_v0, %s1931_s12 }
 0x13e   : > { %v637_v16 = vpop.permute.xlu1 %636  ;;  %v632_v17 = vpop.permute.xlu0 %631 }
 0x13f   : > { %639 = vst.msk [vmem:[#allocation3 + $0x4] sm:$0xf] %vm634_vm9, %v637_v16  ;;  %635 = vst.msk [vmem:[#allocation3] sm:$0xf] %vm634_vm9, %v632_v17 }
 0x140   : > { %895 = vrot.lane.b32.xlu0 %v1273_v3, %s1443_s28  ;;  %909 = vrot.lane.b32.xlu1 %v1274_v6, %s1446_s5 }
 0x142   : > { %v762_v18 = vpop.permute.xlu1 %761  ;;  %v641_v19 = vpop.permute.xlu0 %640 }
 0x143   : > { %764 = vst.msk [vmem:[#allocation3 + $0xc] sm:$0xf] %vm634_vm9, %v762_v18  ;;  %643 = vst.msk [vmem:[#allocation3 + $0x8] sm:$0xf] %vm634_vm9, %v641_v19 }
 0x144   : > { %923 = vrot.lane.b32.xlu0 %v1275_v7, %s1448_s8  ;;  %937 = vrot.lane.b32.xlu1 %v1276_v8, %s1451_s14 }
 0x146   : > { %v655_v23 = vpop.permute.xlu1 %654  ;;  %v650_v24 = vpop.permute.xlu0 %649 }
 0x147   : > { %657 = vst.msk [vmem:[#allocation3 + $0x4] sm:$0xf] %vm652_vm11, %v655_v23  ;;  %653 = vst.msk [vmem:[#allocation3] sm:$0xf] %vm652_vm11, %v650_v24 }
 0x148   : > { %954 = vrot.lane.b32.xlu0 %v1279_v11, %s1454_s15  ;;  %967 = vperm.xlu1 %1389, %v964_v22  }
 0x14a   : > { %v776_v25 = vpop.permute.xlu1 %775  ;;  %v659_v26 = vpop.permute.xlu0 %658 }
 0x14b   : > { %778 = vst.msk [vmem:[#allocation3 + $0xc] sm:$0xf] %vm652_vm11, %v776_v25  ;;  %661 = vst.msk [vmem:[#allocation3 + $0x8] sm:$0xf] %vm652_vm11, %v659_v26  ;;  %v958_v25 = vld [vmem:[%s1924_s1] sm:$0xff] }
 0x14e   : > { %v673_v27 = vpop.permute.xlu1 %672  ;;  %v668_v28 = vpop.permute.xlu0 %667 }
 0x14f   : > { %675 = vst.msk [vmem:[#allocation3 + $0x4] sm:$0xf] %vm670_vm12, %v673_v27  ;;  %671 = vst.msk [vmem:[#allocation3] sm:$0xf] %vm670_vm12, %v668_v28 }
 0x152   : > { %v738_v29 = vpop.permute.xlu1 %737  ;;  %v677_v30 = vpop.permute.xlu0 %676 }
 0x153   : > { %740 = vst.msk [vmem:[#allocation3 + $0x10] sm:$0xf] %vm597_vm7, %v738_v29 }
 0x154   : > { %679 = vst.msk [vmem:[#allocation3 + $0x8] sm:$0xf] %vm670_vm12, %v677_v30 }
 0x156   : > { %v790_v31 = vpop.permute.xlu1 %789  ;;  %v742_v32 = vpop.permute.xlu0 %741 }
 0x157   : > { %792 = vst.msk [vmem:[#allocation3 + $0xc] sm:$0xf] %vm670_vm12, %v790_v31 }
 0x158   : > { %744 = vst.msk [vmem:[#allocation3 + $0x14] sm:$0xf] %vm597_vm7, %v742_v32 }
 0x15a   : > { %v686_v33 = vpop.permute.xlu1 %685  ;;  %v850_v34 = vpop.permute.xlu0 %849 }
 0x15b   : > { %689 = vst.msk [vmem:[#allocation3] sm:$0xf] %vm688_vm13, %v686_v33 }
 0x15c   : > { %852 = vst.msk [vmem:[#allocation3 + $0x1c] sm:$0xf] %vm597_vm7, %v850_v34 }
 0x15e   : > { %v695_v35 = vpop.permute.xlu1 %694  ;;  %v691_v36 = vpop.permute.xlu0 %690 }
 0x15f   : > { %697 = vst.msk [vmem:[#allocation3 + $0x8] sm:$0xf] %vm688_vm13, %v695_v35  ;;  %693 = vst.msk [vmem:[#allocation3 + $0x4] sm:$0xf] %vm688_vm13, %v691_v36 }
 0x162   : > { %v756_v37 = vpop.permute.xlu1 %755  ;;  %v752_v38 = vpop.permute.xlu0 %751 }
 0x163   : > { %758 = vst.msk [vmem:[#allocation3 + $0x14] sm:$0xf] %vm616_vm8, %v756_v37  ;;  %754 = vst.msk [vmem:[#allocation3 + $0x10] sm:$0xf] %vm616_vm8, %v752_v38 }
 0x166   : > { %v860_v39 = vpop.permute.xlu1 %859  ;;  %v804_v40 = vpop.permute.xlu0 %803 }
 0x167   : > { %862 = vst.msk [vmem:[#allocation3 + $0x18] sm:$0xf] %vm616_vm8, %v860_v39 }
 0x168   : > { %806 = vst.msk [vmem:[#allocation3 + $0xc] sm:$0xf] %vm688_vm13, %v804_v40 }
 0x16a   : > { %v704_v41 = vpop.permute.xlu1 %703  ;;  %v864_v42 = vpop.permute.xlu0 %863 }
 0x16b   : > { %707 = vst.msk [vmem:[#allocation3] sm:$0xf] %vm706_vm14, %v704_v41 }
 0x16c   : > { %866 = vst.msk [vmem:[#allocation3 + $0x1c] sm:$0xf] %vm616_vm8, %v864_v42 }
 0x16e   : > { %v713_v43 = vpop.permute.xlu1 %712  ;;  %v709_v44 = vpop.permute.xlu0 %708 }
 0x16f   : > { %715 = vst.msk [vmem:[#allocation3 + $0x8] sm:$0xf] %vm706_vm14, %v713_v43  ;;  %711 = vst.msk [vmem:[#allocation3 + $0x4] sm:$0xf] %vm706_vm14, %v709_v44 }
 0x172   : > { %v770_v45 = vpop.permute.xlu1 %769  ;;  %v766_v46 = vpop.permute.xlu0 %765 }
 0x173   : > { %772 = vst.msk [vmem:[#allocation3 + $0x14] sm:$0xf] %vm634_vm9, %v770_v45  ;;  %768 = vst.msk [vmem:[#allocation3 + $0x10] sm:$0xf] %vm634_vm9, %v766_v46 }
 0x176   : > { %v874_v47 = vpop.permute.xlu1 %873  ;;  %v818_v48 = vpop.permute.xlu0 %817 }
 0x177   : > { %876 = vst.msk [vmem:[#allocation3 + $0x18] sm:$0xf] %vm634_vm9, %v874_v47 }
 0x178   : > { %820 = vst.msk [vmem:[#allocation3 + $0xc] sm:$0xf] %vm706_vm14, %v818_v48 }
 0x17a   : > { %v722_v49 = vpop.permute.xlu1 %721  ;;  %v878_v50 = vpop.permute.xlu0 %877 }
 0x17b   : > { %725 = vst.msk [vmem:[#allocation3] sm:$0xf] %vm724_vm15, %v722_v49 }
 0x17c   : > { %880 = vst.msk [vmem:[#allocation3 + $0x1c] sm:$0xf] %vm634_vm9, %v878_v50 }
 0x17e   : > { %v731_v51 = vpop.permute.xlu1 %730  ;;  %v727_v52 = vpop.permute.xlu0 %726 }
 0x17f   : > { %733 = vst.msk [vmem:[#allocation3 + $0x8] sm:$0xf] %vm724_vm15, %v731_v51  ;;  %729 = vst.msk [vmem:[#allocation3 + $0x4] sm:$0xf] %vm724_vm15, %v727_v52 }
 0x182   : > { %v784_v53 = vpop.permute.xlu1 %783  ;;  %v780_v54 = vpop.permute.xlu0 %779 }
 0x183   : > { %786 = vst.msk [vmem:[#allocation3 + $0x14] sm:$0xf] %vm652_vm11, %v784_v53  ;;  %782 = vst.msk [vmem:[#allocation3 + $0x10] sm:$0xf] %vm652_vm11, %v780_v54 }
 0x186   : > { %v888_v55 = vpop.permute.xlu1 %887  ;;  %v835_v56 = vpop.permute.xlu0 %834  ;;  %v959_v61 = vld [vmem:[#allocation3] sm:$0xff] }
 0x187   : > { %890 = vst.msk [vmem:[#allocation3 + $0x18] sm:$0xf] %vm652_vm11, %v888_v55 }
 0x188   : > { %837 = vst.msk [vmem:[#allocation3 + $0xc] sm:$0xf] %vm724_vm15, %v835_v56 }
 0x18a   : > { %v794_v57 = vpop.permute.xlu1 %793  ;;  %v892_v58 = vpop.permute.xlu0 %891 }
 0x18b   : > { %796 = vst.msk [vmem:[#allocation3 + $0x10] sm:$0xf] %vm670_vm12, %v794_v57 }
 0x18c   : > { %894 = vst.msk [vmem:[#allocation3 + $0x1c] sm:$0xf] %vm652_vm11, %v892_v58 }
 0x18e   : > { %v902_v59 = vpop.permute.xlu1 %901  ;;  %v798_v60 = vpop.permute.xlu0 %797 }
 0x18f   : > { %v960_v62 = vld [vmem:[#allocation3 + $0x8] sm:$0xff]  ;;  %904 = vst.msk [vmem:[#allocation3 + $0x18] sm:$0xf] %vm670_vm12, %v902_v59  ;;  %800 = vst.msk [vmem:[#allocation3 + $0x14] sm:$0xf] %vm670_vm12, %v798_v60 }
 0x190   : > { %v1315_v63 = vpack.c.bf16 %v960_v62, %v959_v61 }
 0x192   : > { %1316 = vmatpush3.bf16.msra.mxu0 %v1315_v63  ;;  %v808_v0 = vpop.permute.xlu1 %807  ;;  %v906_v1 = vpop.permute.xlu0 %905 }
 0x193   : > { %1317 = vmatprep.subr.bf16.mxu0 %v1456_v5  ;;  %810 = vst.msk [vmem:[#allocation3 + $0x10] sm:$0xf] %vm688_vm13, %v808_v0 }
 0x194   : > { %908 = vst.msk [vmem:[#allocation3 + $0x1c] sm:$0xf] %vm670_vm12, %v906_v1 }
 0x196   : > { %v916_v2 = vpop.permute.xlu1 %915  ;;  %v812_v3 = vpop.permute.xlu0 %811 }
 0x197   : > { %918 = vst.msk [vmem:[#allocation3 + $0x18] sm:$0xf] %vm688_vm13, %v916_v2  ;;  %814 = vst.msk [vmem:[#allocation3 + $0x14] sm:$0xf] %vm688_vm13, %v812_v3 }
 0x19a   : > { %v822_v4 = vpop.permute.xlu1 %821  ;;  %v920_v6 = vpop.permute.xlu0 %919 }
 0x19b   : > { %824 = vst.msk [vmem:[#allocation3 + $0x10] sm:$0xf] %vm706_vm14, %v822_v4 }
 0x19c   : > { %922 = vst.msk [vmem:[#allocation3 + $0x1c] sm:$0xf] %vm688_vm13, %v920_v6 }
 0x19e   : > { %v854_v7 = vpop.permute.xlu1 %853  ;;  %v826_v8 = vpop.permute.xlu0 %825 }
 0x19f   : > { %856 = vst.msk [vmem:[#allocation3 + $0x20] sm:$0xf] %vm597_vm7, %v854_v7 }
 0x1a0   : > { %828 = vst.msk [vmem:[#allocation3 + $0x14] sm:$0xf] %vm706_vm14, %v826_v8 }
 0x1a2   : > { %v934_v5 = vpop.permute.xlu1 %933  ;;  %v930_v9 = vpop.permute.xlu0 %929 }
 0x1a3   : > { %936 = vst.msk [vmem:[#allocation3 + $0x1c] sm:$0xf] %vm706_vm14, %v934_v5  ;;  %932 = vst.msk [vmem:[#allocation3 + $0x18] sm:$0xf] %vm706_vm14, %v930_v9 }
 0x1a6   : > { %v843_v10 = vpop.permute.xlu1 %842  ;;  %v839_v11 = vpop.permute.xlu0 %838 }
 0x1a7   : > { %845 = vst.msk [vmem:[#allocation3 + $0x14] sm:$0xf] %vm724_vm15, %v843_v10  ;;  %841 = vst.msk [vmem:[#allocation3 + $0x10] sm:$0xf] %vm724_vm15, %v839_v11 }
 0x1aa   : > { %v868_v12 = vpop.permute.xlu0 %867  ;;  %v947_v13 = vpop.permute.xlu1 %946 }
 0x1ab   : > { %870 = vst.msk [vmem:[#allocation3 + $0x20] sm:$0xf] %vm616_vm8, %v868_v12 }
 0x1ac   : > { %949 = vst.msk [vmem:[#allocation3 + $0x18] sm:$0xf] %vm724_vm15, %v947_v13 }
 0x1ae   : > { %v951_v14 = vpop.permute.xlu0 %950  ;;  %v882_v15 = vpop.permute.xlu1 %881  ;;  %v961_v21 = vld [vmem:[#allocation3 + $0x10] sm:$0xff] }
 0x1af   : > { %953 = vst.msk [vmem:[#allocation3 + $0x1c] sm:$0xf] %vm724_vm15, %v951_v14 }
 0x1b0   : > { %884 = vst.msk [vmem:[#allocation3 + $0x20] sm:$0xf] %vm634_vm9, %v882_v15 }
 0x1b2   : > { %v896_v16 = vpop.permute.xlu0 %895  ;;  %v910_v17 = vpop.permute.xlu1 %909 }
 0x1b3   : > { %898 = vst.msk [vmem:[#allocation3 + $0x20] sm:$0xf] %vm652_vm11, %v896_v16 }
 0x1b4   : > { %912 = vst.msk [vmem:[#allocation3 + $0x20] sm:$0xf] %vm670_vm12, %v910_v17 }
 0x1b6   : > { %v924_v18 = vpop.permute.xlu0 %923  ;;  %v938_v19 = vpop.permute.xlu1 %937  ;;  %v962_v22 = vld [vmem:[#allocation3 + $0x18] sm:$0xff] }
 0x1b7   : > { %926 = vst.msk [vmem:[#allocation3 + $0x20] sm:$0xf] %vm688_vm13, %v924_v18  ;;  %v1318_v23 = vpack.c.bf16 %v962_v22, %v961_v21 }
 0x1b8   : > { %940 = vst.msk [vmem:[#allocation3 + $0x20] sm:$0xf] %vm706_vm14, %v938_v19 }
 0x1b9   : > { %1319 = vmatpush3.bf16.msra.mxu0 %v1318_v23 }
 0x1ba   : > { %v955_v24 = vpop.permute.xlu0 %954  ;;  %1309 = vmatprep.subr.mxu0 %v1458_v20 }
 0x1bb   : > { %957 = vst.msk [vmem:[#allocation3 + $0x20] sm:$0xf] %vm724_vm15, %v955_v24 }
 0x1c2   : > { %v963_v26 = vld [vmem:[#allocation3 + $0x20] sm:$0xf] }
 0x1c3   : > { %1310 = vmatpush3.msk.msra.mxu0 %vm974_vm0, %v963_v26 }
 0x1c4   : > { %1312 = vmatmul.mubr.msk.f32.vlgmr.msra.gmra.mrb[0].mxu0 %vm970_vm1, %v958_v25 }
 0x1c7   : > { %v968_v27 = vpop.permute.xlu1 %967 }
 0x297   : > { %v1044_v28 = vpop.f32.mrb[0].mxu0 }
 0x298   : > { %v1045_v29 = vadd.f32 %v1044_v28, %v968_v27  ;;  %v1313_v30 = vpop.f32.mrb[1].mxu0 }
 0x29a   : > { %1055 = vst [vmem:[%s1527_s6] sm:$0xff] %v1045_v29  ;;  %1048 = vadd.xlane.f32.xlu0 %v1045_v29 }
 0x327   : > { %v1049_v20 = vpop.xlane.xlu0 %1048 }
 0x328   : > { %v1050_v31 = vmul.f32 0.0078125, %v1049_v20 }
 0x32a   : > { %v1051_v32 = vsub.f32 %v1045_v29, %v1050_v31  ;;  %1057 = vst.msk [vmem:[%s1532_s9] sm:$0xff] %vm1056_vm2, %v1050_v31 }
 0x32c   : > { %v1052_v33 = vmul.f32 %v1051_v32, %v1051_v32 }
 0x32e   : > { %1053 = vadd.xlane.f32.xlu1 %v1052_v33 }
 0x3bb   : > { %v1054_v34 = vpop.xlane.xlu1 %1053 }
 0x3bc   : > { %1059 = vst.msk [vmem:[%s1532_s9] sm:$0xff] %vm1058_vm3, %v1054_v34 }
 0x3bd PF: > { %s15_s19 = sadd.s32 1, %s1429_s19   ;;  %s1932_s15 = smov %s1421_s17 }
 0x3be   : > { %p12_p8 = scmp.ge.s32.totalorder %s15_s19, 6   ;;  %s1933_s16 = smov %s1425_s18 }
 0x3bf   : > { %s1934_s17 = smov %s1937_s20  ;;  %s1935_s18 = smov %s1941_s21 }
 0x3c0   :  { %14 = sbr.rel (!%p12_p8) target bundleno = 3 (0x3), region = 105 }

</bundles_post_ra>
